<compile_context>
chip_gen: v6e
topology: v6e:2x2x1
jax: 0.10.0
libtpu: 0.0.40
codegen_flags: <defaults>
</compile_context>

<pallas_src>
import jax
import jax.numpy as jnp
from jax import lax
from jax.experimental import pallas as pl
from jax.experimental.pallas import tpu as pltpu


def _resnet_block_kernel(x_ref, w1_ref, b1_ref, w2_ref, b2_ref, o_ref, slab_ref):
    # x_ref:    (H, W, C)     f32   full input image (also the residual)
    # w*_ref:   (3C, 3C)      bf16  row = kw*C + cin, col = kh*C + cout
    # b*_ref:   (1, C)        f32
    # o_ref:    (Ht, W, C)    f32   output rows of the current row tile
    # slab_ref: (H+2, W, 3C)  bf16  dw-shifted, vertically reflect-padded im2col slab
    H, W, C = x_ref.shape
    Ht = o_ref.shape[0]
    HtW = Ht * W
    t = pl.program_id(1)

    def build_slab(img_f32):
        # Vertically reflect-padded image (cast to bf16 exactly once) goes into the
        # centre lane block; the +-1 horizontal taps are built from it.
        img = img_f32.astype(jnp.bfloat16)                         # (H, W, C)
        slab_ref[1:H + 1, :, C:2 * C] = img                        # aligned interior
        slab_ref[0:1, :, C:2 * C] = img[1:2]                       # top reflect    <- row 1
        slab_ref[H + 1:H + 2, :, C:2 * C] = img[H - 2:H - 1]       # bottom reflect <- row H-2
        v = slab_ref[:, :, C:2 * C]                                # (H+2, W, C) bf16
        # left tap (dw=0): columns shifted right by 1; left edge reflects column 1
        slab_ref[:, 1:W, 0:C] = v[:, 0:W - 1, :]
        slab_ref[:, 0:1, 0:C] = v[:, 1:2, :]
        # right tap (dw=2): columns shifted left by 1; right edge reflects column W-2
        slab_ref[:, 0:W - 1, 2 * C:3 * C] = v[:, 1:W, :]
        slab_ref[:, W - 1:W, 2 * C:3 * C] = v[:, W - 2:W - 1, :]

    def conv3x3(w_ref, slab_rows, n_rows):
        # slab_rows: ((n_rows+2)*W, 3C) bf16.  One deep dot (K=3C, N=3C), then the
        # 3 vertical taps are combined with aligned row/lane-block shifted adds.
        y = jnp.dot(slab_rows, w_ref[...], preferred_element_type=jnp.float32)
        n = n_rows * W
        return (y[0:n, 0:C]
                + y[W:n + W, C:2 * C]
                + y[2 * W:n + 2 * W, 2 * C:3 * C])                 # (n_rows*W, C) f32

    # ---- once per image: conv1 -> bias -> ReLU -> rebuild slab from intermediate ----
    @pl.when(t == 0)
    def _():
        build_slab(x_ref[...])
        h = jnp.maximum(
            conv3x3(w1_ref, slab_ref[...].reshape((H + 2) * W, 3 * C), H) + b1_ref[0],
            0.0)                                                   # (H*W, C) f32
        # TODO(synk): nn.Dropout(0.5) is stochastic in train mode; eval-mode identity used.
        build_slab(h.reshape(H, W, C))

    # ---- per row tile: conv2 -> bias -> residual -> store ----
    r0 = pl.multiple_of(t * Ht, Ht)
    y2 = conv3x3(w2_ref,
                 slab_ref[pl.ds(r0, Ht + 2)].reshape((Ht + 2) * W, 3 * C),
                 Ht)
    out = y2 + b2_ref[0] + x_ref[pl.ds(r0, Ht)].reshape(HtW, C)
    o_ref[...] = out.reshape(Ht, W, C).astype(o_ref.dtype)


def resnet_block_forward(x_nchw, w1, b1, w2, b2, *, row_tiles=2):
    """x_nchw: (B, C, H, W) f32; w*: (Cout, Cin, 3, 3); b*: (C,)."""
    B, C, H, W = x_nchw.shape
    assert C % 128 == 0 and W % 8 == 0 and H % row_tiles == 0 and H // row_tiles >= 1
    Ht = H // row_tiles
    x = jnp.transpose(x_nchw, (0, 2, 3, 1)).astype(jnp.float32)    # NHWC

    def prep_w(w):
        # (cout, cin, kh, kw) -> (kw, cin, kh, cout) -> (3C, 3C) bf16:
        # K axis = kw*C + cin (matches the slab lane blocks), N axis = kh*C + cout.
        return jnp.transpose(w, (3, 1, 2, 0)).reshape(3 * C, 3 * C).astype(jnp.bfloat16)

    w1k, w2k = prep_w(w1), prep_w(w2)
    b1k = b1.reshape(1, C).astype(jnp.float32)
    b2k = b2.reshape(1, C).astype(jnp.float32)

    # NOTE(v7x): per-image footprint here is ~1.3 MiB (slab + blocks + weights), far
    # under the 32 MiB scoped VMEM; for production H/W shrink Ht (and raise row_tiles)
    # before raising vmem_limit_bytes, leaving headroom for the double buffers.
    out_nhwc = pl.pallas_call(
        _resnet_block_kernel,
        out_shape=jax.ShapeDtypeStruct((B, H, W, C), jnp.float32),
        grid_spec=pltpu.PrefetchScalarGridSpec(
            num_scalar_prefetch=0,
            grid=(B, row_tiles),
            in_specs=[
                pl.BlockSpec((None, H, W, C), lambda b, t: (b, 0, 0, 0)),   # resident per b
                pl.BlockSpec((3 * C, 3 * C), lambda b, t: (0, 0)),
                pl.BlockSpec((1, C), lambda b, t: (0, 0)),
                pl.BlockSpec((3 * C, 3 * C), lambda b, t: (0, 0)),
                pl.BlockSpec((1, C), lambda b, t: (0, 0)),
            ],
            out_specs=pl.BlockSpec((None, Ht, W, C), lambda b, t: (b, t, 0, 0)),
            scratch_shapes=[
                pltpu.VMEM((H + 2, W, 3 * C), jnp.bfloat16),       # dw-folded bf16 slab
            ],
        ),
        compiler_params=pltpu.CompilerParams(
            dimension_semantics=("parallel", "arbitrary"),
            vmem_limit_bytes=32 * 1024 * 1024,
        ),
    )(x, w1k, b1k, w2k, b2k)
    return jnp.transpose(out_nhwc, (0, 3, 1, 2))                   # back to NCHW


def reference_forward(x, w1, b1, w2, b2):
    """Pure-JAX reference (NCHW, lax.conv) with the same bf16-operand / f32-acc
    numerics as the kernel's MXU path."""
    def conv3x3_reflect(inp, w, b):
        inp_p = jnp.pad(inp, ((0, 0), (0, 0), (1, 1), (1, 1)), mode="reflect")
        y = lax.conv_general_dilated(
            inp_p.astype(jnp.bfloat16), w.astype(jnp.bfloat16),
            window_strides=(1, 1), padding="VALID",
            dimension_numbers=("NCHW", "OIHW", "NCHW"),
            preferred_element_type=jnp.float32)
        return y + b.reshape(1, -1, 1, 1)

    h = jnp.maximum(conv3x3_reflect(x, w1, b1), 0.0)
    return x + conv3x3_reflect(h, w2, b2)


if __name__ == "__main__":
    # ResnetBlock(dim=128, padding_type='reflect', use_dropout=False)
    B, C, H, W = 2, 128, 16, 16
    key = jax.random.PRNGKey(0)
    kx, kw1, kb1, kw2, kb2 = jax.random.split(key, 5)

    x = jax.random.normal(kx, (B, C, H, W), jnp.float32)
    w1 = jax.random.normal(kw1, (C, C, 3, 3), jnp.float32) * 0.05
    b1 = jax.random.normal(kb1, (C,), jnp.float32) * 0.05
    w2 = jax.random.normal(kw2, (C, C, 3, 3), jnp.float32) * 0.05
    b2 = jax.random.normal(kb2, (C,), jnp.float32) * 0.05

    out = jax.block_until_ready(resnet_block_forward(x, w1, b1, w2, b2))
    ref = jax.block_until_ready(reference_forward(x, w1, b1, w2, b2))

    assert out.shape == (B, C, H, W) and out.dtype == jnp.float32
    assert jnp.allclose(out, ref, rtol=1e-2, atol=1e-2), (
        f"max abs err {float(jnp.max(jnp.abs(out - ref)))}")

    print("KERNEL_OK")
</pallas_src>

<mosaic_0001>
module attributes {stable_mosaic.version = 11 : i64} {
  func.func @_resnet_block_kernel(%arg0: i32, %arg1: i32, %arg2: memref<1x16x16x128xf32, #tpu.memory_space<vmem>>, %arg3: memref<384x384xbf16, #tpu.memory_space<vmem>>, %arg4: memref<1x128xf32, #tpu.memory_space<vmem>>, %arg5: memref<384x384xbf16, #tpu.memory_space<vmem>>, %arg6: memref<1x128xf32, #tpu.memory_space<vmem>>, %arg7: memref<1x8x16x128xf32, #tpu.memory_space<vmem>>, %arg8: memref<18x16x384xbf16, #tpu.memory_space<vmem>>) attributes {dimension_semantics = [#tpu.dimension_semantics<parallel>, #tpu.dimension_semantics<arbitrary>], iteration_bounds = array<i64: 2, 2>, scalar_prefetch = 0 : i64, scratch_operands = 1 : i64, tpu.core_type = #tpu.core_type<tc>, window_params = [{transform_indices = @transform_0, window_bounds = array<i64: 1, 16, 16, 128>}, {pipeline_mode = #tpu.pipeline_mode<synchronous>, transform_indices = @transform_1, window_bounds = array<i64: 384, 384>}, {pipeline_mode = #tpu.pipeline_mode<synchronous>, transform_indices = @transform_2, window_bounds = array<i64: 1, 128>}, {pipeline_mode = #tpu.pipeline_mode<synchronous>, transform_indices = @transform_3, window_bounds = array<i64: 384, 384>}, {pipeline_mode = #tpu.pipeline_mode<synchronous>, transform_indices = @transform_4, window_bounds = array<i64: 1, 128>}, {transform_indices = @transform_5, window_bounds = array<i64: 1, 8, 16, 128>}]} {
    %c0_i32 = arith.constant 0 : i32
    %0 = arith.cmpi eq, %arg1, %c0_i32 : i32
    %1 = arith.extui %0 : i1 to i32
    %c0_i32_0 = arith.constant 0 : i32
    %2 = arith.cmpi ne, %1, %c0_i32_0 : i32
    scf.if %2 {
      %c0_13 = arith.constant 0 : index
      %c0_14 = arith.constant 0 : index
      %c0_15 = arith.constant 0 : index
      %c0_16 = arith.constant 0 : index
      %29 = vector.load %arg2[%c0_13, %c0_14, %c0_15, %c0_16] : memref<1x16x16x128xf32, #tpu.memory_space<vmem>>, vector<1x16x16x128xf32>
      %30 = vector.shape_cast %29 : vector<1x16x16x128xf32> to vector<16x16x128xf32>
      %31 = arith.truncf %30 : vector<16x16x128xf32> to vector<16x16x128xbf16>
      %c1 = arith.constant 1 : index
      %c0_17 = arith.constant 0 : index
      %c128 = arith.constant 128 : index
      %32 = vector.load %arg8[%c1, %c0_17, %c128] : memref<18x16x384xbf16, #tpu.memory_space<vmem>>, vector<16x16x128xbf16>
      tpu.vector_store %arg8[%c1, %c0_17, %c128], %31 {strides = array<i32>} : memref<18x16x384xbf16, #tpu.memory_space<vmem>>, vector<16x16x128xbf16>,
      %33 = vector.extract_strided_slice %31 {offsets = [1, 0, 0], sizes = [1, 16, 128], strides = [1, 1, 1]} : vector<16x16x128xbf16> to vector<1x16x128xbf16>
      %c0_18 = arith.constant 0 : index
      %c0_19 = arith.constant 0 : index
      %c128_20 = arith.constant 128 : index
      %34 = vector.load %arg8[%c0_18, %c0_19, %c128_20] : memref<18x16x384xbf16, #tpu.memory_space<vmem>>, vector<1x16x128xbf16>
      tpu.vector_store %arg8[%c0_18, %c0_19, %c128_20], %33 {strides = array<i32>} : memref<18x16x384xbf16, #tpu.memory_space<vmem>>, vector<1x16x128xbf16>,
      %35 = vector.extract_strided_slice %31 {offsets = [14, 0, 0], sizes = [1, 16, 128], strides = [1, 1, 1]} : vector<16x16x128xbf16> to vector<1x16x128xbf16>
      %c17 = arith.constant 17 : index
      %c0_21 = arith.constant 0 : index
      %c128_22 = arith.constant 128 : index
      %36 = vector.load %arg8[%c17, %c0_21, %c128_22] : memref<18x16x384xbf16, #tpu.memory_space<vmem>>, vector<1x16x128xbf16>
      tpu.vector_store %arg8[%c17, %c0_21, %c128_22], %35 {strides = array<i32>} : memref<18x16x384xbf16, #tpu.memory_space<vmem>>, vector<1x16x128xbf16>,
      %c0_23 = arith.constant 0 : index
      %c0_24 = arith.constant 0 : index
      %c128_25 = arith.constant 128 : index
      %37 = vector.load %arg8[%c0_23, %c0_24, %c128_25] : memref<18x16x384xbf16, #tpu.memory_space<vmem>>, vector<18x16x128xbf16>
      %38 = vector.extract_strided_slice %37 {offsets = [0, 0, 0], sizes = [18, 15, 128], strides = [1, 1, 1]} : vector<18x16x128xbf16> to vector<18x15x128xbf16>
      %c0_26 = arith.constant 0 : index
      %c1_27 = arith.constant 1 : index
      %c0_28 = arith.constant 0 : index
      %39 = vector.load %arg8[%c0_26, %c1_27, %c0_28] : memref<18x16x384xbf16, #tpu.memory_space<vmem>>, vector<18x15x128xbf16>
      tpu.vector_store %arg8[%c0_26, %c1_27, %c0_28], %38 {strides = array<i32>} : memref<18x16x384xbf16, #tpu.memory_space<vmem>>, vector<18x15x128xbf16>,
      %40 = vector.extract_strided_slice %37 {offsets = [0, 1, 0], sizes = [18, 1, 128], strides = [1, 1, 1]} : vector<18x16x128xbf16> to vector<18x1x128xbf16>
      %c0_29 = arith.constant 0 : index
      %c0_30 = arith.constant 0 : index
      %c0_31 = arith.constant 0 : index
      %41 = vector.load %arg8[%c0_29, %c0_30, %c0_31] : memref<18x16x384xbf16, #tpu.memory_space<vmem>>, vector<18x1x128xbf16>
      tpu.vector_store %arg8[%c0_29, %c0_30, %c0_31], %40 {strides = array<i32>} : memref<18x16x384xbf16, #tpu.memory_space<vmem>>, vector<18x1x128xbf16>,
      %42 = vector.extract_strided_slice %37 {offsets = [0, 1, 0], sizes = [18, 15, 128], strides = [1, 1, 1]} : vector<18x16x128xbf16> to vector<18x15x128xbf16>
      %c0_32 = arith.constant 0 : index
      %c0_33 = arith.constant 0 : index
      %c256 = arith.constant 256 : index
      %43 = vector.load %arg8[%c0_32, %c0_33, %c256] : memref<18x16x384xbf16, #tpu.memory_space<vmem>>, vector<18x15x128xbf16>
      tpu.vector_store %arg8[%c0_32, %c0_33, %c256], %42 {strides = array<i32>} : memref<18x16x384xbf16, #tpu.memory_space<vmem>>, vector<18x15x128xbf16>,
      %44 = vector.extract_strided_slice %37 {offsets = [0, 14, 0], sizes = [18, 1, 128], strides = [1, 1, 1]} : vector<18x16x128xbf16> to vector<18x1x128xbf16>
      %c0_34 = arith.constant 0 : index
      %c15 = arith.constant 15 : index
      %c256_35 = arith.constant 256 : index
      %45 = vector.load %arg8[%c0_34, %c15, %c256_35] : memref<18x16x384xbf16, #tpu.memory_space<vmem>>, vector<18x1x128xbf16>
      tpu.vector_store %arg8[%c0_34, %c15, %c256_35], %44 {strides = array<i32>} : memref<18x16x384xbf16, #tpu.memory_space<vmem>>, vector<18x1x128xbf16>,
      %c0_36 = arith.constant 0 : index
      %c0_37 = arith.constant 0 : index
      %c0_38 = arith.constant 0 : index
      %46 = vector.load %arg8[%c0_36, %c0_37, %c0_38] : memref<18x16x384xbf16, #tpu.memory_space<vmem>>, vector<18x16x384xbf16>
      %47 = vector.shape_cast %46 : vector<18x16x384xbf16> to vector<288x384xbf16>
      %c0_39 = arith.constant 0 : index
      %c0_40 = arith.constant 0 : index
      %48 = vector.load %arg3[%c0_39, %c0_40] : memref<384x384xbf16, #tpu.memory_space<vmem>>, vector<384x384xbf16>
      %cst_41 = arith.constant dense<0.000000e+00> : vector<288x384xf32>
      %49 = tpu.matmul %47, %48, %cst_41 {dimension_numbers = #tpu.dot_dimension_numbers<[1], [0], [0], [1], [0, 0, 1, 1], [], []>} : vector<288x384xbf16>, vector<384x384xbf16>, vector<288x384xf32> -> vector<288x384xf32>
      %50 = vector.extract_strided_slice %49 {offsets = [0, 0], sizes = [256, 128], strides = [1, 1]} : vector<288x384xf32> to vector<256x128xf32>
      %51 = vector.extract_strided_slice %49 {offsets = [16, 128], sizes = [256, 128], strides = [1, 1]} : vector<288x384xf32> to vector<256x128xf32>
      %52 = arith.addf %50, %51 : vector<256x128xf32>
      %53 = vector.extract_strided_slice %49 {offsets = [32, 256], sizes = [256, 128], strides = [1, 1]} : vector<288x384xf32> to vector<256x128xf32>
      %54 = arith.addf %52, %53 : vector<256x128xf32>
      %c0_42 = arith.constant 0 : index
      %c0_43 = arith.constant 0 : index
      %55 = vector.load %arg4[%c0_42, %c0_43] : memref<1x128xf32, #tpu.memory_space<vmem>>, vector<1x128xf32>
      %56 = vector.shape_cast %55 : vector<1x128xf32> to vector<128xf32>
      %57 = vector.shape_cast %56 : vector<128xf32> to vector<1x128xf32>
      %58 = vector.broadcast %57 : vector<1x128xf32> to vector<256x128xf32>
      %59 = arith.addf %54, %58 : vector<256x128xf32>
      %cst_44 = arith.constant 0.000000e+00 : f32
      %60 = vector.broadcast %cst_44 : f32 to vector<256x128xf32>
      %61 = arith.maximumf %59, %60 : vector<256x128xf32>
      %62 = vector.shape_cast %61 : vector<256x128xf32> to vector<16x16x128xf32>
      %63 = arith.truncf %62 : vector<16x16x128xf32> to vector<16x16x128xbf16>
      %c1_45 = arith.constant 1 : index
      %c0_46 = arith.constant 0 : index
      %c128_47 = arith.constant 128 : index
      %64 = vector.load %arg8[%c1_45, %c0_46, %c128_47] : memref<18x16x384xbf16, #tpu.memory_space<vmem>>, vector<16x16x128xbf16>
      tpu.vector_store %arg8[%c1_45, %c0_46, %c128_47], %63 {strides = array<i32>} : memref<18x16x384xbf16, #tpu.memory_space<vmem>>, vector<16x16x128xbf16>,
      %65 = vector.extract_strided_slice %63 {offsets = [1, 0, 0], sizes = [1, 16, 128], strides = [1, 1, 1]} : vector<16x16x128xbf16> to vector<1x16x128xbf16>
      %c0_48 = arith.constant 0 : index
      %c0_49 = arith.constant 0 : index
      %c128_50 = arith.constant 128 : index
      %66 = vector.load %arg8[%c0_48, %c0_49, %c128_50] : memref<18x16x384xbf16, #tpu.memory_space<vmem>>, vector<1x16x128xbf16>
      tpu.vector_store %arg8[%c0_48, %c0_49, %c128_50], %65 {strides = array<i32>} : memref<18x16x384xbf16, #tpu.memory_space<vmem>>, vector<1x16x128xbf16>,
      %67 = vector.extract_strided_slice %63 {offsets = [14, 0, 0], sizes = [1, 16, 128], strides = [1, 1, 1]} : vector<16x16x128xbf16> to vector<1x16x128xbf16>
      %c17_51 = arith.constant 17 : index
      %c0_52 = arith.constant 0 : index
      %c128_53 = arith.constant 128 : index
      %68 = vector.load %arg8[%c17_51, %c0_52, %c128_53] : memref<18x16x384xbf16, #tpu.memory_space<vmem>>, vector<1x16x128xbf16>
      tpu.vector_store %arg8[%c17_51, %c0_52, %c128_53], %67 {strides = array<i32>} : memref<18x16x384xbf16, #tpu.memory_space<vmem>>, vector<1x16x128xbf16>,
      %c0_54 = arith.constant 0 : index
      %c0_55 = arith.constant 0 : index
      %c128_56 = arith.constant 128 : index
      %69 = vector.load %arg8[%c0_54, %c0_55, %c128_56] : memref<18x16x384xbf16, #tpu.memory_space<vmem>>, vector<18x16x128xbf16>
      %70 = vector.extract_strided_slice %69 {offsets = [0, 0, 0], sizes = [18, 15, 128], strides = [1, 1, 1]} : vector<18x16x128xbf16> to vector<18x15x128xbf16>
      %c0_57 = arith.constant 0 : index
      %c1_58 = arith.constant 1 : index
      %c0_59 = arith.constant 0 : index
      %71 = vector.load %arg8[%c0_57, %c1_58, %c0_59] : memref<18x16x384xbf16, #tpu.memory_space<vmem>>, vector<18x15x128xbf16>
      tpu.vector_store %arg8[%c0_57, %c1_58, %c0_59], %70 {strides = array<i32>} : memref<18x16x384xbf16, #tpu.memory_space<vmem>>, vector<18x15x128xbf16>,
      %72 = vector.extract_strided_slice %69 {offsets = [0, 1, 0], sizes = [18, 1, 128], strides = [1, 1, 1]} : vector<18x16x128xbf16> to vector<18x1x128xbf16>
      %c0_60 = arith.constant 0 : index
      %c0_61 = arith.constant 0 : index
      %c0_62 = arith.constant 0 : index
      %73 = vector.load %arg8[%c0_60, %c0_61, %c0_62] : memref<18x16x384xbf16, #tpu.memory_space<vmem>>, vector<18x1x128xbf16>
      tpu.vector_store %arg8[%c0_60, %c0_61, %c0_62], %72 {strides = array<i32>} : memref<18x16x384xbf16, #tpu.memory_space<vmem>>, vector<18x1x128xbf16>,
      %74 = vector.extract_strided_slice %69 {offsets = [0, 1, 0], sizes = [18, 15, 128], strides = [1, 1, 1]} : vector<18x16x128xbf16> to vector<18x15x128xbf16>
      %c0_63 = arith.constant 0 : index
      %c0_64 = arith.constant 0 : index
      %c256_65 = arith.constant 256 : index
      %75 = vector.load %arg8[%c0_63, %c0_64, %c256_65] : memref<18x16x384xbf16, #tpu.memory_space<vmem>>, vector<18x15x128xbf16>
      tpu.vector_store %arg8[%c0_63, %c0_64, %c256_65], %74 {strides = array<i32>} : memref<18x16x384xbf16, #tpu.memory_space<vmem>>, vector<18x15x128xbf16>,
      %76 = vector.extract_strided_slice %69 {offsets = [0, 14, 0], sizes = [18, 1, 128], strides = [1, 1, 1]} : vector<18x16x128xbf16> to vector<18x1x128xbf16>
      %c0_66 = arith.constant 0 : index
      %c15_67 = arith.constant 15 : index
      %c256_68 = arith.constant 256 : index
      %77 = vector.load %arg8[%c0_66, %c15_67, %c256_68] : memref<18x16x384xbf16, #tpu.memory_space<vmem>>, vector<18x1x128xbf16>
      tpu.vector_store %arg8[%c0_66, %c15_67, %c256_68], %76 {strides = array<i32>} : memref<18x16x384xbf16, #tpu.memory_space<vmem>>, vector<18x1x128xbf16>,
    } else {
    }
    %c8_i32 = arith.constant 8 : i32
    %3 = arith.muli %arg1, %c8_i32 : i32
    %4 = tpu.assume_multiple %3, 8 : i32
    %5 = arith.index_cast %4 : i32 to index
    %c0 = arith.constant 0 : index
    %c0_1 = arith.constant 0 : index
    %6 = vector.load %arg8[%5, %c0, %c0_1] : memref<18x16x384xbf16, #tpu.memory_space<vmem>>, vector<10x16x384xbf16>
    %7 = vector.shape_cast %6 : vector<10x16x384xbf16> to vector<160x384xbf16>
    %c0_2 = arith.constant 0 : index
    %c0_3 = arith.constant 0 : index
    %8 = vector.load %arg5[%c0_2, %c0_3] : memref<384x384xbf16, #tpu.memory_space<vmem>>, vector<384x384xbf16>
    %cst = arith.constant dense<0.000000e+00> : vector<160x384xf32>
    %9 = tpu.matmul %7, %8, %cst {dimension_numbers = #tpu.dot_dimension_numbers<[1], [0], [0], [1], [0, 0, 1, 1], [], []>} : vector<160x384xbf16>, vector<384x384xbf16>, vector<160x384xf32> -> vector<160x384xf32>
    %10 = vector.extract_strided_slice %9 {offsets = [0, 0], sizes = [128, 128], strides = [1, 1]} : vector<160x384xf32> to vector<128x128xf32>
    %11 = vector.extract_strided_slice %9 {offsets = [16, 128], sizes = [128, 128], strides = [1, 1]} : vector<160x384xf32> to vector<128x128xf32>
    %12 = arith.addf %10, %11 : vector<128x128xf32>
    %13 = vector.extract_strided_slice %9 {offsets = [32, 256], sizes = [128, 128], strides = [1, 1]} : vector<160x384xf32> to vector<128x128xf32>
    %14 = arith.addf %12, %13 : vector<128x128xf32>
    %c0_4 = arith.constant 0 : index
    %c0_5 = arith.constant 0 : index
    %15 = vector.load %arg6[%c0_4, %c0_5] : memref<1x128xf32, #tpu.memory_space<vmem>>, vector<1x128xf32>
    %16 = vector.shape_cast %15 : vector<1x128xf32> to vector<128xf32>
    %17 = vector.shape_cast %16 : vector<128xf32> to vector<1x128xf32>
    %18 = vector.broadcast %17 : vector<1x128xf32> to vector<128x128xf32>
    %19 = arith.addf %14, %18 : vector<128x128xf32>
    %c0_6 = arith.constant 0 : index
    %20 = arith.index_cast %4 : i32 to index
    %c0_7 = arith.constant 0 : index
    %c0_8 = arith.constant 0 : index
    %21 = vector.load %arg2[%c0_6, %20, %c0_7, %c0_8] : memref<1x16x16x128xf32, #tpu.memory_space<vmem>>, vector<1x8x16x128xf32>
    %22 = vector.shape_cast %21 : vector<1x8x16x128xf32> to vector<8x16x128xf32>
    %23 = vector.shape_cast %22 : vector<8x16x128xf32> to vector<128x128xf32>
    %24 = arith.addf %19, %23 : vector<128x128xf32>
    %25 = vector.shape_cast %24 : vector<128x128xf32> to vector<8x16x128xf32>
    %c0_9 = arith.constant 0 : index
    %c0_10 = arith.constant 0 : index
    %c0_11 = arith.constant 0 : index
    %c0_12 = arith.constant 0 : index
    %26 = vector.load %arg7[%c0_9, %c0_10, %c0_11, %c0_12] : memref<1x8x16x128xf32, #tpu.memory_space<vmem>>, vector<1x8x16x128xf32>
    %27 = vector.shape_cast %26 : vector<1x8x16x128xf32> to vector<8x16x128xf32>
    %28 = vector.shape_cast %25 : vector<8x16x128xf32> to vector<1x8x16x128xf32>
    tpu.vector_store %arg7[%c0_9, %c0_10, %c0_11, %c0_12], %28 {strides = array<i32>} : memref<1x8x16x128xf32, #tpu.memory_space<vmem>>, vector<1x8x16x128xf32>,
    return
  }
  func.func @transform_0(%arg0: i32, %arg1: i32) -> (i32, i32, i32, i32) {
    %c0_i32 = arith.constant 0 : i32
    %c0_i32_0 = arith.constant 0 : i32
    %c0_i32_1 = arith.constant 0 : i32
    %c0_i32_2 = arith.constant 0 : i32
    return %arg0, %c0_i32, %c0_i32_0, %c0_i32_1 : i32, i32, i32, i32
  }
  func.func @transform_1(%arg0: i32, %arg1: i32) -> (i32, i32) {
    %c0_i32 = arith.constant 0 : i32
    %c0_i32_0 = arith.constant 0 : i32
    %c0_i32_1 = arith.constant 0 : i32
    return %c0_i32, %c0_i32_0 : i32, i32
  }
  func.func @transform_2(%arg0: i32, %arg1: i32) -> (i32, i32) {
    %c0_i32 = arith.constant 0 : i32
    %c0_i32_0 = arith.constant 0 : i32
    %c0_i32_1 = arith.constant 0 : i32
    return %c0_i32, %c0_i32_0 : i32, i32
  }
  func.func @transform_3(%arg0: i32, %arg1: i32) -> (i32, i32) {
    %c0_i32 = arith.constant 0 : i32
    %c0_i32_0 = arith.constant 0 : i32
    %c0_i32_1 = arith.constant 0 : i32
    return %c0_i32, %c0_i32_0 : i32, i32
  }
  func.func @transform_4(%arg0: i32, %arg1: i32) -> (i32, i32) {
    %c0_i32 = arith.constant 0 : i32
    %c0_i32_0 = arith.constant 0 : i32
    %c0_i32_1 = arith.constant 0 : i32
    return %c0_i32, %c0_i32_0 : i32, i32
  }
  func.func @transform_5(%arg0: i32, %arg1: i32) -> (i32, i32, i32, i32) {
    %c0_i32 = arith.constant 0 : i32
    %c0_i32_0 = arith.constant 0 : i32
    %c0_i32_1 = arith.constant 0 : i32
    return %arg0, %arg1, %c0_i32, %c0_i32_0 : i32, i32, i32, i32
  }
}

</mosaic_0001>

<bundles_post_ra>
// kernel: tpu_custom_call.1
= control target key start
LH: loop header
LB: loop body
LE: loop exit
PB: predicated region body
PF: predicated region fallthrough
CT: control target
= control target key end

     0   :  { %s8939_s0 = inlined_call_operand.hbm [shape: f32[2,16,16,128], index: 0, kind: input, shape index: {}]   ;;  %s8940_s1 = inlined_call_operand.hbm [shape: bf16[384,384], index: 1, kind: input, shape index: {}]   ;;  %s8941_s2 = inlined_call_operand.vmem [shape: f32[1,128], index: 2, kind: input, shape index: {}]   ;;  %s8942_s3 = inlined_call_operand.hbm [shape: bf16[384,384], index: 3, kind: input, shape index: {}]   ;;  %s8943_s4 = inlined_call_operand.vmem [shape: f32[1,128], index: 4, kind: input, shape index: {}]   ;;  %s8944_s5 = inlined_call_operand.hbm [shape: f32[2,16,16,128], index: 5, kind: output, shape index: {}]  }
   0x1   :  { %8962 = sst [smem:[#allocation29_spill]] %s8940_s1 }
   0x2   :  { %8963 = sst [smem:[#allocation30_spill]] %s8942_s3 }
   0x3   :  { %8964 = sst [smem:[#allocation31_spill]] %s8944_s5 }
   0x4   :  { %10 = vsyncpa [#allocation4], 0 }
   0x5   :  { %12 = vsyncpa [#allocation4 + $0x1], 0 }
   0x6   :  { %13 = vsyncpa [#allocation7], 0 }
   0x7   :  { %14 = vsyncpa [#allocation5], 0 }
   0x8   :  { %16 = vsyncpa [#allocation5 + $0x1], 0  ;;  %s6812_s18 = smov 0   ;;  %s6814_s19 = smov 0  }
   0x9   :  { %s6816_s20 = smov 0   ;;  %s6818_s21 = smov 0  }
   0xa   :  { %s6820_s22 = smov 0   ;;  %s6822_s23 = smov 0  }
   0xb   :  { %s6824_s24 = smov 0   ;;  %s6826_s25 = smov 0  }
   0xc   :  { %s6828_s26 = smov 0   ;;  %s6830_s27 = smov 0  }
   0xd   :  { %s6832_s28 = smov 0  }
   0xe LB: > { %8965 = sst [smem:[#allocation13_spill]] %s6728_s18  ;;  %s5512_s29 = sadd.s32 4294967295, %s6768_s28   ;;  %s6768_s28 = sphi %s6832_s28, %s22_s28   ;;  %s6764_s27 = sphi %s6830_s27, %s9045_s27   ;;  %s6760_s26 = sphi %s6828_s26, %s9044_s26   ;;  %s6756_s25 = sphi %s6826_s25, %s9043_s25   ;;  %s6752_s24 = sphi %s6824_s24, %s9035_s24   ;;  %s6748_s23 = sphi %s6822_s23, %s9042_s23   ;;  %s6744_s22 = sphi %s6820_s22, %s9041_s22   ;;  %s6740_s21 = sphi %s6818_s21, %s9040_s21   ;;  %s6736_s20 = sphi %s6816_s20, %s9039_s20   ;;  %s6732_s19 = sphi %s6814_s19, %s9038_s19   ;;  %s6728_s18 = sphi %s6812_s18, %s9037_s18  }
   0xf   : > { %8966 = sst [smem:[#allocation14_spill]] %s6756_s25  ;;  %s5513_s30 = sadd.s32 4294967294, %s6768_s28  }
  0x10   : > { %8967 = sst [smem:[#allocation15_spill]] %s6760_s26  ;;  %p54_p0 = scmp.ne.s32.totalorder %s6744_s22, %s6740_s21 }
  0x11   : > { %p6868_p1 = scmp.eq.s32.totalorder %s5512_s29, 0  ;;  %p163_p2 = scmp.ne.s32.totalorder %s6736_s20, %s6732_s19 }
  0x12   : > { %p164_p4 = scmp.eq.s32.totalorder %s5512_s29, 3  ;;  %p169_p5 = scmp.ne.s32.totalorder %s6732_s19, %s6728_s18 }
  0x13   : > { %s8968_s6 = scalar_select %p6868_p1, 1, 0 }
  0x14   : > { %p6877_p3 = por %p6868_p1, %p54_p0  ;;  %p170_p6 = scmp.eq.s32.totalorder %s5513_s30, 3 }
  0x15   : > { %p6883_p7 = por %p164_p4, %p163_p2  ;;  %p5514_p8 = scmp.ge.s32.totalorder %s6768_s28, 1 }
  0x16   : > { %p6888_p9 = por %p170_p6, %p169_p5  ;;  %p177_p10 = scmp.lt.s32.totalorder %s6768_s28, 5 }
  0x17   : > { %s8970_s9 = scalar_select %p6883_p7, 1, 0 }
  0x18   : > { %s8972_s10 = scalar_select %p6888_p9, 1, 0 }
  0x19   : > { %8971 = sst [smem:[#allocation16_spill]] %s8970_s9  ;;  %p6893_p11 = pnand %p5514_p8, %p177_p10 }
  0x1a   : > { %8973 = sst [smem:[#allocation17_spill]] %s8972_s10  ;;  %s6770_s12 = smov [#allocation6]  }
  0x1b   : > { %s189_s13 = sshll.u32 %s6770_s12, 4  ;;  %p6120_p12 = pneg %p6893_p11  ;;  %s190_s13 = int_to_ptr.vmem [resolvable:$true] %s189_s13 }
  0x1c   : > { %s6771_s15 = smov [#allocation8]   ;;  %s6575_s17 = scalar_lea.vmem %s190_s13, 9216 }
  0x1d   : > { %p6901_p13 = pnand %p6120_p12, %p6868_p1  ;;  %s205_s16 = sshll.u32 %s6771_s15, 4  ;;  %s206_s16 = int_to_ptr.vmem [resolvable:$true] %s205_s16 }
  0x1e   : > { %p6576_p2 = scmp.ne.s32.totalorder %s190_s13, %s6575_s17  ;;  %p6583_p6 = scmp.lt.s32.totalorder %s190_s13, %s190_s13 }
  0x1f   : > { %p6566_p0 = pneg %p6901_p13  ;;  %p6584_p8 = scmp.lt.s32.totalorder %s6575_s17, %s6575_s17 }
  0x21   : > { %p6578_p4 = pnand %p6576_p2, %p6566_p0  ;;  %p6585_p10 = por %p6584_p8, %p6583_p6 }
  0x23   : > { %p6579_p5 = pneg %p6578_p4 }
  0x25   : > { %p6586_p12 = pnand %p6585_p10, %p6579_p5 }
  0x27   : > { %6589 = shalt.err (!%p6586_p12)
}
  0x28   : > { %s6772_s21 = smov 192   ;;  %s6773_s29 = smov 12  }
  0x29   : > { %s8976_s1 = sld [smem:[#allocation29_spill]]  ;;  %s6601_s15 = scalar_lea.vmem %s206_s16, 9216 }
  0x2a   : > { %p6602_p9 = scmp.ne.s32.totalorder %s206_s16, %s6601_s15  ;;  %p6609_p7 = scmp.lt.s32.totalorder %s206_s16, %s206_s16 }
  0x2b   : > { %p6610_p1 = scmp.lt.s32.totalorder %s6601_s15, %s6601_s15 }
  0x2c   : > { %p6604_p2 = pnand %p6602_p9, %p6566_p0 }
  0x2d   : > { %p6611_p6 = por %p6610_p1, %p6609_p7 }
  0x2e   : > { %p6605_p4 = pneg %p6604_p2 }
  0x2f   : > { %6123 = dma.hbm_to_vmem [thread:$0]  (!%p6901_p13), %s8976_s1, 9216, %s190_s13, [#allocation7], %s6772_s21, %s6772_s21, %s6773_s29  }
  0x30   : > { %p6612_p5 = pnand %p6611_p6, %p6605_p4 }
  0x32   : > { %6615 = shalt.err (!%p6612_p5)
}
  0x33   : > { %s8977_s3 = sld [smem:[#allocation30_spill]]  ;;  %s31_s13 = sadd.s32 1, %s6760_s26 }
  0x34   : > { %s34_s30 = sadd.s32 1, %s6764_s27  ;;  %p32_p1 = scmp.ge.s32.totalorder %s31_s13, 2 }
  0x35   : > { %s41_s14 = sadd.s32 1, %s6748_s23  ;;  %p48_p7 = scmp.ne.s32.totalorder %s6748_s23, %s6744_s22 }
  0x36   : > { %p49_p9 = scmp.eq.s32.totalorder %s6768_s28, 0  ;;  %s9047_s13 = smov (%p32_p1, %s31_s13), 0 }
  0x37   : > { %8978 = sst [smem:[#allocation18_spill]] %s9047_s13  ;;  %s9049_s30 = smov (!%p32_p1, %s34_s30), %s6764_s27 }
  0x38   : > { %p6932_p0 = por %p49_p9, %p48_p7  ;;  %s149_s12 = ssub.s32 %s6760_s26, %s9047_s13 }
  0x39   : > { %6126 = dma.hbm_to_vmem [thread:$0]  (!%p6901_p13), %s8977_s3, 9216, %s206_s16, [#allocation7], %s6772_s21, %s6772_s21, %s6773_s29  }
  0x3a   : > { %p36_p13 = scmp.ge.s32.totalorder %s9049_s30, 2  ;;  %p6137_p8 = scmp.lt.s32.totalorder %s6768_s28, 4 }
  0x3b   : > { %s222_s16 = sand.u32 1, %s6748_s23   ;;  %s5832_s21 = sshll.u32 %s6764_s27, 12 }
  0x3c   : > { %s9051_s30 = smov (%p36_p13, %s9049_s30), 0  ;;  %s5518_s29 = sshll.u32 %s222_s16, 8 }
  0x3d   : > { %s38_s15 = ssub.s32 %s6764_s27, %s9051_s30  ;;  %s232_s10 = scalar_lea.hbm %s8939_s0, %s5832_s21 }
  0x3e   : > { %p39_p10 = scmp.eq.s32.totalorder %s38_s15, 0  ;;  %s150_s17 = sor.u32 %s149_s12, %s38_s15 }
  0x3f   : > { %p151_p12 = scmp.eq.s32.totalorder %s150_s17, 0  ;;  %s8980_s13 = sadd.s32 1, %s6736_s20 }
  0x40   : > { %s6949_s18 = scalar_select %p39_p10, %s6748_s23, %s41_s14  }
  0x41   : > { %s6954_s26 = scalar_select %p151_p12, %s6736_s20, %s8980_s13  }
  0x42   : > { %s226_s5 = scalar_lea.vmem [#allocation3], %s5518_s29  ;;  %p6960_p2 = pnand %p6137_p8, %p6932_p0 }
  0x43   : > { %s233_s9 = sshll.u32 %s226_s5, 4  ;;  %s223_s12 = scalar_lea.sflag [#allocation4], %s222_s16  ;;  %s234_s9 = int_to_ptr.vmem [resolvable:$true] %s233_s9 }
  0x44   : > { %p6618_p4 = pneg %p6960_p2  ;;  %s6629_s1 = scalar_lea.vmem %s234_s9, 4096 }
  0x45   : > { %p6630_p6 = scmp.ne.s32.totalorder %s234_s9, %s6629_s1  ;;  %s6774_s3 = smov [#allocation3]  }
  0x46   : > { %s6634_s13 = sshll.u32 %s6774_s3, 4  ;;  %s6635_s13 = int_to_ptr.vmem [resolvable:$false] %s6634_s13 }
  0x47   : > { %p6632_p5 = pnand %p6630_p6, %p6618_p4  ;;  %s6636_s14 = scalar_lea.vmem %s6635_s13, 8192 }
  0x48   : > { %p6637_p7 = scmp.lt.s32.totalorder %s234_s9, %s6635_s13  ;;  %p6638_p9 = scmp.lt.s32.totalorder %s6636_s14, %s6629_s1 }
  0x49   : > { %p6633_p1 = pneg %p6632_p5 }
  0x4a   : > { %p6639_p13 = por %p6638_p9, %p6637_p7 }
  0x4c   : > { %p6640_p0 = pnand %p6639_p13, %p6633_p1 }
  0x4e   : > { %6643 = shalt.err (!%p6640_p0)
}
  0x4f   : > { %s6775_s5 = smov 128   ;;  %s6776_s7 = smov 8  }
  0x50   : > { %6130 = dma.hbm_to_vmem [thread:$0]  (!%p6960_p2), %s232_s10, 4096, %s234_s9, %s223_s12, %s6775_s5, %s6775_s5, %s6776_s7  }
  0x51   : > { %245 = sbr.rel (%p6893_p11) target bundleno = 1112 (0x458), region = 40  ;;  %s247_s16 = sand.u32 (!%p6893_p11), 1, %s6744_s22  }
  0x52   : > { %s5522_s21 = sshll.u32 (!%p6893_p11), %s247_s16, 8  ;;  %s248_s29 = scalar_lea.sflag (!%p6893_p11), [#allocation4], %s247_s16 }
  0x53   : > { %s6971_s15 = scalar_lea.vmem (!%p6893_p11), [#allocation3], %s5522_s21 }
  0x56   : > { %6715 = dma.done.wait (%p6877_p3), %s248_s29, 4096  }
  0x57   : > { %6717 = vsyncadd (%p6877_p3), %s248_s29, 4294963200  ;;  %p8982_p8 = scmp.ne.s32.totalorder %s8968_s6, 0 }
  0x59   : > { %6719 = dma.done.wait (%p8982_p8), [#allocation7], 18432  }
  0x5a   : > { %6721 = vsyncadd (%p8982_p8), [#allocation7], 4294948864  ;;  %s283_s25 = sand.u32 1, %s6732_s19   ;;  %p5526_p11 = scmp.ne.s32.totalorder %s6752_s24, 0 }
  0x5b   : > { %s5525_s9 = sshll.u32 %s283_s25, 7 }
  0x5c   : > { %s6984_s10 = scalar_lea.vmem [#allocation9], %s5525_s9  ;;  %291 = sbr.rel (%p5526_p11) target bundleno = 703 (0x2bf), region = 56 }
  0x61   : > { %v6239_v0 = vld [vmem:[#allocation6 + $0xac] ss:$12 sps:$4 sm:$0xff]   ;;  %v6241_v1 = vld [vmem:[#allocation6 + $0xa8] ss:$12 sps:$4 sm:$0xff]   ;;  %v8957_v2 = vmov 0   ;;  %v292_v38 = vld [vmem:[%s6971_s15] sm:$0xff] }
  0x62   : > { %2446 = vmatprep.mubr.bf16.mxu1 %v8957_v2  ;;  %2209 = vmatprep.subr.bf16.mxu0 %v6239_v0  ;;  %v6242_v3 = vld [vmem:[#allocation6 + $0x22c] ss:$12 sps:$4 sm:$0xff]   ;;  %v6244_v4 = vld [vmem:[#allocation6 + $0x94] ss:$12 sps:$4 sm:$0xff]   ;;  %v6247_v6 = vld [vmem:[#allocation6 + $0x90] ss:$12 sps:$4 sm:$0xff]   ;;  %v5833_v40 = vpack.c.bf16 %v292_v38, %v292_v38 }
  0x63   : > { %2210 = vmatpush1.bf16.msra.mxu0 %v6241_v1  ;;  %v6246_v5 = vld [vmem:[#allocation6 + $0x228] ss:$12 sps:$4 sm:$0xff]   ;;  %2414 = vmatprep.subr.bf16.mxu1 %v6242_v3  ;;  %v6252_v9 = vld [vmem:[#allocation6 + $0x210] ss:$12 sps:$4 sm:$0xff]   ;;  %v6253_v10 = vld [vmem:[#allocation6 + $0x78] ss:$12 sps:$4 sm:$0xff]  }
  0x64   : > { %v6248_v7 = vld [vmem:[#allocation6 + $0x214] ss:$12 sps:$4 sm:$0xff]   ;;  %2211 = vmatprep.subr.bf16.mxu0 %v6244_v4  ;;  %2415 = vmatpush1.bf16.msra.mxu1 %v6246_v5  ;;  %v6250_v8 = vld [vmem:[#allocation6 + $0x7c] ss:$12 sps:$4 sm:$0xff]   ;;  %v6256_v12 = vld [vmem:[#allocation6 + $0x64] ss:$12 sps:$4 sm:$0xff]  }
  0x65   : > { %2416 = vmatprep.subr.bf16.mxu1 %v6248_v7  ;;  %v6254_v11 = vld [vmem:[#allocation6 + $0x1fc] ss:$12 sps:$4 sm:$0xff]   ;;  %v6258_v13 = vld [vmem:[#allocation6 + $0x1f8] ss:$12 sps:$4 sm:$0xff]   ;;  %v6259_v15 = vld [vmem:[#allocation6 + $0x60] ss:$12 sps:$4 sm:$0xff]  }
  0x66   : > { %v6260_v14 = vld [vmem:[#allocation6 + $0x1e4] ss:$12 sps:$4 sm:$0xff]   ;;  %v6262_v16 = vld [vmem:[#allocation6 + $0x4c] ss:$12 sps:$4 sm:$0xff]   ;;  %v6265_v19 = vld [vmem:[#allocation6 + $0x48] ss:$12 sps:$4 sm:$0xff]  }
  0x67   : > { %2212 = vmatpush1.bf16.msra.mxu0 %v6247_v6  ;;  %v6264_v17 = vld [vmem:[#allocation6 + $0x1e0] ss:$12 sps:$4 sm:$0xff]   ;;  %v6270_v21 = vld [vmem:[#allocation6 + $0x1c8] ss:$12 sps:$4 sm:$0xff]   ;;  %v6271_v23 = vld [vmem:[#allocation6 + $0x30] ss:$12 sps:$4 sm:$0xff]  }
  0x68   : > { %2213 = vmatprep.subr.bf16.mxu0 %v6250_v8  ;;  %2417 = vmatpush1.bf16.msra.mxu1 %v6252_v9  ;;  %v6266_v18 = vld [vmem:[#allocation6 + $0x1cc] ss:$12 sps:$4 sm:$0xff]   ;;  %v6268_v20 = vld [vmem:[#allocation6 + $0x34] ss:$12 sps:$4 sm:$0xff]   ;;  %v6274_v24 = vld [vmem:[#allocation6 + $0x1c] ss:$12 sps:$4 sm:$0xff]  }
  0x69   : > { %2418 = vmatprep.subr.bf16.mxu1 %v6254_v11  ;;  %v6272_v22 = vld [vmem:[#allocation6 + $0x1b4] ss:$12 sps:$4 sm:$0xff]   ;;  %v6276_v25 = vld [vmem:[#allocation6 + $0x1b0] ss:$12 sps:$4 sm:$0xff]   ;;  %v6277_v27 = vld [vmem:[#allocation6 + $0x18] ss:$12 sps:$4 sm:$0xff]  }
  0x6a   : > { %v6278_v26 = vld [vmem:[#allocation6 + $0x19c] ss:$12 sps:$4 sm:$0xff]   ;;  %v294_v28 = vld [vmem:[%s6971_s15 + $0x10] sm:$0xff]  ;;  %v6282_v32 = vld [vmem:[#allocation6 + $0x198] ss:$12 sps:$4 sm:$0xff]   ;;  %vm853_vm0 = vcmask 1043456  }
  0x6b   : > { %2214 = vmatpush1.bf16.msra.mxu0 %v6253_v10  ;;  %v6280_v29 = vld [vmem:[#allocation6 + $0x4] ss:$12 sps:$4 sm:$0xff]   ;;  %v295_v30 = vld [vmem:[%s6971_s15 + $0x18] sm:$0xff]  ;;  %v5835_v31 = vpack.c.bf16 %v294_v28, %v294_v28  ;;  %v6283_v35 = vld [vmem:[#allocation6] ss:$12 sps:$4 sm:$0xff]   ;;  %vm1312_vm5 = vcmask 1043459  }
  0x6c   : > { %2215 = vmatprep.subr.bf16.mxu0 %v6256_v12  ;;  %2419 = vmatpush1.bf16.msra.mxu1 %v6258_v13  ;;  %v5836_v33 = vpack.c.bf16 %v295_v30, %v295_v30  ;;  %v6284_v34 = vld [vmem:[#allocation6 + $0x184] ss:$12 sps:$4 sm:$0xff]   ;;  %v6286_v36 = vld [vmem:[#allocation6 + $0x16c] ss:$12 sps:$4 sm:$0xff]   ;;  %v6289_v42 = vld [vmem:[#allocation6 + $0x168] ss:$12 sps:$4 sm:$0xff]  }
  0x6d   : > { %2420 = vmatprep.subr.bf16.mxu1 %v6260_v14  ;;  %485 = vst [vmem:[#allocation2 + $0x4] sm:$0xf] %v5835_v31  ;;  %455 = vst [vmem:[#allocation2 + $0x34] sm:$0xf] %v5835_v31  ;;  %v6288_v37 = vld [vmem:[#allocation6 + $0x180] ss:$12 sps:$4 sm:$0xff]  }
  0x6e   : > { %486 = vst [vmem:[#allocation2 + $0x10] sm:$0xf] %v5836_v33  ;;  %456 = vst [vmem:[#allocation2 + $0x40] sm:$0xf] %v5836_v33  ;;  %v293_v39 = vld [vmem:[%s6971_s15 + $0x8] sm:$0xff]  ;;  %vm982_vm10 = vcmask 1040384  }
  0x6f   : > { %2216 = vmatpush1.bf16.msra.mxu0 %v6259_v15  ;;  %v5834_v41 = vpack.c.bf16 %v293_v39, %v293_v39  ;;  %v6290_v43 = vld [vmem:[#allocation6 + $0x154] ss:$12 sps:$4 sm:$0xff]   ;;  %vm1038_vm1 = vsmask.f32 3328  ;;  %453 = vst [vmem:[#allocation2 + $0x1c] sm:$0xf] %v5833_v40 }
  0x70   : > { %2217 = vmatprep.subr.bf16.mxu0 %v6262_v16  ;;  %2421 = vmatpush1.bf16.msra.mxu1 %v6264_v17  ;;  %vm1039_vm2 = vsmask.f32 7440  ;;  %v6294_v48 = vld [vmem:[#allocation6 + $0x150] ss:$12 sps:$4 sm:$0xff]   ;;  %vm526_vm3 = vsmask.f32 256  ;;  %vm7044_vm8 = vmand %vm853_vm0, %vm1038_vm1 }
  0x71   : > { %2422 = vmatprep.subr.bf16.mxu1 %v6266_v18  ;;  %454 = vst [vmem:[#allocation2 + $0x28] sm:$0xf] %v5834_v41  ;;  %vm527_vm4 = vsmask.f32 4368  ;;  %v6295_v55 = vld [vmem:[#allocation6 + $0x13c] ss:$12 sps:$4 sm:$0xff]   ;;  %vm7031_vm7 = vmor %vm1038_vm1, %vm1039_vm2 }
  0x72   : > { %v6297_v60 = vld [vmem:[#allocation6 + $0x138] ss:$12 sps:$4 sm:$0xff]   ;;  %vm1313_vm6 = vsmask.f32 7950  ;;  %vm854_vm9 = vsmask.f32 7938  ;;  %vm7076_vm11 = vmor %vm526_vm3, %vm527_vm4 }
  0x73   : > { %2218 = vmatpush1.bf16.msra.mxu0 %v6265_v19  ;;  %v1223_v0 = vld [vmem:[#allocation2 + $0x14] sm:$0xf]  ;;  %v1231_v33 = vld [vmem:[#allocation2 + $0x44] sm:$0xf]  ;;  %vm7089_vm12 = vmand %vm853_vm0, %vm854_vm9 }
  0x74   : > { %2219 = vmatprep.subr.bf16.mxu0 %v6268_v20  ;;  %2423 = vmatpush1.bf16.msra.mxu1 %v6270_v21  ;;  %v6992_v44 = vld [vmem:[#allocation2 + $0x4] sm:$0xf]  ;;  %v7003_v51 = vld [vmem:[#allocation2 + $0x34] sm:$0xf]  ;;  %vm7101_vm13 = vmand %vm1312_vm5, %vm1313_vm6 }
  0x75   : > { %2424 = vmatprep.subr.bf16.mxu1 %v6272_v22  ;;  %v6995_v45 = vld [vmem:[#allocation2 + $0x10] sm:$0xf]  ;;  %v530_v46 = vshrl.u32 %v6992_v44, 16  ;;  %v533_v47 = vshll.u32 %v6992_v44, 16  ;;  %v7005_v52 = vld [vmem:[#allocation2 + $0x40] sm:$0xf]  ;;  %vm7160_vm14 = vmand %vm982_vm10, %vm526_vm3 }
  0x76   : > { %v538_v49 = vshrl.u32 %v6995_v45, 16  ;;  %v7001_v50 = vshll.u32 %v6995_v45, 16  ;;  %v562_v56 = vshrl.u32 %v7003_v51, 16  ;;  %v565_v57 = vshll.u32 %v7003_v51, 16  ;;  %v6298_v1 = vld [vmem:[#allocation6 + $0x124] ss:$12 sps:$4 sm:$0xff]  }
  0x77   : > { %2220 = vmatpush1.bf16.msra.mxu0 %v6271_v23  ;;  %v7009_v53 = vrot.slane %v530_v46, 4  ;;  %v1041_v54 = vrot.slane %v533_v47, 5  ;;  %v570_v61 = vshrl.u32 %v7005_v52, 16  ;;  %v7020_v62 = vshll.u32 %v7005_v52, 16  ;;  %v7035_v7 = vld [vmem:[#allocation2 + $0x1c] sm:$0xf] }
  0x78   : > { %2221 = vmatprep.subr.bf16.mxu0 %v6274_v24  ;;  %2425 = vmatpush1.bf16.msra.mxu1 %v6276_v25  ;;  %v1044_v58 = vrot.slane %v7001_v50, 5  ;;  %v1046_v59 = vrot.slane %v538_v49, 4  ;;  %v7025_v3 = vrot.slane %v562_v56, 4  ;;  %v1057_v4 = vrot.slane %v565_v57, 5  ;;  %v7037_v8 = vld [vmem:[#allocation2 + $0x28] sm:$0xf] }
  0x79   : > { %2426 = vmatprep.subr.bf16.mxu1 %v6278_v26  ;;  %v1042_v63 = vor.u32 %v1041_v54, %v7009_v53  ;;  %v1060_v9 = vrot.slane %v7020_v62, 5  ;;  %v1062_v10 = vrot.slane %v570_v61, 4  ;;  %v546_v13 = vshrl.u32 %v7035_v7, 16  ;;  %v6301_v23 = vld [vmem:[#allocation6 + $0x120] ss:$12 sps:$4 sm:$0xff]  }
  0x7a   : > { %v1047_v6 = vor.u32 %v1046_v59, %v1044_v58  ;;  %v549_v14 = vshll.u32 %v7035_v7, 16  ;;  %v554_v15 = vshrl.u32 %v7037_v8, 16  ;;  %v7052_v17 = vshll.u32 %v7037_v8, 16  ;;  %v6303_v26 = vld [vmem:[#allocation6 + $0x10c] ss:$12 sps:$4 sm:$0xff]  }
  0x7b   : > { %2222 = vmatpush1.bf16.msra.mxu0 %v6277_v27  ;;  %v1043_v11 = vrot.slane %v1042_v63, 4  ;;  %v1058_v18 = vor.u32 %v1057_v4, %v7025_v3  ;;  %v7057_v20 = vrot.slane %v546_v13, 4  ;;  %v1063_v28 = vor.u32 %v1062_v10, %v1060_v9  ;;  %v6305_v38 = vld [vmem:[#allocation6 + $0x108] ss:$12 sps:$4 sm:$0xff]  }
  0x7c   : > { %2223 = vmatprep.subr.bf16.mxu0 %v6280_v29  ;;  %2427 = vmatpush1.bf16.msra.mxu1 %v6282_v32  ;;  %v1048_v16 = vrot.slane %v1047_v6, 4  ;;  %v1049_v21 = vrot.slane %v549_v14, 5  ;;  %v1054_v22 = vrot.slane %v554_v15, 4  ;;  %v1052_v25 = vrot.slane %v7052_v17, 5  ;;  %v296_v29 = vld [vmem:[%s6971_s15 + $0x20] sm:$0xff] }
  0x7d   : > { %2428 = vmatprep.subr.bf16.mxu1 %v6284_v34  ;;  %v1045_v19 = vsel %vm7031_vm7, %v1043_v11, %v1044_v58  ;;  %v1059_v27 = vrot.slane %v1058_v18, 4  ;;  %v929_v30 = vrot.slane %v7009_v53, 4  ;;  %v931_v31 = vrot.slane %v7057_v20, 4  ;;  %v297_v34 = vld [vmem:[%s6971_s15 + $0x28] sm:$0xff]  ;;  %v299_v58 = vld [vmem:[%s6971_s15 + $0x38] sm:$0xff] }
  0x7e   : > { %1221 = vst [vmem:[#allocation2 + $0x8] sm:$0xf] %v1045_v19  ;;  %v1224_v24 = vsel %vm7044_vm8, %v1048_v16, %v1223_v0  ;;  %v1050_v32 = vor.u32 %v1049_v21, %v7057_v20  ;;  %v1064_v40 = vrot.slane %v1063_v28, 4  ;;  %v5838_v41 = vpack.c.bf16 %v297_v34, %v297_v34  ;;  %v860_v11 = vld [vmem:[#allocation2 + $0x18] sm:$0xf]  ;;  %v300_v16 = vld [vmem:[%s6971_s15 + $0x40] sm:$0xff] }
  0x7f   : > { %2224 = vmatpush1.bf16.msra.mxu0 %v6283_v35  ;;  %1225 = vst [vmem:[#allocation2 + $0x14] sm:$0xf] %v1224_v24  ;;  %v5837_v35 = vpack.c.bf16 %v296_v29, %v296_v29  ;;  %v1061_v39 = vsel %vm7031_vm7, %v1059_v27, %v1060_v9  ;;  %v532_v54 = vrot.slane %v530_v46, 7  ;;  %v5840_v46 = vpack.c.bf16 %v299_v58, %v299_v58  ;;  %v6309_v21 = vld [vmem:[#allocation6 + $0xf0] ss:$12 sps:$4 sm:$0xff]   ;;  %v301_v24 = vld [vmem:[%s6971_s15 + $0x48] sm:$0xff] }
  0x80   : > { %2225 = vmatprep.subr.bf16.mxu0 %v6286_v36  ;;  %2429 = vmatpush1.bf16.msra.mxu1 %v6288_v37  ;;  %v1055_v36 = vor.u32 %v1054_v22, %v1052_v25  ;;  %v1227_v37 = vld [vmem:[#allocation2 + $0x2c] sm:$0xf]  ;;  %1230 = vst [vmem:[#allocation2 + $0x38] sm:$0xf] %v1061_v39  ;;  %v1232_v63 = vsel %vm7044_vm8, %v1064_v40, %v1231_v33  ;;  %458 = vst [vmem:[#allocation2 + $0x58] sm:$0xf] %v5838_v41 }
  0x81   : > { %2619 = vmatprep.subr.bf16.mxu1 %v8957_v2  ;;  %457 = vst [vmem:[#allocation2 + $0x4c] sm:$0xf] %v5837_v35  ;;  %v548_v4 = vrot.slane %v546_v13, 7  ;;  %1233 = vst [vmem:[#allocation2 + $0x44] sm:$0xf] %v1232_v63  ;;  %v535_v6 = vor.u32 %v533_v47, %v532_v54  ;;  %v536_v9 = vrot.slane %v532_v54, 4  ;;  %v5842_v27 = vpack.c.bf16 %v301_v24, %v301_v24 }
  0x82   : > { %460 = vst [vmem:[#allocation2 + $0x70] sm:$0xf] %v5840_v46  ;;  %v556_v19 = vrot.slane %v554_v15, 7  ;;  %v572_v28 = vrot.slane %v570_v61, 7  ;;  %v302_v29 = vld [vmem:[%s6971_s15 + $0x50] sm:$0xff]  ;;  %v303_v35 = vld [vmem:[%s6971_s15 + $0x58] sm:$0xff] }
  0x83   : > { %2226 = vmatpush2.bf16.msra.mxu0 %v6289_v42  ;;  %v298_v42 = vld [vmem:[%s6971_s15 + $0x30] sm:$0xff]  ;;  %v551_v44 = vor.u32 %v549_v14, %v548_v4  ;;  %v552_v47 = vrot.slane %v548_v4, 4  ;;  %v6311_v14 = vld [vmem:[#allocation6 + $0xdc] ss:$12 sps:$4 sm:$0xff]   ;;  %v864_v34 = vld [vmem:[#allocation2 + $0x30] sm:$0xf]  ;;  %v5844_v61 = vpack.c.bf16 %v303_v35, %v303_v35 }
  0x84   : > { %2227 = vmatprep.subr.bf16.mxu0 %v6290_v43  ;;  %v1051_v43 = vrot.slane %v1050_v32, 4  ;;  %v5839_v59 = vpack.c.bf16 %v298_v42, %v298_v42  ;;  %v559_v8 = vor.u32 %v7052_v17, %v556_v19  ;;  %462 = vst [vmem:[#allocation2 + $0x88] sm:$0xf] %v5842_v27  ;;  %v6314_v39 = vld [vmem:[#allocation6 + $0xc4] ss:$12 sps:$4 sm:$0xff]  }
  0x85   : > { %v861_v15 = vsel %vm7089_vm12, %v551_v44, %v860_v11  ;;  %464 = vst [vmem:[#allocation2 + $0xa0] sm:$0xf] %v5844_v61  ;;  %v6293_v4 = vld [vmem:[#allocation6 + $0xb0] ss:$12 sps:$4 sm:$0xff]   ;;  %v933_v11 = vrot.slane %v7025_v3, 4 }
  0x86   : > { %v1053_v45 = vsel %vm7031_vm7, %v1051_v43, %v1052_v25  ;;  %459 = vst [vmem:[#allocation2 + $0x64] sm:$0xf] %v5839_v59  ;;  %v5841_v25 = vpack.c.bf16 %v300_v16, %v300_v16  ;;  %v1315_v7 = vld [vmem:[#allocation2 + $0x14] sm:$0x8]  ;;  %862 = vst [vmem:[#allocation2 + $0x18] sm:$0xf] %v861_v15  ;;  %v560_v52 = vsel %vm7076_vm11, %v552_v47, %v559_v8 }
  0x87   : > { %2228 = vmatpush2.bf16.msra.mxu0 %v6294_v48  ;;  %1226 = vst [vmem:[#allocation2 + $0x20] sm:$0xf] %v1053_v45  ;;  %v7135_v40 = vld [vmem:[#allocation2 + $0x58] sm:$0xf]  ;;  %863 = vst [vmem:[#allocation2 + $0x24] sm:$0xf] %v560_v52 }
  0x88   : > { %2229 = vmatprep.subr.bf16.mxu0 %v6295_v55  ;;  %v540_v55 = vrot.slane %v538_v49, 7  ;;  %v6306_v49 = vld [vmem:[#allocation6 + $0xf4] ss:$12 sps:$4 sm:$0xff]   ;;  %461 = vst [vmem:[#allocation2 + $0x7c] sm:$0xf] %v5841_v25  ;;  %v586_v43 = vshrl.u32 %v7135_v40, 16 }
  0x89   : > { %v1321_v42 = vld [vmem:[#allocation2 + $0x44] sm:$0x8]  ;;  %v7143_v54 = vshll.u32 %v7135_v40, 16  ;;  %v7164_v46 = vld [vmem:[#allocation2 + $0x70] sm:$0xf] }
  0x8a   : > { %v543_v10 = vor.u32 %v7001_v50, %v540_v55  ;;  %v1322_v59 = vsel %vm7101_vm13, %v7020_v62, %v1321_v42  ;;  %v6317_v44 = vld [vmem:[#allocation6 + $0xc0] ss:$12 sps:$4 sm:$0xff]   ;;  %v602_v19 = vshrl.u32 %v7164_v46, 16  ;;  %v6302_v8 = vld [vmem:[#allocation6 + $0x98] ss:$12 sps:$4 sm:$0xff]   ;;  %v306_v61 = vld [vmem:[%s6971_s15 + $0x70] sm:$0xff] }
  0x8b   : > { %2230 = vmatpush2.bf16.msra.mxu0 %v6297_v60  ;;  %v1056_v60 = vrot.slane %v1055_v36, 4  ;;  %v5843_v36 = vpack.c.bf16 %v302_v29, %v302_v29  ;;  %1323 = vst [vmem:[#allocation2 + $0x44] sm:$0x8] %v1322_v59  ;;  %v1068_v45 = vrot.slane %v7143_v54, 5  ;;  %v305_v29 = vld [vmem:[%s6971_s15 + $0x68] sm:$0xff] }
  0x8c   : > { %2231 = vmatprep.subr.bf16.mxu0 %v6298_v1  ;;  %v856_v1 = vld [vmem:[#allocation2] sm:$0xf]  ;;  %v544_v22 = vsel %vm7076_vm11, %v536_v9, %v543_v10  ;;  %v5846_v59 = vpack.c.bf16 %v305_v29, %v305_v29 }
  0x8d   : > { %v1228_v18 = vsel %vm7044_vm8, %v1056_v60, %v1227_v37  ;;  %859 = vst [vmem:[#allocation2 + $0xc] sm:$0xf] %v544_v22  ;;  %v6313_v37 = vld [vmem:[#allocation6 + $0xd8] ss:$12 sps:$4 sm:$0xff]   ;;  %463 = vst [vmem:[#allocation2 + $0x94] sm:$0xf] %v5843_v36 }
  0x8e   : > { %1229 = vst [vmem:[#allocation2 + $0x2c] sm:$0xf] %v1228_v18  ;;  %v7145_v55 = vld [vmem:[#allocation2 + $0x64] sm:$0xf]  ;;  %v1235_v18 = vld [vmem:[#allocation2 + $0x5c] sm:$0xf] }
  0x8f   : > { %2232 = vmatpush2.bf16.msra.mxu0 %v6301_v23  ;;  %v857_v23 = vsel %vm7089_vm12, %v535_v6, %v856_v1  ;;  %v594_v6 = vshrl.u32 %v7145_v55, 16  ;;  %v597_v9 = vshll.u32 %v7145_v55, 16  ;;  %v987_v24 = vld [vmem:[#allocation2 + $0x18] sm:$0x1]  ;;  %v7189_v25 = vld [vmem:[#allocation2 + $0x7c] sm:$0xf] }
  0x90   : > { %2233 = vmatprep.subr.bf16.mxu0 %v6303_v26  ;;  %v564_v26 = vrot.slane %v562_v56, 7  ;;  %858 = vst [vmem:[#allocation2] sm:$0xf] %v857_v23  ;;  %v1316_v56 = vsel %vm7101_vm13, %v7001_v50, %v1315_v7  ;;  %v575_v50 = vor.u32 %v7020_v62, %v572_v28  ;;  %v1078_v28 = vrot.slane %v602_v19, 4  ;;  %466 = vst [vmem:[#allocation2 + $0xb8] sm:$0xf] %v5846_v59 }
  0x91   : > { %1317 = vst [vmem:[#allocation2 + $0x14] sm:$0x8] %v1316_v56  ;;  %v7187_v3 = vrot.slane %v594_v6, 4  ;;  %v1073_v53 = vrot.slane %v597_v9, 5 }
  0x92   : > { %v567_v32 = vor.u32 %v565_v57, %v564_v26  ;;  %v568_v33 = vrot.slane %v564_v26, 4  ;;  %v6308_v59 = vld [vmem:[#allocation2 + $0x38] ss:$12 sps:$4 sm:$0xff]  }
  0x93   : > { %2234 = vmatpush2.bf16.msra.mxu0 %v6305_v38  ;;  %v7130_v38 = vld [vmem:[#allocation2 + $0x4c] sm:$0xf]  ;;  %v1074_v20 = vor.u32 %v1073_v53, %v7187_v3  ;;  %v937_v55 = vrot.slane %v7187_v3, 4 }
  0x94   : > { %2235 = vmatprep.subr.bf16.mxu0 %v6306_v49  ;;  %v578_v51 = vshrl.u32 %v7130_v38, 16  ;;  %v581_v57 = vshll.u32 %v7130_v38, 16  ;;  %v865_v41 = vsel %vm7089_vm12, %v567_v32, %v864_v34  ;;  %v576_v58 = vsel %vm7076_vm11, %v568_v33, %v575_v50  ;;  %v7204_v32 = vld [vmem:[#allocation2 + $0x88] sm:$0xf]  ;;  %v7215_v50 = vld [vmem:[#allocation2 + $0x94] sm:$0xf] }
  0x95   : > { %866 = vst [vmem:[#allocation2 + $0x30] sm:$0xf] %v865_v41  ;;  %867 = vst [vmem:[#allocation2 + $0x3c] sm:$0xf] %v576_v58  ;;  %v1318_v62 = vld [vmem:[#allocation2 + $0x2c] sm:$0x8] }
  0x96   : > { %v7154_v60 = vrot.slane %v578_v51, 4  ;;  %v1065_v63 = vrot.slane %v581_v57, 5  ;;  %v1070_v49 = vrot.slane %v586_v43, 4  ;;  %v1319_v10 = vsel %vm7101_vm13, %v7052_v17, %v1318_v62  ;;  %v1239_v41 = vld [vmem:[#allocation2 + $0x74] sm:$0xf]  ;;  %v311_v3 = vld [vmem:[%s6971_s15 + $0x98] sm:$0xff] }
  0x97   : > { %2236 = vmatpush2.bf16.msra.mxu0 %v6309_v21  ;;  %v984_v47 = vld [vmem:[#allocation2] sm:$0x1]  ;;  %v304_v21 = vld [vmem:[%s6971_s15 + $0x60] sm:$0xff]  ;;  %1320 = vst [vmem:[#allocation2 + $0x2c] sm:$0x8] %v1319_v10  ;;  %v7183_v17 = vshll.u32 %v7164_v46, 16 }
  0x98   : > { %2237 = vmatprep.subr.bf16.mxu0 %v6311_v14  ;;  %v1066_v16 = vor.u32 %v1065_v63, %v7154_v60  ;;  %v1071_v22 = vor.u32 %v1070_v49, %v1068_v45  ;;  %v985_v23 = vsel %vm7160_vm14, %v929_v30, %v984_v47  ;;  %v6292_v26 = vld [vmem:[#allocation2 + $0x8] ss:$12 sps:$4 sm:$0xff]   ;;  %v988_v30 = vsel %vm7160_vm14, %v931_v31, %v987_v24  ;;  %v6310_v63 = vld [vmem:[#allocation6 + $0x80] ss:$12 sps:$4 sm:$0xff]   ;;  %v7230_v10 = vld [vmem:[#allocation2 + $0xa0] sm:$0xf] }
  0x99   : > { %986 = vst [vmem:[#allocation2] sm:$0x1] %v985_v23  ;;  %v5845_v14 = vpack.c.bf16 %v304_v21, %v304_v21  ;;  %v1076_v27 = vrot.slane %v7183_v17, 5  ;;  %989 = vst [vmem:[#allocation2 + $0x18] sm:$0x1] %v988_v30  ;;  %2447 = vmatmul.mubr.bf16.vlgmr.msra.gmra.mxu1 %v6292_v26  ;;  %v610_v31 = vshrl.u32 %v7189_v25, 16 }
  0x9a   : > { %v1067_v7 = vrot.slane %v1066_v16, 4  ;;  %v1072_v15 = vrot.slane %v1071_v22, 4  ;;  %v613_v33 = vshll.u32 %v7189_v25, 16  ;;  %2620 = vmatpush1.bf16.msra.mxu1 %v6293_v4  ;;  %2454 = vmatprep.mubr.bf16.mxu1 %v8957_v2  ;;  %v7213_v52 = vshll.u32 %v7204_v32, 16  ;;  %v6318_v47 = vld [vmem:[#allocation2 + $0x4] ss:$12 sps:$4 sm:$0xff]  }
  0x9b   : > { %2238 = vmatpush2.bf16.msra.mxu0 %v6313_v37  ;;  %465 = vst [vmem:[#allocation2 + $0xac] sm:$0xf] %v5845_v14  ;;  %v1079_v36 = vor.u32 %v1078_v28, %v1076_v27  ;;  %v618_v37 = vshrl.u32 %v7204_v32, 16  ;;  %2621 = vmatprep.subr.bf16.mxu1 %v8957_v2  ;;  %v7221_v42 = vrot.slane %v610_v31, 4  ;;  %v629_v26 = vshll.u32 %v7215_v50, 16 }
  0x9c   : > { %2239 = vmatprep.subr.bf16.mxu0 %v6314_v39  ;;  %v1069_v56 = vsel %vm7031_vm7, %v1067_v7, %v1068_v45  ;;  %v990_v34 = vld [vmem:[#allocation2 + $0x30] sm:$0x1]  ;;  %v1236_v35 = vsel %vm7044_vm8, %v1072_v15, %v1235_v18  ;;  %v1075_v39 = vrot.slane %v1074_v20, 4  ;;  %v1081_v62 = vrot.slane %v613_v33, 5  ;;  %v6323_v7 = vld [vmem:[#allocation2 + $0x1c] ss:$12 sps:$4 sm:$0xff]   ;;  %2241 = vmatprep.mubr.bf16.mxu0 %v6318_v47 }
  0x9d   : > { %1234 = vst [vmem:[#allocation2 + $0x50] sm:$0xf] %v1069_v56  ;;  %1237 = vst [vmem:[#allocation2 + $0x5c] sm:$0xf] %v1236_v35  ;;  %v991_v58 = vsel %vm7160_vm14, %v933_v11, %v990_v34  ;;  %v1080_v4 = vrot.slane %v1079_v36, 4  ;;  %v1084_v45 = vrot.slane %v7213_v52, 5 }
  0x9e   : > { %v1086_v49 = vrot.slane %v618_v37, 4  ;;  %992 = vst [vmem:[#allocation2 + $0x30] sm:$0x1] %v991_v58  ;;  %v6300_v16 = vld [vmem:[#allocation2 + $0x20] ss:$12 sps:$4 sm:$0xff]   ;;  %v1077_v18 = vsel %vm7031_vm7, %v1075_v39, %v1076_v27  ;;  %v626_v11 = vshrl.u32 %v7215_v50, 16  ;;  %2622 = vmatpush1.bf16.msra.mxu1 %v6302_v8  ;;  %v1082_v23 = vor.u32 %v1081_v62, %v7221_v42 }
  0x9f   : > { %2240 = vmatpush2.bf16.msra.mxu0 %v6317_v44  ;;  %v5847_v44 = vpack.c.bf16 %v306_v61, %v306_v61  ;;  %1238 = vst [vmem:[#allocation2 + $0x68] sm:$0xf] %v1077_v18  ;;  %v1240_v22 = vsel %vm7044_vm8, %v1080_v4, %v1239_v41  ;;  %2623 = vmatprep.subr.bf16.mxu1 %v8957_v2  ;;  %v1243_v53 = vld [vmem:[#allocation2 + $0x8c] sm:$0xf]  ;;  %v634_v30 = vshrl.u32 %v7230_v10, 16  ;;  %v7242_v27 = vshll.u32 %v7230_v10, 16 }
  0xa0   : > { %v6321_v21 = vld [vmem:[#allocation2] ss:$12 sps:$4 sm:$0xff]   ;;  %v1087_v24 = vor.u32 %v1086_v49, %v1084_v45  ;;  %1241 = vst [vmem:[#allocation2 + $0x74] sm:$0xf] %v1240_v22  ;;  %v6320_v14 = vld [vmem:[#allocation6 + $0x68] ss:$12 sps:$4 sm:$0xff]  }
  0xa1   : > { %467 = vst [vmem:[#allocation2 + $0xc4] sm:$0xf] %v5847_v44  ;;  %v1083_v8 = vrot.slane %v1082_v23, 4  ;;  %v7246_v28 = vrot.slane %v626_v11, 4  ;;  %2455 = vmatmul.mubr.bf16.gmra.mxu1 %v6300_v16  ;;  %v1089_v29 = vrot.slane %v629_v26, 5  ;;  %v1094_v56 = vrot.slane %v634_v30, 4 }
  0xa2   : > { %v1088_v15 = vrot.slane %v1087_v24, 4  ;;  %2242 = vmatmul.mubr.bf16.vlgmr.msra.gmra.mxu0 %v6321_v21  ;;  %v580_v20 = vrot.slane %v578_v51, 7  ;;  %v588_v34 = vrot.slane %v586_v43, 7  ;;  %2464 = vmatprep.mubr.bf16.mxu1 %v8957_v2  ;;  %v935_v35 = vrot.slane %v7154_v60, 4  ;;  %v868_v58 = vld [vmem:[#allocation2 + $0x48] sm:$0xf] }
  0xa3   : > { %2624 = vmatpush1.bf16.msra.mxu1 %v6310_v63  ;;  %v1085_v61 = vsel %vm7031_vm7, %v1083_v8, %v1084_v45  ;;  %v1092_v41 = vrot.slane %v7242_v27, 5  ;;  %2249 = vmatprep.mubr.bf16.mxu0 %v6323_v7  ;;  %v6325_v51 = vld [vmem:[#allocation2 + $0x18] ss:$12 sps:$4 sm:$0xff]   ;;  %v1090_v43 = vor.u32 %v1089_v29, %v7246_v28  ;;  %v6326_v62 = vld [vmem:[#allocation6 + $0x50] ss:$12 sps:$4 sm:$0xff]   ;;  %v596_v21 = vrot.slane %v594_v6, 7 }
  0xa4   : > { %v1324_v36 = vld [vmem:[#allocation2 + $0x5c] sm:$0x8]  ;;  %v1244_v39 = vsel %vm7044_vm8, %v1088_v15, %v1243_v53  ;;  %2625 = vmatprep.subr.bf16.mxu1 %v8957_v2  ;;  %1242 = vst [vmem:[#allocation2 + $0x80] sm:$0xf] %v1085_v61  ;;  %v583_v63 = vor.u32 %v581_v57, %v580_v20  ;;  %v584_v4 = vrot.slane %v580_v20, 4  ;;  %v591_v16 = vor.u32 %v7143_v54, %v588_v34 }
  0xa5   : > { %v1325_v40 = vsel %vm7101_vm13, %v7143_v54, %v1324_v36  ;;  %1245 = vst [vmem:[#allocation2 + $0x8c] sm:$0xf] %v1244_v39  ;;  %v1095_v45 = vor.u32 %v1094_v56, %v1092_v41  ;;  %v1247_v49 = vld [vmem:[#allocation2 + $0xa4] sm:$0xf]  ;;  %v1091_v18 = vrot.slane %v1090_v43, 4  ;;  %v599_v20 = vor.u32 %v597_v9, %v596_v21 }
  0xa6   : > { %1326 = vst [vmem:[#allocation2 + $0x5c] sm:$0x8] %v1325_v40  ;;  %v869_v44 = vsel %vm7089_vm12, %v583_v63, %v868_v58  ;;  %v7273_v47 = vld [vmem:[#allocation2 + $0xac] sm:$0xf]  ;;  %v592_v57 = vsel %vm7076_vm11, %v584_v4, %v591_v16  ;;  %v7279_v23 = vld [vmem:[#allocation2 + $0xb8] sm:$0xf] }
  0xa7   : > { %2626 = vmatpush1.bf16.msra.mxu1 %v6320_v14  ;;  %v1327_v22 = vld [vmem:[#allocation2 + $0x74] sm:$0x8]  ;;  %v1096_v38 = vrot.slane %v1095_v45, 4  ;;  %870 = vst [vmem:[#allocation2 + $0x48] sm:$0xf] %v869_v44  ;;  %v642_v54 = vshrl.u32 %v7273_v47, 16  ;;  %v1093_v6 = vsel %vm7031_vm7, %v1091_v18, %v1092_v41 }
  0xa8   : > { %v1328_v24 = vsel %vm7101_vm13, %v7183_v17, %v1327_v22  ;;  %2627 = vmatprep.subr.bf16.mxu1 %v8957_v2  ;;  %v6328_v7 = vld [vmem:[#allocation2 + $0x34] ss:$12 sps:$4 sm:$0xff]   ;;  %871 = vst [vmem:[#allocation2 + $0x54] sm:$0xf] %v592_v57  ;;  %v645_v53 = vshll.u32 %v7273_v47, 16  ;;  %v650_v14 = vshrl.u32 %v7279_v23, 16 }
  0xa9   : > { %v872_v8 = vld [vmem:[#allocation2 + $0x60] sm:$0xf]  ;;  %1329 = vst [vmem:[#allocation2 + $0x74] sm:$0x8] %v1328_v24  ;;  %1246 = vst [vmem:[#allocation2 + $0x98] sm:$0xf] %v1093_v6  ;;  %v1248_v15 = vsel %vm7044_vm8, %v1096_v38, %v1247_v49  ;;  %2465 = vmatmul.mubr.bf16.gmra.mxu1 %v6308_v59 }
  0xaa   : > { %v7293_v29 = vshll.u32 %v7279_v23, 16  ;;  %v7297_v56 = vrot.slane %v642_v54, 4  ;;  %2250 = vmatmul.mubr.bf16.gmra.mxu0 %v6325_v51  ;;  %v6331_v34 = vld [vmem:[#allocation6 + $0x38] ss:$12 sps:$4 sm:$0xff]   ;;  %1249 = vst [vmem:[#allocation2 + $0xa4] sm:$0xf] %v1248_v15  ;;  %2474 = vmatprep.mubr.bf16.mxu1 %v8957_v2  ;;  %v873_v59 = vsel %vm7089_vm12, %v599_v20, %v872_v8 }
  0xab   : > { %v1097_v36 = vrot.slane %v645_v53, 5  ;;  %v1102_v61 = vrot.slane %v650_v14, 4  ;;  %v600_v39 = vrot.slane %v596_v21, 4  ;;  %v604_v41 = vrot.slane %v602_v19, 7  ;;  %2628 = vmatpush1.bf16.msra.mxu1 %v6326_v62  ;;  %2259 = vmatprep.mubr.bf16.mxu0 %v6328_v7  ;;  %v6330_v46 = vld [vmem:[#allocation2 + $0x30] ss:$12 sps:$4 sm:$0xff]  }
  0xac   : > { %v1330_v9 = vld [vmem:[#allocation2 + $0x8c] sm:$0x8]  ;;  %v1100_v58 = vrot.slane %v7293_v29, 5  ;;  %2629 = vmatprep.subr.bf16.mxu1 %v8957_v2  ;;  %v1251_v51 = vld [vmem:[#allocation2 + $0xbc] sm:$0xf]  ;;  %v612_v4 = vrot.slane %v610_v31, 7 }
  0xad   : > { %v1331_v40 = vsel %vm7101_vm13, %v7213_v52, %v1330_v9  ;;  %v1098_v19 = vor.u32 %v1097_v36, %v7297_v56  ;;  %v607_v43 = vor.u32 %v7183_v17, %v604_v41  ;;  %874 = vst [vmem:[#allocation2 + $0x60] sm:$0xf] %v873_v59  ;;  %v307_v63 = vld [vmem:[%s6971_s15 + $0x78] sm:$0xff]  ;;  %v6316_v62 = vld [vmem:[#allocation2 + $0x50] ss:$12 sps:$4 sm:$0xff]   ;;  %v620_v44 = vrot.slane %v618_v37, 7 }
  0xae   : > { %1332 = vst [vmem:[#allocation2 + $0x8c] sm:$0x8] %v1331_v40  ;;  %v6336_v45 = vld [vmem:[#allocation6 + $0x20] ss:$12 sps:$4 sm:$0xff]   ;;  %v1103_v49 = vor.u32 %v1102_v61, %v1100_v58  ;;  %v5848_v16 = vpack.c.bf16 %v307_v63, %v307_v63  ;;  %v7321_v18 = vld [vmem:[#allocation2 + $0xc4] sm:$0xf]  ;;  %v615_v37 = vor.u32 %v613_v33, %v612_v4 }
  0xaf   : > { %v308_v21 = vld [vmem:[%s6971_s15 + $0x80] sm:$0xff]  ;;  %v993_v22 = vld [vmem:[#allocation2 + $0x48] sm:$0x1]  ;;  %v1099_v17 = vrot.slane %v1098_v19, 4  ;;  %v608_v38 = vsel %vm7076_vm11, %v600_v39, %v607_v43  ;;  %v658_v57 = vshrl.u32 %v7321_v18, 16  ;;  %v661_v31 = vshll.u32 %v7321_v18, 16  ;;  %2630 = vmatpush1.bf16.msra.mxu1 %v6331_v34 }
  0xb0   : > { %v309_v24 = vld [vmem:[%s6971_s15 + $0x88] sm:$0xff]  ;;  %v994_v7 = vsel %vm7160_vm14, %v935_v35, %v993_v22  ;;  %v1104_v32 = vrot.slane %v1103_v49, 4  ;;  %875 = vst [vmem:[#allocation2 + $0x6c] sm:$0xf] %v608_v38  ;;  %468 = vst [vmem:[#allocation2 + $0xd0] sm:$0xf] %v5848_v16  ;;  %2631 = vmatprep.subr.bf16.mxu1 %v8957_v2  ;;  %v623_v60 = vor.u32 %v7213_v52, %v620_v44 }
  0xb1   : > { %v616_v6 = vrot.slane %v612_v4, 4  ;;  %v876_v8 = vld [vmem:[#allocation2 + $0x78] sm:$0xf]  ;;  %v310_v15 = vld [vmem:[%s6971_s15 + $0x90] sm:$0xff]  ;;  %995 = vst [vmem:[#allocation2 + $0x48] sm:$0x1] %v994_v7  ;;  %v1101_v20 = vsel %vm7031_vm7, %v1099_v17, %v1100_v58  ;;  %v5849_v34 = vpack.c.bf16 %v308_v21, %v308_v21  ;;  %v5850_v36 = vpack.c.bf16 %v309_v24, %v309_v24  ;;  %2475 = vmatmul.mubr.bf16.gmra.mxu1 %v6316_v62 }
  0xb2   : > { %v1333_v35 = vld [vmem:[#allocation2 + $0xa4] sm:$0x8]  ;;  %1250 = vst [vmem:[#allocation2 + $0xb0] sm:$0xf] %v1101_v20  ;;  %v1252_v61 = vsel %vm7044_vm8, %v1104_v32, %v1251_v51  ;;  %v7346_v25 = vrot.slane %v658_v57, 4  ;;  %v1105_v33 = vrot.slane %v661_v31, 5  ;;  %v877_v39 = vsel %vm7089_vm12, %v615_v37, %v876_v8  ;;  %2260 = vmatmul.mubr.bf16.gmra.mxu0 %v6330_v46  ;;  %2484 = vmatprep.mubr.bf16.mxu1 %v8957_v2 }
  0xb3   : > { %v1334_v52 = vsel %vm7101_vm13, %v7242_v27, %v1333_v35  ;;  %1253 = vst [vmem:[#allocation2 + $0xbc] sm:$0xf] %v1252_v61  ;;  %v6341_v41 = vld [vmem:[#allocation6 + $0x8] ss:$12 sps:$4 sm:$0xff]   ;;  %v624_v9 = vsel %vm7076_vm11, %v616_v6, %v623_v60  ;;  %878 = vst [vmem:[#allocation2 + $0x78] sm:$0xf] %v877_v39  ;;  %v5851_v59 = vpack.c.bf16 %v310_v15, %v310_v15  ;;  %2632 = vmatpush1.bf16.msra.mxu1 %v6336_v45 }
  0xb4   : > { %v6346_v58 = vld [vmem:[#allocation6 + $0x230] ss:$12 sps:$4 sm:$0xff]   ;;  %469 = vst [vmem:[#allocation2 + $0xdc] sm:$0xf] %v5849_v34  ;;  %470 = vst [vmem:[#allocation2 + $0xe8] sm:$0xf] %v5850_v36  ;;  %2633 = vmatprep.subr.bf16.mxu1 %v8957_v2  ;;  %v1106_v43 = vor.u32 %v1105_v33, %v7346_v25  ;;  %v5852_v16 = vpack.c.bf16 %v311_v3, %v311_v3 }
  0xb5   : > { %1335 = vst [vmem:[#allocation2 + $0xa4] sm:$0x8] %v1334_v52  ;;  %v996_v40 = vld [vmem:[#allocation2 + $0x60] sm:$0x1]  ;;  %879 = vst [vmem:[#allocation2 + $0x84] sm:$0xf] %v624_v9  ;;  %6020 = vmatprep.subr.bf16.mxu0 %v6346_v58 }
  0xb6   : > { %v628_v46 = vrot.slane %v626_v11, 7  ;;  %v6322_v19 = vld [vmem:[#allocation2 + $0x68] ss:$12 sps:$4 sm:$0xff]   ;;  %v997_v51 = vsel %vm7160_vm14, %v937_v55, %v996_v40  ;;  %471 = vst [vmem:[#allocation2 + $0xf4] sm:$0xf] %v5851_v59  ;;  %6021 = vmatpush3.bf16.msra.mxu0 %v6346_v58  ;;  %v636_v11 = vrot.slane %v634_v30, 7 }
  0xb7   : > { %998 = vst [vmem:[#allocation2 + $0x60] sm:$0x1] %v997_v51  ;;  %v6348_v63 = vld [vmem:[#allocation6 + $0x170] ss:$12 sps:$4 sm:$0xff]   ;;  %v939_v45 = vrot.slane %v7221_v42, 4  ;;  %2634 = vmatpush1.bf16.msra.mxu1 %v6341_v41  ;;  %v941_v10 = vrot.slane %v7246_v28, 4 }
  0xb8   : > { %v631_v4 = vor.u32 %v629_v26, %v628_v46  ;;  %v632_v62 = vrot.slane %v628_v46, 4  ;;  %v7372_v55 = vld [vmem:[#allocation2 + $0xd0] sm:$0xf]  ;;  %v6333_v44 = vld [vmem:[#allocation2 + $0x4c] ss:$12 sps:$4 sm:$0xff]   ;;  %v639_v17 = vor.u32 %v7242_v27, %v636_v11  ;;  %v1107_v42 = vrot.slane %v1106_v43, 4  ;;  %2635 = vmatprep.subr.bf16.mxu1 %v8957_v2 }
  0xb9   : > { %v880_v49 = vld [vmem:[#allocation2 + $0x90] sm:$0xf]  ;;  %v6335_v21 = vld [vmem:[#allocation2 + $0x48] ss:$12 sps:$4 sm:$0xff]   ;;  %v666_v22 = vshrl.u32 %v7372_v55, 16  ;;  %v7380_v26 = vshll.u32 %v7372_v55, 16  ;;  %2269 = vmatprep.mubr.bf16.mxu0 %v6333_v44  ;;  %2485 = vmatmul.mubr.bf16.gmra.mxu1 %v6322_v19 }
  0xba   : > { %v881_v50 = vsel %vm7089_vm12, %v631_v4, %v880_v49  ;;  %472 = vst [vmem:[#allocation2 + $0x100] sm:$0xf] %v5852_v16  ;;  %v644_v30 = vrot.slane %v642_v54, 7  ;;  %v1336_v38 = vld [vmem:[#allocation2 + $0xbc] sm:$0x8]  ;;  %v640_v28 = vsel %vm7076_vm11, %v632_v62, %v639_v17  ;;  %v652_v7 = vrot.slane %v650_v14, 7  ;;  %2270 = vmatmul.mubr.bf16.gmra.mxu0 %v6335_v21  ;;  %2494 = vmatprep.mubr.bf16.mxu1 %v8957_v2 }
  0xbb   : > { %882 = vst [vmem:[#allocation2 + $0x90] sm:$0xf] %v881_v50  ;;  %v1110_v27 = vrot.slane %v666_v22, 4  ;;  %v999_v24 = vld [vmem:[#allocation2 + $0x78] sm:$0x1]  ;;  %v1337_v32 = vsel %vm7101_vm13, %v7293_v29, %v1336_v38  ;;  %v1108_v54 = vrot.slane %v7380_v26, 5  ;;  %2636 = vmatpush2.bf16.msra.mxu1 %v6348_v63 }
  0xbc   : > { %v1000_v37 = vsel %vm7160_vm14, %v939_v45, %v999_v24  ;;  %883 = vst [vmem:[#allocation2 + $0x9c] sm:$0xf] %v640_v28  ;;  %v648_v6 = vrot.slane %v644_v30, 4  ;;  %1338 = vst [vmem:[#allocation2 + $0xbc] sm:$0x8] %v1337_v32  ;;  %v655_v20 = vor.u32 %v7293_v29, %v652_v7  ;;  %2637 = vmatprep.subr.bf16.mxu1 %v8957_v2  ;;  %v313_v50 = vld [vmem:[%s6971_s15 + $0xa8] sm:$0xff] }
  0xbd   : > { %v1255_v8 = vld [vmem:[#allocation2 + $0xd4] sm:$0xf]  ;;  %1001 = vst [vmem:[#allocation2 + $0x78] sm:$0x1] %v1000_v37  ;;  %v7398_v23 = vld [vmem:[#allocation2 + $0xdc] sm:$0xf]  ;;  %v1109_v35 = vsel %vm7031_vm7, %v1107_v42, %v1108_v54  ;;  %v1111_v61 = vor.u32 %v1110_v27, %v1108_v54  ;;  %v647_v39 = vor.u32 %v645_v53, %v644_v30  ;;  %v5854_v32 = vpack.c.bf16 %v313_v50, %v313_v50 }
  0xbe   : > { %v7400_v14 = vld [vmem:[#allocation2 + $0xe8] sm:$0xf]  ;;  %v7402_v15 = vld [vmem:[#allocation2 + $0xf4] sm:$0xf]  ;;  %v6327_v60 = vld [vmem:[#allocation2 + $0x80] ss:$12 sps:$4 sm:$0xff]   ;;  %v656_v47 = vsel %vm7076_vm11, %v648_v6, %v655_v20 }
  0xbf   : > { %v6338_v34 = vld [vmem:[#allocation2 + $0x64] ss:$12 sps:$4 sm:$0xff]   ;;  %v6340_v36 = vld [vmem:[#allocation2 + $0x60] ss:$12 sps:$4 sm:$0xff]   ;;  %v674_v33 = vshrl.u32 %v7398_v23, 16  ;;  %v677_v52 = vshll.u32 %v7398_v23, 16 }
  0xc0   : > { %1254 = vst [vmem:[#allocation2 + $0xc8] sm:$0xf] %v1109_v35  ;;  %v682_v29 = vshrl.u32 %v7400_v14, 16  ;;  %v7414_v41 = vshll.u32 %v7400_v14, 16  ;;  %v690_v9 = vshrl.u32 %v7402_v15, 16  ;;  %2279 = vmatprep.mubr.bf16.mxu0 %v6338_v34  ;;  %v1112_v58 = vrot.slane %v1111_v61, 4 }
  0xc1   : > { %v7419_v59 = vrot.slane %v674_v33, 4  ;;  %v693_v40 = vshll.u32 %v7402_v15, 16  ;;  %v312_v53 = vld [vmem:[%s6971_s15 + $0xa0] sm:$0xff]  ;;  %v1113_v46 = vrot.slane %v677_v52, 5  ;;  %887 = vst [vmem:[#allocation2 + $0xb4] sm:$0xf] %v656_v47  ;;  %2495 = vmatmul.mubr.bf16.gmra.mxu1 %v6327_v60 }
  0xc2   : > { %v1116_v19 = vrot.slane %v7414_v41, 5  ;;  %v1118_v51 = vrot.slane %v682_v29, 4  ;;  %v1002_v43 = vld [vmem:[#allocation2 + $0x90] sm:$0x1]  ;;  %v7432_v63 = vrot.slane %v690_v9, 4  ;;  %v1256_v4 = vsel %vm7044_vm8, %v1112_v58, %v1255_v8  ;;  %2280 = vmatmul.mubr.bf16.gmra.mxu0 %v6340_v36  ;;  %2504 = vmatprep.mubr.bf16.mxu1 %v8957_v2 }
  0xc3   : > { %v1003_v62 = vsel %vm7160_vm14, %v941_v10, %v1002_v43  ;;  %v7438_v11 = vld [vmem:[#allocation2 + $0x100] sm:$0xf]  ;;  %v1121_v3 = vrot.slane %v693_v40, 5  ;;  %v6353_v45 = vld [vmem:[#allocation6 + $0x158] ss:$12 sps:$4 sm:$0xff]   ;;  %v1114_v49 = vor.u32 %v1113_v46, %v7419_v59  ;;  %v5853_v38 = vpack.c.bf16 %v312_v53, %v312_v53 }
  0xc4   : > { %1257 = vst [vmem:[#allocation2 + $0xd4] sm:$0xf] %v1256_v4  ;;  %v1119_v16 = vor.u32 %v1118_v51, %v1116_v19  ;;  %1004 = vst [vmem:[#allocation2 + $0x90] sm:$0x1] %v1003_v62  ;;  %v698_v44 = vshrl.u32 %v7438_v11, 16  ;;  %v7445_v21 = vshll.u32 %v7438_v11, 16  ;;  %2638 = vmatpush2.bf16.msra.mxu1 %v6353_v45 }
  0xc5   : > { %v884_v17 = vld [vmem:[#allocation2 + $0xa8] sm:$0xf]  ;;  %v1259_v10 = vld [vmem:[#allocation2 + $0xec] sm:$0xf]  ;;  %v1122_v42 = vor.u32 %v1121_v3, %v7432_v63  ;;  %v943_v27 = vrot.slane %v7297_v56, 4  ;;  %v1115_v28 = vrot.slane %v1114_v49, 4  ;;  %2639 = vmatprep.subr.bf16.mxu1 %v8957_v2 }
  0xc6   : > { %v885_v30 = vsel %vm7089_vm12, %v647_v39, %v884_v17  ;;  %v6343_v24 = vld [vmem:[#allocation2 + $0x7c] ss:$12 sps:$4 sm:$0xff]   ;;  %v1120_v7 = vrot.slane %v1119_v16, 4  ;;  %v6332_v54 = vld [vmem:[#allocation2 + $0x98] ss:$12 sps:$4 sm:$0xff]   ;;  %v1124_v6 = vrot.slane %v7445_v21, 5 }
  0xc7   : > { %886 = vst [vmem:[#allocation2 + $0xa8] sm:$0xf] %v885_v30  ;;  %v1123_v37 = vrot.slane %v1122_v42, 4  ;;  %v1126_v8 = vrot.slane %v698_v44, 4  ;;  %473 = vst [vmem:[#allocation2 + $0x10c] sm:$0xf] %v5853_v38  ;;  %2289 = vmatprep.mubr.bf16.mxu0 %v6343_v24  ;;  %v1117_v56 = vsel %vm7031_vm7, %v1115_v28, %v1116_v19 }
  0xc8   : > { %v660_v20 = vrot.slane %v658_v57, 7  ;;  %v1260_v60 = vsel %vm7044_vm8, %v1120_v7, %v1259_v10  ;;  %v1263_v34 = vld [vmem:[#allocation2 + $0x104] sm:$0xf]  ;;  %v6357_v36 = vld [vmem:[#allocation6 + $0x218] ss:$12 sps:$4 sm:$0xff]   ;;  %v668_v53 = vrot.slane %v666_v22, 7 }
  0xc9   : > { %474 = vst [vmem:[#allocation2 + $0x118] sm:$0xf] %v5854_v32  ;;  %v6345_v35 = vld [vmem:[#allocation2 + $0x78] ss:$12 sps:$4 sm:$0xff]   ;;  %1258 = vst [vmem:[#allocation2 + $0xe0] sm:$0xf] %v1117_v56  ;;  %v1125_v61 = vsel %vm7031_vm7, %v1123_v37, %v1124_v6  ;;  %v1127_v39 = vor.u32 %v1126_v8, %v1124_v6  ;;  %6022 = vmatprep.subr.bf16.mxu0 %v6357_v36  ;;  %2505 = vmatmul.mubr.bf16.gmra.mxu1 %v6332_v54 }
  0xca   : > { %1261 = vst [vmem:[#allocation2 + $0xec] sm:$0xf] %v1260_v60  ;;  %v663_v57 = vor.u32 %v661_v31, %v660_v20  ;;  %v664_v58 = vrot.slane %v660_v20, 4  ;;  %1262 = vst [vmem:[#allocation2 + $0xf8] sm:$0xf] %v1125_v61  ;;  %v314_v46 = vld [vmem:[%s6971_s15 + $0xb0] sm:$0xff]  ;;  %6023 = vmatpush3.bf16.msra.mxu0 %v6357_v36  ;;  %v671_v31 = vor.u32 %v7380_v26, %v668_v53  ;;  %2514 = vmatprep.mubr.bf16.mxu1 %v8957_v2 }
  0xcb   : > { %v6359_v47 = vld [vmem:[#allocation6 + $0x140] ss:$12 sps:$4 sm:$0xff]   ;;  %v1339_v19 = vld [vmem:[#allocation2 + $0xd4] sm:$0x8]  ;;  %v1128_v43 = vrot.slane %v1127_v39, 4  ;;  %v5855_v4 = vpack.c.bf16 %v314_v46, %v314_v46  ;;  %v315_v3 = vld [vmem:[%s6971_s15 + $0xb8] sm:$0xff]  ;;  %2290 = vmatmul.mubr.bf16.gmra.mxu0 %v6345_v35 }
  0xcc   : > { %v6349_v51 = vld [vmem:[#allocation2 + $0x94] ss:$12 sps:$4 sm:$0xff]   ;;  %v1340_v18 = vsel %vm7101_vm13, %v7380_v26, %v1339_v19  ;;  %2640 = vmatpush2.bf16.msra.mxu1 %v6359_v47  ;;  %v676_v55 = vrot.slane %v674_v33, 7  ;;  %v5856_v16 = vpack.c.bf16 %v315_v3, %v315_v3  ;;  %v684_v26 = vrot.slane %v682_v29, 7  ;;  %v892_v14 = vld [vmem:[#allocation2 + $0xd8] sm:$0xf] }
  0xcd   : > { %v888_v62 = vld [vmem:[#allocation2 + $0xc0] sm:$0xf]  ;;  %1341 = vst [vmem:[#allocation2 + $0xd4] sm:$0x8] %v1340_v18  ;;  %v1264_v22 = vsel %vm7044_vm8, %v1128_v43, %v1263_v34  ;;  %475 = vst [vmem:[#allocation2 + $0x124] sm:$0xf] %v5855_v4  ;;  %2299 = vmatprep.mubr.bf16.mxu0 %v6349_v51  ;;  %v672_v10 = vsel %vm7076_vm11, %v664_v58, %v671_v31  ;;  %2641 = vmatprep.subr.bf16.mxu1 %v8957_v2 }
  0xce   : > { %v1005_v45 = vld [vmem:[#allocation2 + $0xa8] sm:$0x1]  ;;  %v889_v49 = vsel %vm7089_vm12, %v663_v57, %v888_v62  ;;  %v316_v17 = vld [vmem:[%s6971_s15 + $0xc0] sm:$0xff]  ;;  %1265 = vst [vmem:[#allocation2 + $0x104] sm:$0xf] %v1264_v22  ;;  %v679_v42 = vor.u32 %v677_v52, %v676_v55  ;;  %v680_v30 = vrot.slane %v676_v55, 4  ;;  %v687_v23 = vor.u32 %v7414_v41, %v684_v26 }
  0xcf   : > { %v1006_v33 = vsel %vm7160_vm14, %v943_v27, %v1005_v45  ;;  %v7487_v50 = vld [vmem:[#allocation2 + $0x10c] sm:$0xf]  ;;  %890 = vst [vmem:[#allocation2 + $0xc0] sm:$0xf] %v889_v49  ;;  %v317_v29 = vld [vmem:[%s6971_s15 + $0xc8] sm:$0xff]  ;;  %v5857_v52 = vpack.c.bf16 %v316_v17, %v316_v17  ;;  %v945_v36 = vrot.slane %v7346_v25, 4 }
  0xd0   : > { %v7494_v38 = vld [vmem:[#allocation2 + $0xb0] ss:$12 sps:$4 sm:$0xff]   ;;  %1007 = vst [vmem:[#allocation2 + $0xa8] sm:$0x1] %v1006_v33  ;;  %v7498_v28 = vld [vmem:[#allocation2 + $0x118] sm:$0xf]  ;;  %v893_v6 = vsel %vm7089_vm12, %v679_v42, %v892_v14  ;;  %v5858_v8 = vpack.c.bf16 %v317_v29, %v317_v29  ;;  %v688_v34 = vsel %vm7076_vm11, %v680_v30, %v687_v23 }
  0xd1   : > { %v7496_v24 = vld [vmem:[#allocation2 + $0x90] ss:$12 sps:$4 sm:$0xff]   ;;  %v706_v27 = vshrl.u32 %v7487_v50, 16  ;;  %v709_v7 = vshll.u32 %v7487_v50, 16  ;;  %891 = vst [vmem:[#allocation2 + $0xcc] sm:$0xf] %v672_v10  ;;  %2515 = vmatmul.mubr.bf16.gmra.mxu1 %v7494_v38 }
  0xd2   : > { %476 = vst [vmem:[#allocation2 + $0x130] sm:$0xf] %v5856_v16  ;;  %v1342_v32 = vld [vmem:[#allocation2 + $0xec] sm:$0x8]  ;;  %v714_v54 = vshrl.u32 %v7498_v28, 16  ;;  %v7506_v37 = vshll.u32 %v7498_v28, 16  ;;  %2524 = vmatprep.mubr.bf16.mxu1 %v8957_v2 }
  0xd3   : > { %v1343_v20 = vsel %vm7101_vm13, %v7414_v41, %v1342_v32  ;;  %v7515_v56 = vrot.slane %v706_v27, 4  ;;  %v1129_v60 = vrot.slane %v709_v7, 5  ;;  %894 = vst [vmem:[#allocation2 + $0xd8] sm:$0xf] %v893_v6  ;;  %477 = vst [vmem:[#allocation2 + $0x13c] sm:$0xf] %v5857_v52  ;;  %2300 = vmatmul.mubr.bf16.gmra.mxu0 %v7496_v24 }
  0xd4   : > { %1344 = vst [vmem:[#allocation2 + $0xec] sm:$0x8] %v1343_v20  ;;  %v1132_v35 = vrot.slane %v7506_v37, 5  ;;  %v1134_v41 = vrot.slane %v714_v54, 4  ;;  %895 = vst [vmem:[#allocation2 + $0xe4] sm:$0xf] %v688_v34 }
  0xd5   : > { %v6366_v61 = vld [vmem:[#allocation6 + $0x128] ss:$12 sps:$4 sm:$0xff]   ;;  %478 = vst [vmem:[#allocation2 + $0x148] sm:$0xf] %v5858_v8  ;;  %v947_v39 = vrot.slane %v7419_v59, 4  ;;  %v1130_v57 = vor.u32 %v1129_v60, %v7515_v56  ;;  %v7542_v31 = vrot.slane %v690_v9, 7 }
  0xd6   : > { %v1135_v58 = vor.u32 %v1134_v41, %v1132_v35  ;;  %v1267_v47 = vld [vmem:[#allocation2 + $0x11c] sm:$0xf]  ;;  %v7527_v53 = vld [vmem:[#allocation2 + $0x124] sm:$0xf]  ;;  %2642 = vmatpush2.bf16.msra.mxu1 %v6366_v61  ;;  %v1008_v19 = vld [vmem:[#allocation2 + $0xc0] sm:$0x1] }
  0xd7   : > { %v1345_v25 = vld [vmem:[#allocation2 + $0x104] sm:$0x8]  ;;  %v1131_v46 = vrot.slane %v1130_v57, 4  ;;  %v722_v51 = vshrl.u32 %v7527_v53, 16  ;;  %v7536_v43 = vld [vmem:[#allocation2 + $0xac] ss:$12 sps:$4 sm:$0xff]   ;;  %v1009_v18 = vsel %vm7160_vm14, %v945_v36, %v1008_v19  ;;  %2643 = vmatprep.subr.bf16.mxu1 %v8957_v2  ;;  %v695_v32 = vor.u32 %v693_v40, %v7542_v31 }
  0xd8   : > { %v1346_v59 = vsel %vm7101_vm13, %v7445_v21, %v1345_v25  ;;  %v1136_v4 = vrot.slane %v1135_v58, 4  ;;  %v7545_v62 = vld [vmem:[#allocation2 + $0xc8] ss:$12 sps:$4 sm:$0xff]   ;;  %1010 = vst [vmem:[#allocation2 + $0xc0] sm:$0x1] %v1009_v18  ;;  %v725_v22 = vshll.u32 %v7527_v53, 16  ;;  %2309 = vmatprep.mubr.bf16.mxu0 %v7536_v43 }
  0xd9   : > { %1347 = vst [vmem:[#allocation2 + $0x104] sm:$0x8] %v1346_v59  ;;  %v1133_v3 = vsel %vm7031_vm7, %v1131_v46, %v1132_v35  ;;  %v7549_v55 = vld [vmem:[#allocation2 + $0x130] sm:$0xf]  ;;  %v7554_v45 = vrot.slane %v722_v51, 4  ;;  %v696_v30 = vrot.slane %v7542_v31, 4  ;;  %2525 = vmatmul.mubr.bf16.gmra.mxu1 %v7545_v62 }
  0xda   : > { %1266 = vst [vmem:[#allocation2 + $0x110] sm:$0xf] %v1133_v3  ;;  %v1268_v9 = vsel %vm7044_vm8, %v1136_v4, %v1267_v47  ;;  %v730_v49 = vshrl.u32 %v7549_v55, 16  ;;  %v7561_v16 = vshll.u32 %v7549_v55, 16  ;;  %v1011_v26 = vld [vmem:[#allocation2 + $0xd8] sm:$0x1]  ;;  %2534 = vmatprep.mubr.bf16.mxu1 %v8957_v2 }
  0xdb   : > { %v7563_v17 = vld [vmem:[#allocation2 + $0x13c] sm:$0xf]  ;;  %v7565_v33 = vld [vmem:[#allocation2 + $0xa8] ss:$12 sps:$4 sm:$0xff]   ;;  %1269 = vst [vmem:[#allocation2 + $0x11c] sm:$0xf] %v1268_v9  ;;  %v1012_v42 = vsel %vm7160_vm14, %v947_v39, %v1011_v26 }
  0xdc   : > { %v1137_v10 = vrot.slane %v725_v22, 5  ;;  %v1140_v14 = vrot.slane %v7561_v16, 5  ;;  %v1142_v29 = vrot.slane %v730_v49, 4  ;;  %1013 = vst [vmem:[#allocation2 + $0xd8] sm:$0x1] %v1012_v42  ;;  %v738_v52 = vshrl.u32 %v7563_v17, 16  ;;  %2310 = vmatmul.mubr.bf16.gmra.mxu0 %v7565_v33 }
  0xdd   : > { %v7575_v23 = vld [vmem:[#allocation2 + $0x148] sm:$0xf]  ;;  %v1271_v8 = vld [vmem:[#allocation2 + $0x134] sm:$0xf]  ;;  %v741_v20 = vshll.u32 %v7563_v17, 16  ;;  %v318_v35 = vld [vmem:[%s6971_s15 + $0xd0] sm:$0xff] }
  0xde   : > { %v1138_v6 = vor.u32 %v1137_v10, %v7554_v45  ;;  %v746_v60 = vshrl.u32 %v7575_v23, 16  ;;  %v7585_v34 = vshll.u32 %v7575_v23, 16  ;;  %v6369_v36 = vld [vmem:[#allocation6 + $0x200] ss:$12 sps:$4 sm:$0xff]   ;;  %v1143_v41 = vor.u32 %v1142_v29, %v1140_v14  ;;  %v1275_v3 = vld [vmem:[#allocation2 + $0x14c] sm:$0xf] }
  0xdf   : > { %v7590_v61 = vrot.slane %v738_v52, 4  ;;  %v700_v15 = vrot.slane %v698_v44, 7  ;;  %v896_v40 = vld [vmem:[#allocation2 + $0xf0] sm:$0xf]  ;;  %v5859_v39 = vpack.c.bf16 %v318_v35, %v318_v35  ;;  %v1145_v58 = vrot.slane %v741_v20, 5  ;;  %6024 = vmatprep.subr.bf16.mxu0 %v6369_v36  ;;  %v319_v29 = vld [vmem:[%s6971_s15 + $0xd8] sm:$0xff] }
  0xe0   : > { %v1139_v57 = vrot.slane %v1138_v6, 4  ;;  %v1148_v47 = vrot.slane %v7585_v34, 5  ;;  %v1150_v25 = vrot.slane %v746_v60, 4  ;;  %v949_v11 = vrot.slane %v7432_v63, 4  ;;  %v7606_v59 = vld [vmem:[#allocation2 + $0xc4] ss:$12 sps:$4 sm:$0xff]   ;;  %6025 = vmatpush3.bf16.msra.mxu0 %v6369_v36 }
  0xe1   : > { %v1144_v44 = vrot.slane %v1143_v41, 4  ;;  %v703_v46 = vor.u32 %v7445_v21, %v700_v15  ;;  %v897_v19 = vsel %vm7089_vm12, %v695_v32, %v896_v40  ;;  %479 = vst [vmem:[#allocation2 + $0x154] sm:$0xf] %v5859_v39  ;;  %v1146_v18 = vor.u32 %v1145_v58, %v7590_v61  ;;  %v6373_v42 = vld [vmem:[#allocation6 + $0x110] ss:$12 sps:$4 sm:$0xff]   ;;  %2319 = vmatprep.mubr.bf16.mxu0 %v7606_v59  ;;  %v320_v40 = vld [vmem:[%s6971_s15 + $0xe0] sm:$0xff] }
  0xe2   : > { %v1141_v4 = vsel %vm7031_vm7, %v1139_v57, %v1140_v14  ;;  %v1151_v31 = vor.u32 %v1150_v25, %v1148_v47  ;;  %898 = vst [vmem:[#allocation2 + $0xf0] sm:$0xf] %v897_v19  ;;  %v951_v9 = vrot.slane %v7515_v56, 4  ;;  %v1348_v26 = vld [vmem:[#allocation2 + $0x11c] sm:$0x8]  ;;  %2644 = vmatpush2.bf16.msra.mxu1 %v6373_v42  ;;  %v708_v41 = vrot.slane %v706_v27, 7 }
  0xe3   : > { %1270 = vst [vmem:[#allocation2 + $0x128] sm:$0xf] %v1141_v4  ;;  %v1272_v21 = vsel %vm7044_vm8, %v1144_v44, %v1271_v8  ;;  %v704_v10 = vsel %vm7076_vm11, %v696_v30, %v703_v46  ;;  %v7617_v14 = vld [vmem:[#allocation2 + $0xe0] ss:$12 sps:$4 sm:$0xff]   ;;  %v1349_v32 = vsel %vm7101_vm13, %v7506_v37, %v1348_v26  ;;  %v1147_v36 = vrot.slane %v1146_v18, 4  ;;  %2645 = vmatprep.subr.bf16.mxu1 %v8957_v2  ;;  %v321_v46 = vld [vmem:[%s6971_s15 + $0xe8] sm:$0xff] }
  0xe4   : > { %v7623_v6 = vld [vmem:[#allocation2 + $0xc0] ss:$12 sps:$4 sm:$0xff]   ;;  %1273 = vst [vmem:[#allocation2 + $0x134] sm:$0xf] %v1272_v21  ;;  %899 = vst [vmem:[#allocation2 + $0xfc] sm:$0xf] %v704_v10  ;;  %v5860_v8 = vpack.c.bf16 %v319_v29, %v319_v29  ;;  %v5861_v58 = vpack.c.bf16 %v320_v40, %v320_v40  ;;  %v711_v44 = vor.u32 %v709_v7, %v708_v41  ;;  %2535 = vmatmul.mubr.bf16.gmra.mxu1 %v7617_v14 }
  0xe5   : > { %1350 = vst [vmem:[#allocation2 + $0x11c] sm:$0x8] %v1349_v32  ;;  %v7625_v35 = vld [vmem:[#allocation2 + $0xdc] ss:$12 sps:$4 sm:$0xff]   ;;  %v1152_v30 = vrot.slane %v1151_v31, 4  ;;  %v716_v15 = vrot.slane %v714_v54, 7  ;;  %v1149_v39 = vsel %vm7031_vm7, %v1147_v36, %v1148_v47  ;;  %2320 = vmatmul.mubr.bf16.gmra.mxu0 %v7623_v6  ;;  %v5862_v19 = vpack.c.bf16 %v321_v46, %v321_v46  ;;  %2544 = vmatprep.mubr.bf16.mxu1 %v8957_v2 }
  0xe6   : > { %480 = vst [vmem:[#allocation2 + $0x160] sm:$0xf] %v5860_v8  ;;  %v900_v57 = vld [vmem:[#allocation2 + $0x108] sm:$0xf]  ;;  %1274 = vst [vmem:[#allocation2 + $0x140] sm:$0xf] %v1149_v39  ;;  %2329 = vmatprep.mubr.bf16.mxu0 %v7625_v35 }
  0xe7   : > { %v1276_v25 = vsel %vm7044_vm8, %v1152_v30, %v1275_v3  ;;  %v712_v27 = vrot.slane %v708_v41, 4  ;;  %v719_v28 = vor.u32 %v7506_v37, %v716_v15  ;;  %v6378_v54 = vld [vmem:[#allocation6 + $0xf8] ss:$12 sps:$4 sm:$0xff]   ;;  %481 = vst [vmem:[#allocation2 + $0x16c] sm:$0xf] %v5861_v58  ;;  %v724_v4 = vrot.slane %v722_v51, 7 }
  0xe8   : > { %1277 = vst [vmem:[#allocation2 + $0x14c] sm:$0xf] %v1276_v25  ;;  %v7643_v47 = vld [vmem:[#allocation2 + $0x154] sm:$0xf]  ;;  %488 = vst [vmem:[#allocation2 + $0x19c] sm:$0xf] %v5861_v58  ;;  %v901_v51 = vsel %vm7089_vm12, %v711_v44, %v900_v57  ;;  %2646 = vmatpush2.bf16.msra.mxu1 %v6378_v54 }
  0xe9   : > { %v732_v50 = vrot.slane %v730_v49, 7  ;;  %v904_v7 = vld [vmem:[#allocation2 + $0x120] sm:$0xf]  ;;  %v1014_v37 = vld [vmem:[#allocation2 + $0xf0] sm:$0x1]  ;;  %v754_v18 = vshrl.u32 %v7643_v47, 16  ;;  %v720_v3 = vsel %vm7076_vm11, %v712_v27, %v719_v28  ;;  %v727_v49 = vor.u32 %v725_v22, %v724_v4  ;;  %2647 = vmatprep.subr.bf16.mxu1 %v8957_v2 }
  0xea   : > { %v757_v31 = vshll.u32 %v7643_v47, 16  ;;  %v7657_v26 = vld [vmem:[#allocation2 + $0xf8] ss:$12 sps:$4 sm:$0xff]   ;;  %v1015_v55 = vsel %vm7160_vm14, %v949_v11, %v1014_v37  ;;  %902 = vst [vmem:[#allocation2 + $0x108] sm:$0xf] %v901_v51  ;;  %v728_v21 = vrot.slane %v724_v4, 4 }
  0xeb   : > { %903 = vst [vmem:[#allocation2 + $0x114] sm:$0xf] %v720_v3  ;;  %482 = vst [vmem:[#allocation2 + $0x178] sm:$0xf] %v5862_v19  ;;  %v735_v10 = vor.u32 %v7561_v16, %v732_v50  ;;  %v322_v42 = vld [vmem:[%s6971_s15 + $0xf0] sm:$0xff]  ;;  %v7669_v63 = vrot.slane %v754_v18, 4  ;;  %v905_v30 = vsel %vm7089_vm12, %v727_v49, %v904_v7 }
  0xec   : > { %489 = vst [vmem:[#allocation2 + $0x1a8] sm:$0xf] %v5862_v19  ;;  %v1351_v29 = vld [vmem:[#allocation2 + $0x134] sm:$0x8]  ;;  %1016 = vst [vmem:[#allocation2 + $0xf0] sm:$0x1] %v1015_v55  ;;  %v5863_v36 = vpack.c.bf16 %v322_v42, %v322_v42  ;;  %2545 = vmatmul.mubr.bf16.gmra.mxu1 %v7657_v26 }
  0xed   : > { %v1153_v11 = vrot.slane %v757_v31, 5  ;;  %v323_v32 = vld [vmem:[%s6971_s15 + $0xf8] sm:$0xff]  ;;  %v1352_v53 = vsel %vm7101_vm13, %v7561_v16, %v1351_v29  ;;  %v7678_v22 = vld [vmem:[#allocation2 + $0xd8] ss:$12 sps:$4 sm:$0xff]   ;;  %v736_v8 = vsel %vm7076_vm11, %v728_v21, %v735_v10  ;;  %v953_v40 = vrot.slane %v7554_v45, 4  ;;  %2554 = vmatprep.mubr.bf16.mxu1 %v8957_v2 }
  0xee   : > { %v6382_v41 = vld [vmem:[#allocation6 + $0x1e8] ss:$12 sps:$4 sm:$0xff]   ;;  %v5864_v15 = vpack.c.bf16 %v323_v32, %v323_v32  ;;  %1353 = vst [vmem:[#allocation2 + $0x134] sm:$0x8] %v1352_v53  ;;  %v7685_v39 = vld [vmem:[#allocation2 + $0x160] sm:$0xf]  ;;  %2330 = vmatmul.mubr.bf16.gmra.mxu0 %v7678_v22 }
  0xef   : > { %v1154_v57 = vor.u32 %v1153_v11, %v7669_v63  ;;  %906 = vst [vmem:[#allocation2 + $0x120] sm:$0xf] %v905_v30  ;;  %907 = vst [vmem:[#allocation2 + $0x12c] sm:$0xf] %v736_v8  ;;  %v7690_v16 = vrot.slane %v738_v52, 7  ;;  %v762_v58 = vshrl.u32 %v7685_v39, 16  ;;  %6026 = vmatprep.subr.bf16.mxu0 %v6382_v41 }
  0xf0   : > { %483 = vst [vmem:[#allocation2 + $0x184] sm:$0xf] %v5863_v36  ;;  %v7694_v25 = vshll.u32 %v7685_v39, 16  ;;  %484 = vst [vmem:[#allocation2 + $0x190] sm:$0xf] %v5864_v15  ;;  %6027 = vmatpush3.bf16.msra.mxu0 %v6382_v41  ;;  %v955_v30 = vrot.slane %v7590_v61, 4 }
  0xf1   : > { %v1354_v45 = vld [vmem:[#allocation2 + $0x14c] sm:$0x8]  ;;  %v1155_v44 = vrot.slane %v1154_v57, 4  ;;  %v744_v28 = vrot.slane %v7690_v16, 4  ;;  %v1158_v46 = vrot.slane %v762_v58, 4  ;;  %v743_v8 = vor.u32 %v741_v20, %v7690_v16 }
  0xf2   : > { %v7696_v27 = vld [vmem:[#allocation2 + $0x16c] sm:$0xf]  ;;  %v1355_v52 = vsel %vm7101_vm13, %v7585_v34, %v1354_v45  ;;  %v1156_v54 = vrot.slane %v7694_v25, 5  ;;  %v6384_v4 = vld [vmem:[#allocation6 + $0xe0] ss:$12 sps:$4 sm:$0xff]  }
  0xf3   : > { %v770_v19 = vshrl.u32 %v7696_v27, 16  ;;  %1356 = vst [vmem:[#allocation2 + $0x14c] sm:$0x8] %v1355_v52  ;;  %v1017_v50 = vld [vmem:[#allocation2 + $0x108] sm:$0x1]  ;;  %v773_v37 = vshll.u32 %v7696_v27, 16  ;;  %2648 = vmatpush2.bf16.msra.mxu1 %v6384_v4 }
  0xf4   : > { %v7709_v7 = vld [vmem:[#allocation2 + $0x178] sm:$0xf]  ;;  %v7712_v3 = vld [vmem:[#allocation2 + $0xf4] ss:$12 sps:$4 sm:$0xff]   ;;  %v1157_v51 = vsel %vm7031_vm7, %v1155_v44, %v1156_v54  ;;  %v1159_v55 = vor.u32 %v1158_v46, %v1156_v54  ;;  %v1279_v49 = vld [vmem:[#allocation2 + $0x164] sm:$0xf]  ;;  %v1018_v21 = vsel %vm7160_vm14, %v951_v9, %v1017_v50  ;;  %2649 = vmatprep.subr.bf16.mxu1 %v8957_v2 }
  0xf5   : > { %v778_v10 = vshrl.u32 %v7709_v7, 16  ;;  %v7721_v42 = vld [vmem:[#allocation2 + $0x110] ss:$12 sps:$4 sm:$0xff]   ;;  %1278 = vst [vmem:[#allocation2 + $0x158] sm:$0xf] %v1157_v51  ;;  %v7724_v29 = vshll.u32 %v7709_v7, 16  ;;  %2339 = vmatprep.mubr.bf16.mxu0 %v7712_v3 }
  0xf6   : > { %1019 = vst [vmem:[#allocation2 + $0x108] sm:$0x1] %v1018_v21  ;;  %v7728_v11 = vrot.slane %v770_v19, 4  ;;  %v1161_v56 = vrot.slane %v773_v37, 5  ;;  %v748_v9 = vrot.slane %v746_v60, 7  ;;  %v1160_v36 = vrot.slane %v1159_v55, 4  ;;  %2555 = vmatmul.mubr.bf16.gmra.mxu1 %v7721_v42 }
  0xf7   : > { %v7736_v32 = vld [vmem:[#allocation2 + $0xf0] ss:$12 sps:$4 sm:$0xff]   ;;  %v1166_v53 = vrot.slane %v778_v10, 4  ;;  %v1164_v23 = vrot.slane %v7724_v29, 5  ;;  %v1020_v60 = vld [vmem:[#allocation2 + $0x120] sm:$0x1]  ;;  %2564 = vmatprep.mubr.bf16.mxu1 %v8957_v2 }
  0xf8   : > { %v1162_v41 = vor.u32 %v1161_v56, %v7728_v11  ;;  %v751_v15 = vor.u32 %v7585_v34, %v748_v9  ;;  %v1280_v57 = vsel %vm7044_vm8, %v1160_v36, %v1279_v49  ;;  %v1021_v45 = vsel %vm7160_vm14, %v953_v40, %v1020_v60  ;;  %v7751_v44 = vld [vmem:[#allocation2 + $0x184] sm:$0xf]  ;;  %v7753_v52 = vld [vmem:[#allocation2 + $0x190] sm:$0xf]  ;;  %v908_v17 = vld [vmem:[#allocation2 + $0x138] sm:$0xf]  ;;  %2340 = vmatmul.mubr.bf16.gmra.mxu0 %v7736_v32 }
  0xf9   : > { %1281 = vst [vmem:[#allocation2 + $0x164] sm:$0xf] %v1280_v57  ;;  %v1167_v16 = vor.u32 %v1166_v53, %v1164_v23  ;;  %1022 = vst [vmem:[#allocation2 + $0x120] sm:$0x1] %v1021_v45  ;;  %v786_v54 = vshrl.u32 %v7751_v44, 16  ;;  %v8961_v46 = vshll.u32 %v7751_v44, 16  ;;  %v909_v51 = vsel %vm7089_vm12, %v743_v8, %v908_v17 }
  0xfa   : > { %v1163_v20 = vrot.slane %v1162_v41, 4  ;;  %v1283_v34 = vld [vmem:[#allocation2 + $0x17c] sm:$0xf]  ;;  %v8960_v40 = vshrl.u32 %v7753_v52, 16  ;;  %v7761_v4 = vshll.u32 %v7753_v52, 16  ;;  %v752_v50 = vsel %vm7076_vm11, %v744_v28, %v751_v15 }
  0xfb   : > { %v1168_v49 = vrot.slane %v1167_v16, 4  ;;  %v7772_v21 = vrot.slane %v786_v54, 4  ;;  %v1169_v56 = vrot.slane %v8961_v46, 5  ;;  %910 = vst [vmem:[#allocation2 + $0x138] sm:$0xf] %v909_v51 }
  0xfc   : > { %v1165_v55 = vsel %vm7031_vm7, %v1163_v20, %v1164_v23  ;;  %911 = vst [vmem:[#allocation2 + $0x144] sm:$0xf] %v752_v50  ;;  %v7776_v9 = vld [vmem:[#allocation2 + $0x10c] ss:$12 sps:$4 sm:$0xff]   ;;  %v1172_v28 = vrot.slane %v7761_v4, 5  ;;  %v1174_v23 = vrot.slane %v8960_v40, 4 }
  0xfd   : > { %1282 = vst [vmem:[#allocation2 + $0x170] sm:$0xf] %v1165_v55  ;;  %v7779_v36 = vld [vmem:[#allocation2 + $0x128] ss:$12 sps:$4 sm:$0xff]   ;;  %v1284_v8 = vsel %vm7044_vm8, %v1168_v49, %v1283_v34  ;;  %v1170_v41 = vor.u32 %v1169_v56, %v7772_v21  ;;  %v6389_v60 = vld [vmem:[#allocation6 + $0xc8] ss:$12 sps:$4 sm:$0xff]   ;;  %2349 = vmatprep.mubr.bf16.mxu0 %v7776_v9 }
  0xfe   : > { %v7788_v15 = vld [vmem:[#allocation2 + $0x108] ss:$12 sps:$4 sm:$0xff]   ;;  %1285 = vst [vmem:[#allocation2 + $0x17c] sm:$0xf] %v1284_v8  ;;  %v7790_v57 = vld [vmem:[#allocation2 + $0x19c] sm:$0xf]  ;;  %v1175_v20 = vor.u32 %v1174_v23, %v1172_v28  ;;  %2650 = vmatpush2.bf16.msra.mxu1 %v6389_v60 }
  0xff   : > { %v7792_v45 = vld [vmem:[#allocation2 + $0x1a8] sm:$0xf]  ;;  %v1171_v17 = vrot.slane %v1170_v41, 4  ;;  %v1287_v16 = vld [vmem:[#allocation2 + $0x194] sm:$0xf]  ;;  %v8959_v34 = vshrl.u32 %v7790_v57, 16  ;;  %2565 = vmatmul.mubr.bf16.gmra.mxu1 %v7779_v36 }
 0x100   : > { %v8955_v50 = vshll.u32 %v7790_v57, 16  ;;  %v1357_v51 = vld [vmem:[#allocation2 + $0x164] sm:$0x8]  ;;  %v8956_v49 = vshrl.u32 %v7792_v45, 16  ;;  %v1176_v41 = vrot.slane %v1175_v20, 4  ;;  %v7805_v23 = vshll.u32 %v7792_v45, 16  ;;  %2350 = vmatmul.mubr.bf16.gmra.mxu0 %v7788_v15  ;;  %2574 = vmatprep.mubr.bf16.mxu1 %v8957_v2 }
 0x101   : > { %v7796_v55 = vld [vmem:[#allocation2 + $0x124] ss:$12 sps:$4 sm:$0xff]   ;;  %v1358_v56 = vsel %vm7101_vm13, %v7694_v25, %v1357_v51  ;;  %v1173_v8 = vsel %vm7031_vm7, %v1171_v17, %v1172_v28  ;;  %v7811_v53 = vrot.slane %v8959_v34, 4  ;;  %v1291_v2 = vld [vmem:[#allocation2 + $0x1ac] sm:$0xf] }
 0x102   : > { %1359 = vst [vmem:[#allocation2 + $0x164] sm:$0x8] %v1358_v56  ;;  %1286 = vst [vmem:[#allocation2 + $0x188] sm:$0xf] %v1173_v8  ;;  %v1023_v60 = vld [vmem:[#allocation2 + $0x138] sm:$0x1]  ;;  %2359 = vmatprep.mubr.bf16.mxu0 %v7796_v55  ;;  %v1288_v17 = vsel %vm7044_vm8, %v1176_v41, %v1287_v16 }
 0x103   : > { %v1177_v51 = vrot.slane %v8955_v50, 5  ;;  %v1182_v28 = vrot.slane %v8956_v49, 4  ;;  %v1024_v20 = vsel %vm7160_vm14, %v955_v30, %v1023_v60  ;;  %v1180_v56 = vrot.slane %v7805_v23, 5  ;;  %v7828_v50 = vld [vmem:[#allocation2 + $0x140] ss:$12 sps:$4 sm:$0xff]  }
 0x104   : > { %v756_v8 = vrot.slane %v754_v18, 7  ;;  %1289 = vst [vmem:[#allocation2 + $0x194] sm:$0xf] %v1288_v17  ;;  %1025 = vst [vmem:[#allocation2 + $0x138] sm:$0x1] %v1024_v20  ;;  %v764_v16 = vrot.slane %v762_v58, 7 }
 0x105   : > { %v1178_v49 = vor.u32 %v1177_v51, %v7811_v53  ;;  %v912_v41 = vld [vmem:[#allocation2 + $0x150] sm:$0xf]  ;;  %v6394_v61 = vld [vmem:[#allocation6 + $0x1d0] ss:$12 sps:$4 sm:$0xff]   ;;  %v772_v30 = vrot.slane %v770_v19, 7  ;;  %v1183_v34 = vor.u32 %v1182_v28, %v1180_v56  ;;  %v780_v17 = vrot.slane %v778_v10, 7 }
 0x106   : > { %v1360_v60 = vld [vmem:[#allocation2 + $0x17c] sm:$0x8]  ;;  %v759_v18 = vor.u32 %v757_v31, %v756_v8  ;;  %v760_v40 = vrot.slane %v756_v8, 4  ;;  %v916_v20 = vld [vmem:[#allocation2 + $0x168] sm:$0xf]  ;;  %v767_v46 = vor.u32 %v7694_v25, %v764_v16  ;;  %6028 = vmatprep.subr.bf16.mxu0 %v6394_v61  ;;  %v8996_v16 = vshrl.u32 %v7753_v52, 16 }
 0x107   : > { %v1361_v39 = vsel %vm7101_vm13, %v7724_v29, %v1360_v60  ;;  %v7842_v58 = vld [vmem:[#allocation2 + $0x120] ss:$12 sps:$4 sm:$0xff]   ;;  %v1179_v51 = vrot.slane %v1178_v49, 4  ;;  %v775_v19 = vor.u32 %v773_v37, %v772_v30  ;;  %v1184_v47 = vrot.slane %v1183_v34, 4  ;;  %6029 = vmatpush3.bf16.msra.mxu0 %v6394_v61  ;;  %v6401_v28 = vld [vmem:[#allocation6 + $0x1b8] ss:$12 sps:$4 sm:$0xff]   ;;  %2575 = vmatmul.mubr.bf16.gmra.mxu1 %v7828_v50 }
 0x108   : > { %1362 = vst [vmem:[#allocation2 + $0x17c] sm:$0x8] %v1361_v39  ;;  %v913_v31 = vsel %vm7089_vm12, %v759_v18, %v912_v41  ;;  %v776_v7 = vrot.slane %v772_v30, 4  ;;  %v783_v10 = vor.u32 %v7724_v29, %v780_v17  ;;  %v768_v25 = vsel %vm7076_vm11, %v760_v40, %v767_v46  ;;  %v920_v34 = vld [vmem:[#allocation2 + $0x180] sm:$0xf]  ;;  %6030 = vmatprep.subr.bf16.mxu0 %v6401_v28 }
 0x109   : > { %v1181_v8 = vsel %vm7031_vm7, %v1179_v51, %v1180_v56  ;;  %914 = vst [vmem:[#allocation2 + $0x150] sm:$0xf] %v913_v31  ;;  %v917_v27 = vsel %vm7089_vm12, %v775_v19, %v916_v20  ;;  %v788_v37 = vrot.slane %v786_v54, 7  ;;  %v1292_v49 = vsel %vm7044_vm8, %v1184_v47, %v1291_v2  ;;  %915 = vst [vmem:[#allocation2 + $0x15c] sm:$0xf] %v768_v25 }
 0x10a   : > { %1290 = vst [vmem:[#allocation2 + $0x1a0] sm:$0xf] %v1181_v8  ;;  %v784_v29 = vsel %vm7076_vm11, %v776_v7, %v783_v10  ;;  %918 = vst [vmem:[#allocation2 + $0x168] sm:$0xf] %v917_v27  ;;  %v924_v56 = vld [vmem:[#allocation2 + $0x198] sm:$0xf]  ;;  %2360 = vmatmul.mubr.bf16.gmra.mxu0 %v7842_v58 }
 0x10b   : > { %1293 = vst [vmem:[#allocation2 + $0x1ac] sm:$0xf] %v1292_v49  ;;  %919 = vst [vmem:[#allocation2 + $0x174] sm:$0xf] %v784_v29  ;;  %v8995_v54 = vshll.u32 %v7751_v44, 16  ;;  %v792_v40 = vrot.slane %v788_v37, 4  ;;  %6031 = vmatpush3.bf16.msra.mxu0 %v6401_v28 }
 0x10c   : > { %v796_v2 = vrot.slane %v8996_v16, 7  ;;  %v8997_v41 = vshrl.u32 %v7790_v57, 16  ;;  %v8998_v30 = vmov 0   ;;  %v1363_v60 = vld [vmem:[#allocation2 + $0x194] sm:$0x8]  ;;  %v8999_v17 = vshrl.u32 %v7792_v45, 16 }
 0x10d   : > { %v791_v46 = vor.u32 %v8995_v54, %v788_v37  ;;  %2584 = vmatprep.mubr.bf16.mxu1 %v8998_v30  ;;  %v7871_v18 = vld [vmem:[#allocation2 + $0x13c] ss:$12 sps:$4 sm:$0xff]   ;;  %v1364_v44 = vsel %vm7101_vm13, %v7761_v4, %v1363_v60  ;;  %v9000_v51 = vshll.u32 %v7790_v57, 16  ;;  %v959_v31 = vrot.slane %v7728_v11, 4  ;;  %v6406_v10 = vld [vmem:[#allocation6 + $0x188] ss:$12 sps:$4 sm:$0xff]  }
 0x10e   : > { %v804_v61 = vrot.slane %v8997_v41, 7  ;;  %v812_v20 = vrot.slane %v8999_v17, 7  ;;  %v799_v39 = vor.u32 %v7761_v4, %v796_v2  ;;  %v6405_v47 = vld [vmem:[#allocation6 + $0x1a0] ss:$12 sps:$4 sm:$0xff]   ;;  %1365 = vst [vmem:[#allocation2 + $0x194] sm:$0x8] %v1364_v44  ;;  %2369 = vmatprep.mubr.bf16.mxu0 %v7871_v18 }
 0x10f   : > { %v921_v52 = vsel %vm7089_vm12, %v791_v46, %v920_v34  ;;  %v7886_v28 = vld [vmem:[#allocation2 + $0x158] ss:$12 sps:$4 sm:$0xff]   ;;  %6032 = vmatprep.subr.bf16.mxu0 %v6405_v47  ;;  %v9001_v27 = vrot.slane %v7669_v63, 4  ;;  %v961_v49 = vrot.slane %v7772_v21, 4  ;;  %v963_v54 = vrot.slane %v7811_v53, 4 }
 0x110   : > { %v807_v19 = vor.u32 %v9000_v51, %v804_v61  ;;  %922 = vst [vmem:[#allocation2 + $0x180] sm:$0xf] %v921_v52  ;;  %v808_v45 = vrot.slane %v804_v61, 4  ;;  %v815_v7 = vor.u32 %v7805_v23, %v812_v20  ;;  %v7888_v4 = vld [vmem:[#allocation2 + $0x138] ss:$12 sps:$4 sm:$0xff]   ;;  %v800_v8 = vsel %vm7076_vm11, %v792_v40, %v799_v39  ;;  %6033 = vmatpush3.bf16.msra.mxu0 %v6405_v47 }
 0x111   : > { %v1026_v11 = vld [vmem:[#allocation2 + $0x150] sm:$0x1]  ;;  %923 = vst [vmem:[#allocation2 + $0x18c] sm:$0xf] %v800_v8  ;;  %v1029_v34 = vld [vmem:[#allocation2 + $0x168] sm:$0x1]  ;;  %6034 = vmatprep.subr.bf16.mxu0 %v6406_v10  ;;  %2585 = vmatmul.mubr.bf16.gmra.mxu1 %v7886_v28 }
 0x112   : > { %v925_v57 = vsel %vm7089_vm12, %v807_v19, %v924_v56  ;;  %v816_v25 = vsel %vm7076_vm11, %v808_v45, %v815_v7  ;;  %v1027_v37 = vsel %vm7160_vm14, %v9001_v27, %v1026_v11  ;;  %v1366_v29 = vld [vmem:[#allocation2 + $0x1ac] sm:$0x8]  ;;  %v1030_v56 = vsel %vm7160_vm14, %v959_v31, %v1029_v34  ;;  %2370 = vmatmul.mubr.bf16.gmra.mxu0 %v7888_v4  ;;  %v7912_v40 = vld [vmem:[#allocation2 + $0x170] ss:$12 sps:$4 sm:$0xff]   ;;  %v7916_v41 = vld [vmem:[#allocation2 + $0x154] ss:$12 sps:$4 sm:$0xff]  }
 0x113   : > { %926 = vst [vmem:[#allocation2 + $0x198] sm:$0xf] %v925_v57  ;;  %927 = vst [vmem:[#allocation2 + $0x1a4] sm:$0xf] %v816_v25  ;;  %v1367_v63 = vsel %vm7101_vm13, %v7805_v23, %v1366_v29  ;;  %2594 = vmatprep.mubr.bf16.mxu1 %v8998_v30  ;;  %v7920_v61 = vld [vmem:[#allocation2 + $0x16c] ss:$12 sps:$4 sm:$0xff]   ;;  %2379 = vmatprep.mubr.bf16.mxu0 %v7916_v41 }
 0x114   : > { %1028 = vst [vmem:[#allocation2 + $0x150] sm:$0x1] %v1027_v37  ;;  %1031 = vst [vmem:[#allocation2 + $0x168] sm:$0x1] %v1030_v56  ;;  %6035 = vmatpush3.bf16.msra.mxu0 %v6406_v10  ;;  %v7931_v17 = vld [vmem:[#allocation2 + $0x184] ss:$12 sps:$4 sm:$0xff]  }
 0x115   : > { %1368 = vst [vmem:[#allocation2 + $0x1ac] sm:$0x8] %v1367_v63  ;;  %v7927_v53 = vld [vmem:[#allocation2 + $0x188] ss:$12 sps:$4 sm:$0xff]   ;;  %v6407_v52 = vld [vmem:[#allocation2 + $0x4] ss:$12 sps:$4 sm:$0xff]  }
 0x116   : > { %v7941_v39 = vld [vmem:[#allocation2 + $0x19c] ss:$12 sps:$4 sm:$0xff]   ;;  %v6411_v31 = vld [vmem:[#allocation2 + $0x18] ss:$12 sps:$4 sm:$0xff]   ;;  %v6412_v45 = vld [vmem:[#allocation2 + $0x34] ss:$12 sps:$4 sm:$0xff]  }
 0x117   : > { %v1032_v21 = vld [vmem:[#allocation2 + $0x180] sm:$0x1]  ;;  %v6409_v19 = vld [vmem:[#allocation2 + $0x1c] ss:$12 sps:$4 sm:$0xff]   ;;  %v6414_v10 = vld [vmem:[#allocation2 + $0x38] ss:$12 sps:$4 sm:$0xff]  }
 0x118   : > { %v1033_v46 = vsel %vm7160_vm14, %v961_v49, %v1032_v21  ;;  %v6410_v47 = vld [vmem:[#allocation2 + $0x8] ss:$12 sps:$4 sm:$0xff]   ;;  %v6413_v7 = vld [vmem:[#allocation2 + $0x20] ss:$12 sps:$4 sm:$0xff]   ;;  %v6415_v8 = vld [vmem:[#allocation2 + $0x30] ss:$12 sps:$4 sm:$0xff]  }
 0x119   : > { %1034 = vst [vmem:[#allocation2 + $0x180] sm:$0x1] %v1033_v46  ;;  %2595 = vmatmul.mubr.bf16.gmra.mxu1 %v7912_v40  ;;  %v6416_v57 = vld [vmem:[#allocation2 + $0x4c] ss:$12 sps:$4 sm:$0xff]   ;;  %v6417_v11 = vld [vmem:[#allocation2 + $0x50] ss:$12 sps:$4 sm:$0xff]  }
 0x11a   : > { %v1035_v16 = vld [vmem:[#allocation2 + $0x198] sm:$0x1]  ;;  %2604 = vmatprep.mubr.bf16.mxu1 %v8998_v30  ;;  %v6418_v25 = vld [vmem:[#allocation2 + $0x68] ss:$12 sps:$4 sm:$0xff]   ;;  %v6420_v37 = vld [vmem:[#allocation2 + $0x64] ss:$12 sps:$4 sm:$0xff]  }
 0x11b   : > { %v1036_v2 = vsel %vm7160_vm14, %v963_v54, %v1035_v16  ;;  %v7918_v23 = vld [vmem:[#allocation2 + $0x150] ss:$12 sps:$4 sm:$0xff]   ;;  %v7929_v60 = vld [vmem:[#allocation2 + $0x168] ss:$12 sps:$4 sm:$0xff]   ;;  %v6421_v34 = vld [vmem:[#allocation2 + $0x80] ss:$12 sps:$4 sm:$0xff]  }
 0x11c   : > { %1037 = vst [vmem:[#allocation2 + $0x198] sm:$0x1] %v1036_v2  ;;  %2380 = vmatmul.mubr.bf16.gmra.mxu0 %v7918_v23  ;;  %v7937_v20 = vld [vmem:[#allocation2 + $0x1a0] ss:$12 sps:$4 sm:$0xff]   ;;  %v6419_v27 = vld [vmem:[#allocation2 + $0x48] ss:$12 sps:$4 sm:$0xff]  }
 0x11d   : > { %2389 = vmatprep.mubr.bf16.mxu0 %v7920_v61  ;;  %v6422_v49 = vld [vmem:[#allocation2 + $0x98] ss:$12 sps:$4 sm:$0xff]   ;;  %v6423_v29 = vld [vmem:[#allocation2 + $0x60] ss:$12 sps:$4 sm:$0xff]   ;;  %v6424_v56 = vld [vmem:[#allocation2 + $0x7c] ss:$12 sps:$4 sm:$0xff]  }
 0x11e   : > { %v6425_v63 = vld [vmem:[#allocation2 + $0x78] ss:$12 sps:$4 sm:$0xff]   ;;  %v6426_v54 = vld [vmem:[#allocation2 + $0x94] ss:$12 sps:$4 sm:$0xff]  }
 0x120   : > { %v7939_v44 = vld [vmem:[#allocation2 + $0x180] ss:$12 sps:$4 sm:$0xff]  }
 0x121   : > { %2605 = vmatmul.mubr.bf16.gmra.mxu1 %v7927_v53 }
 0x122   : > { %2612 = vmatprep.mubr.bf16.mxu1 %v8998_v30  ;;  %v6408_v30 = vld [vmem:[#allocation2] ss:$12 sps:$4 sm:$0xff]  }
 0x123   : > { %v7946_v51 = vld [vmem:[#allocation2 + $0x198] ss:$12 sps:$4 sm:$0xff]  }
 0x124   : > { %2390 = vmatmul.mubr.bf16.gmra.mxu0 %v7929_v60 }
 0x125   : > { %2399 = vmatprep.mubr.bf16.mxu0 %v7931_v17 }
 0x129   : > { %2613 = vmatmul.mubr.bf16.gmra.mxu1 %v7937_v20 }
 0x12a   : > { %2651 = vmatprep.mubr.bf16.mxu1 %v6407_v52 }
 0x12c   : > { %2400 = vmatmul.mubr.bf16.gmra.mxu0 %v7939_v44 }
 0x12d   : > { %2407 = vmatprep.mubr.bf16.mxu0 %v7941_v39 }
 0x131   : > { %2652 = vmatmul.mubr.bf16.vlgmr.msra.gmra.mxu1 %v6408_v30 }
 0x132   : > { %2657 = vmatprep.mubr.bf16.mxu1 %v6409_v19 }
 0x134   : > { %2408 = vmatmul.mubr.bf16.gmra.mxu0 %v7946_v51 }
 0x135   : > { %6036 = vmatprep.mubr.bf16.mxu0 %v6410_v47 }
 0x139   : > { %2658 = vmatmul.mubr.bf16.gmra.mxu1 %v6411_v31 }
 0x13a   : > { %2663 = vmatprep.mubr.bf16.mxu1 %v6412_v45 }
 0x13c   : > { %6037 = vmatmul.mubr.bf16.vlgmr.msra.gmra.mxu0 %v6413_v7 }
 0x13d   : > { %6040 = vmatprep.mubr.bf16.mxu0 %v6414_v10 }
 0x141   : > { %2664 = vmatmul.mubr.bf16.gmra.mxu1 %v6415_v8 }
 0x142   : > { %2671 = vmatprep.mubr.bf16.mxu1 %v6416_v57 }
 0x144   : > { %6041 = vmatmul.mubr.bf16.gmra.mxu0 %v6417_v11 }
 0x145   : > { %6044 = vmatprep.mubr.bf16.mxu0 %v6418_v25 }
 0x149   : > { %2672 = vmatmul.mubr.bf16.gmra.mxu1 %v6419_v27 }
 0x14a   : > { %2679 = vmatprep.mubr.bf16.mxu1 %v6420_v37 }
 0x14c   : > { %6045 = vmatmul.mubr.bf16.gmra.mxu0 %v6421_v34 }
 0x14d   : > { %6048 = vmatprep.mubr.bf16.mxu0 %v6422_v49 }
 0x151   : > { %2680 = vmatmul.mubr.bf16.gmra.mxu1 %v6423_v29 }
 0x152   : > { %2687 = vmatprep.mubr.bf16.mxu1 %v6424_v56 }
 0x154   : > { %6049 = vmatmul.mubr.bf16.gmra.mxu0 %v7494_v38 }
 0x155   : > { %6052 = vmatprep.mubr.bf16.mxu0 %v7545_v62 }
 0x159   : > { %2688 = vmatmul.mubr.bf16.gmra.mxu1 %v6425_v63  ;;  %v2448_v21 = vpop.f32.mrf.mxu1 }
 0x15a   : > { %2695 = vmatprep.mubr.bf16.mxu1 %v6426_v54 }
 0x15b   : > { %v2450_v46 = vpop.f32.mrf.mxu1 }
 0x15c   : > { %6053 = vmatmul.mubr.bf16.gmra.mxu0 %v7617_v14 }
 0x15d   : > { %6056 = vmatprep.mubr.bf16.mxu0 %v7657_v26  ;;  %v2451_v38 = vpop.f32.mrf.mxu1 }
 0x15f   : > { %v2453_v62 = vpop.f32.mrf.mxu1 }
 0x161   : > { %2696 = vmatmul.mubr.bf16.gmra.mxu1 %v7496_v24  ;;  %v2456_v16 = vpop.f32.mrf.mxu1 }
 0x162   : > { %2703 = vmatprep.mubr.bf16.mxu1 %v7536_v43  ;;  %v2243_v2 = vpop.f32.mrf.mxu0 }
 0x163   : > { %v2449_v14 = vadd.f32 %v2448_v21, %v2243_v2  ;;  %v2458_v26 = vpop.f32.mrf.mxu1 }
 0x164   : > { %6057 = vmatmul.mubr.bf16.gmra.mxu0 %v7721_v42  ;;  %v2245_v24 = vpop.f32.mrf.mxu0 }
 0x165   : > { %6060 = vmatprep.mubr.bf16.mxu0 %v7779_v36  ;;  %v2460_v43 = vpop.f32.mrf.mxu1 }
 0x166   : > { %v2246_v42 = vpop.f32.mrf.mxu0 }
 0x167   : > { %v2452_v52 = vadd.f32 %v2451_v38, %v2246_v42  ;;  %v2462_v30 = vpop.f32.mrf.mxu1 }
 0x168   : > { %v2248_v36 = vpop.f32.mrf.mxu0 }
 0x169   : > { %2704 = vmatmul.mubr.bf16.gmra.mxu1 %v7565_v33  ;;  %v2466_v19 = vpop.f32.mrf.mxu1 }
 0x16a   : > { %2711 = vmatprep.mubr.bf16.mxu1 %v7606_v59  ;;  %v2251_v47 = vpop.f32.mrf.mxu0 }
 0x16b   : > { %v2457_v33 = vadd.f32 %v2456_v16, %v2251_v47  ;;  %v2468_v59 = vpop.f32.mrf.mxu1 }
 0x16c   : > { %6061 = vmatmul.mubr.bf16.gmra.mxu0 %v7828_v50  ;;  %v2253_v50 = vpop.f32.mrf.mxu0 }
 0x16d   : > { %6064 = vmatprep.mubr.bf16.mxu0 %v7886_v28  ;;  %v2459_v31 = vadd.f32 %v2458_v26, %v2253_v50  ;;  %v2470_v28 = vpop.f32.mrf.mxu1 }
 0x16e   : > { %v2255_v45 = vpop.f32.mrf.mxu0 }
 0x16f   : > { %v7965_v7 = vadd.f32 %v2459_v31, %v2449_v14  ;;  %v2461_v10 = vadd.f32 %v2460_v43, %v2255_v45  ;;  %v2472_v8 = vpop.f32.mrf.mxu1 }
 0x170   : > { %v2257_v57 = vpop.f32.mrf.mxu0 }
 0x171   : > { %2712 = vmatmul.mubr.bf16.gmra.mxu1 %v7623_v6  ;;  %v2463_v11 = vadd.f32 %v2462_v30, %v2257_v57  ;;  %v2476_v6 = vpop.f32.mrf.mxu1 }
 0x172   : > { %2719 = vmatprep.mubr.bf16.mxu1 %v7625_v35  ;;  %v2261_v35 = vpop.f32.mrf.mxu0 }
 0x173   : > { %v2467_v25 = vadd.f32 %v2466_v19, %v2261_v35 }
 0x174   : > { %6065 = vmatmul.mubr.bf16.gmra.mxu0 %v7912_v40  ;;  %v7969_v40 = vadd.f32 %v2463_v11, %v2452_v52  ;;  %v2263_v27 = vpop.f32.mrf.mxu0 }
 0x175   : > { %6068 = vmatprep.mubr.bf16.mxu0 %v7927_v53  ;;  %v2478_v53 = vpop.f32.mrf.mxu1  ;;  %v2469_v37 = vadd.f32 %v2468_v59, %v2263_v27 }
 0x176   : > { %v2265_v49 = vpop.f32.mrf.mxu0 }
 0x177   : > { %v2480_v34 = vpop.f32.mrf.mxu1  ;;  %v7972_v29 = vadd.f32 %v2469_v37, %v2457_v33  ;;  %v2471_v56 = vadd.f32 %v2470_v28, %v2265_v49 }
 0x178   : > { %v2267_v54 = vpop.f32.mrf.mxu0 }
 0x179   : > { %2720 = vmatmul.mubr.bf16.gmra.mxu1 %v7678_v22  ;;  %v2482_v63 = vpop.f32.mrf.mxu1  ;;  %v2473_v21 = vadd.f32 %v2472_v8, %v2267_v54 }
 0x17a   : > { %2727 = vmatprep.mubr.bf16.mxu1 %v7712_v3  ;;  %v2271_v3 = vpop.f32.mrf.mxu0 }
 0x17b   : > { %v2486_v22 = vpop.f32.mrf.mxu1  ;;  %v7976_v46 = vadd.f32 %v2473_v21, %v2461_v10 }
 0x17c   : > { %6069 = vmatmul.mubr.bf16.gmra.mxu0 %v7937_v20  ;;  %v2477_v20 = vadd.f32 %v2476_v6, %v2271_v3  ;;  %v2273_v62 = vpop.f32.mrf.mxu0 }
 0x17d   : > { %v2488_v38 = vpop.f32.mrf.mxu1  ;;  %v2479_v16 = vadd.f32 %v2478_v53, %v2273_v62 }
 0x17e   : > { %v2275_v14 = vpop.f32.mrf.mxu0 }
 0x17f   : > { %v2490_v2 = vpop.f32.mrf.mxu1  ;;  %v7978_v26 = vadd.f32 %v2479_v16, %v2467_v25  ;;  %v2481_v24 = vadd.f32 %v2480_v34, %v2275_v14 }
 0x180   : > { %v2277_v42 = vpop.f32.mrf.mxu0 }
 0x181   : > { %2728 = vmatmul.mubr.bf16.gmra.mxu1 %v7736_v32  ;;  %v2492_v43 = vpop.f32.mrf.mxu1  ;;  %v2483_v52 = vadd.f32 %v2482_v63, %v2277_v42 }
 0x182   : > { %2735 = vmatprep.mubr.bf16.mxu1 %v7776_v9  ;;  %v2281_v32 = vpop.f32.mrf.mxu0 }
 0x183   : > { %v2496_v30 = vpop.f32.mrf.mxu1  ;;  %v7982_v9 = vadd.f32 %v2483_v52, %v2471_v56  ;;  %v2487_v36 = vadd.f32 %v2486_v22, %v2281_v32 }
 0x184   : > { %v2283_v47 = vpop.f32.mrf.mxu0 }
 0x185   : > { %v2498_v19 = vpop.f32.mrf.mxu1  ;;  %v2489_v33 = vadd.f32 %v2488_v38, %v2283_v47 }
 0x186   : > { %v2285_v50 = vpop.f32.mrf.mxu0 }
 0x187   : > { %v2500_v59 = vpop.f32.mrf.mxu1  ;;  %v7984_v31 = vadd.f32 %v2489_v33, %v2477_v20  ;;  %v2491_v28 = vadd.f32 %v2490_v2, %v2285_v50 }
 0x188   : > { %v2287_v10 = vpop.f32.mrf.mxu0 }
 0x189   : > { %2736 = vmatmul.mubr.bf16.gmra.mxu1 %v7788_v15  ;;  %v2502_v45 = vpop.f32.mrf.mxu1  ;;  %v2493_v8 = vadd.f32 %v2492_v43, %v2287_v10 }
 0x18a   : > { %2743 = vmatprep.mubr.bf16.mxu1 %v7796_v55 }
 0x18b   : > { %v2506_v57 = vpop.f32.mrf.mxu1  ;;  %v2291_v15 = vpop.f32.mrf.mxu0  ;;  %v7988_v55 = vadd.f32 %v2493_v8, %v2481_v24 }
 0x18c   : > { %v2497_v11 = vadd.f32 %v2496_v30, %v2291_v15 }
 0x18d   : > { %v2508_v6 = vpop.f32.mrf.mxu1  ;;  %v2293_v35 = vpop.f32.mrf.mxu0 }
 0x18e   : > { %v2499_v25 = vadd.f32 %v2498_v19, %v2293_v35 }
 0x18f   : > { %v2510_v53 = vpop.f32.mrf.mxu1  ;;  %v2295_v27 = vpop.f32.mrf.mxu0 }
 0x190   : > { %v7990_v37 = vadd.f32 %v2499_v25, %v2487_v36  ;;  %v2501_v34 = vadd.f32 %v2500_v59, %v2295_v27 }
 0x191   : > { %2744 = vmatmul.mubr.bf16.gmra.mxu1 %v7842_v58  ;;  %v2512_v49 = vpop.f32.mrf.mxu1  ;;  %v2297_v56 = vpop.f32.mrf.mxu0 }
 0x192   : > { %2751 = vmatprep.mubr.bf16.mxu1 %v7871_v18  ;;  %v2503_v63 = vadd.f32 %v2502_v45, %v2297_v56 }
 0x193   : > { %v2516_v54 = vpop.f32.mrf.mxu1  ;;  %v2301_v58 = vpop.f32.mrf.mxu0 }
 0x194   : > { %v7994_v18 = vadd.f32 %v2503_v63, %v2491_v28  ;;  %v2507_v21 = vadd.f32 %v2506_v57, %v2301_v58 }
 0x195   : > { %v2518_v22 = vpop.f32.mrf.mxu1  ;;  %v2303_v3 = vpop.f32.mrf.mxu0 }
 0x196   : > { %v2509_v20 = vadd.f32 %v2508_v6, %v2303_v3 }
 0x197   : > { %v2520_v38 = vpop.f32.mrf.mxu1  ;;  %v2305_v62 = vpop.f32.mrf.mxu0 }
 0x198   : > { %v7996_v16 = vadd.f32 %v2509_v20, %v2497_v11  ;;  %v2511_v2 = vadd.f32 %v2510_v53, %v2305_v62 }
 0x199   : > { %2752 = vmatmul.mubr.bf16.gmra.mxu1 %v7888_v4  ;;  %v2522_v14 = vpop.f32.mrf.mxu1  ;;  %v2307_v24 = vpop.f32.mrf.mxu0 }
 0x19a   : > { %2759 = vmatprep.mubr.bf16.mxu1 %v7916_v41  ;;  %v2513_v43 = vadd.f32 %v2512_v49, %v2307_v24 }
 0x19b   : > { %v2526_v42 = vpop.f32.mrf.mxu1 }
 0x19c   : > { %v2311_v4 = vpop.f32.mrf.mxu0  ;;  %v8000_v41 = vadd.f32 %v2513_v43, %v2501_v34 }
 0x19d   : > { %v2517_v52 = vadd.f32 %v2516_v54, %v2311_v4  ;;  %v2528_v30 = vpop.f32.mrf.mxu1 }
 0x19e   : > { %v2313_v32 = vpop.f32.mrf.mxu0 }
 0x19f   : > { %v2519_v36 = vadd.f32 %v2518_v22, %v2313_v32  ;;  %v2530_v19 = vpop.f32.mrf.mxu1 }
 0x1a0   : > { %v2315_v47 = vpop.f32.mrf.mxu0 }
 0x1a1   : > { %2760 = vmatmul.mubr.bf16.gmra.mxu1 %v7918_v23  ;;  %v8002_v33 = vadd.f32 %v2519_v36, %v2507_v21  ;;  %v2521_v59 = vadd.f32 %v2520_v38, %v2315_v47  ;;  %v2532_v50 = vpop.f32.mrf.mxu1 }
 0x1a2   : > { %2767 = vmatprep.mubr.bf16.mxu1 %v7920_v61  ;;  %v2317_v28 = vpop.f32.mrf.mxu0 }
 0x1a3   : > { %v2523_v45 = vadd.f32 %v2522_v14, %v2317_v28 }
 0x1a4   : > { %v2536_v10 = vpop.f32.mrf.mxu1 }
 0x1a5   : > { %v2321_v23 = vpop.f32.mrf.mxu0  ;;  %v8006_v61 = vadd.f32 %v2523_v45, %v2511_v2 }
 0x1a6   : > { %v2527_v8 = vadd.f32 %v2526_v42, %v2321_v23  ;;  %v2538_v57 = vpop.f32.mrf.mxu1 }
 0x1a7   : > { %v2323_v15 = vpop.f32.mrf.mxu0 }
 0x1a8   : > { %v2529_v11 = vadd.f32 %v2528_v30, %v2323_v15  ;;  %v2540_v6 = vpop.f32.mrf.mxu1 }
 0x1a9   : > { %2768 = vmatmul.mubr.bf16.gmra.mxu1 %v7929_v60  ;;  %v2325_v35 = vpop.f32.mrf.mxu0 }
 0x1aa   : > { %2775 = vmatprep.mubr.bf16.mxu1 %v7931_v17  ;;  %v8008_v25 = vadd.f32 %v2529_v11, %v2517_v52  ;;  %v2531_v53 = vadd.f32 %v2530_v19, %v2325_v35  ;;  %v2542_v27 = vpop.f32.mrf.mxu1 }
 0x1ab   : > { %v2327_v34 = vpop.f32.mrf.mxu0 }
 0x1ac   : > { %v2533_v49 = vadd.f32 %v2532_v50, %v2327_v34  ;;  %v2546_v56 = vpop.f32.mrf.mxu1 }
 0x1ae   : > { %v2331_v60 = vpop.f32.mrf.mxu0  ;;  %v8012_v17 = vadd.f32 %v2533_v49, %v2521_v59  ;;  %v2548_v54 = vpop.f32.mrf.mxu1 }
 0x1af   : > { %v2537_v63 = vadd.f32 %v2536_v10, %v2331_v60 }
 0x1b0   : > { %v2333_v58 = vpop.f32.mrf.mxu0  ;;  %v2550_v22 = vpop.f32.mrf.mxu1 }
 0x1b1   : > { %2776 = vmatmul.mubr.bf16.gmra.mxu1 %v7939_v44  ;;  %v2539_v21 = vadd.f32 %v2538_v57, %v2333_v58 }
 0x1b2   : > { %2783 = vmatprep.mubr.bf16.mxu1 %v7941_v39  ;;  %v2335_v3 = vpop.f32.mrf.mxu0  ;;  %v2552_v62 = vpop.f32.mrf.mxu1 }
 0x1b3   : > { %v8014_v20 = vadd.f32 %v2539_v21, %v2527_v8  ;;  %v2541_v38 = vadd.f32 %v2540_v6, %v2335_v3 }
 0x1b4   : > { %v2337_v2 = vpop.f32.mrf.mxu0 }
 0x1b5   : > { %v2543_v14 = vadd.f32 %v2542_v27, %v2337_v2 }
 0x1b6   : > { %v2556_v24 = vpop.f32.mrf.mxu1 }
 0x1b7   : > { %v8017_v43 = vadd.f32 %v2543_v14, %v2531_v53 }
 0x1b8   : > { %v2341_v44 = vpop.f32.mrf.mxu0  ;;  %v2558_v42 = vpop.f32.mrf.mxu1 }
 0x1b9   : > { %2784 = vmatmul.mubr.bf16.gmra.mxu1 %v7946_v51  ;;  %v2547_v39 = vadd.f32 %v2546_v56, %v2341_v44 }
 0x1ba   : > { %v2343_v4 = vpop.f32.mrf.mxu0  ;;  %v2560_v30 = vpop.f32.mrf.mxu1 }
 0x1bb   : > { %v2549_v52 = vadd.f32 %v2548_v54, %v2343_v4 }
 0x1bc   : > { %v2345_v32 = vpop.f32.mrf.mxu0  ;;  %v2562_v47 = vpop.f32.mrf.mxu1 }
 0x1bd   : > { %v8019_v36 = vadd.f32 %v2549_v52, %v2537_v63  ;;  %v2551_v19 = vadd.f32 %v2550_v22, %v2345_v32 }
 0x1be   : > { %v2347_v59 = vpop.f32.mrf.mxu0 }
 0x1bf   : > { %v2553_v50 = vadd.f32 %v2552_v62, %v2347_v59  ;;  %v2566_v28 = vpop.f32.mrf.mxu1 }
 0x1c0   : > { %v2351_v45 = vpop.f32.mrf.mxu0 }
 0x1c1   : > { %v8021_v10 = vadd.f32 %v2553_v50, %v2541_v38  ;;  %v2557_v51 = vadd.f32 %v2556_v24, %v2351_v45  ;;  %v2568_v23 = vpop.f32.mrf.mxu1 }
 0x1c2   : > { %v2353_v8 = vpop.f32.mrf.mxu0 }
 0x1c3   : > { %v2559_v57 = vadd.f32 %v2558_v42, %v2353_v8  ;;  %v2570_v15 = vpop.f32.mrf.mxu1 }
 0x1c4   : > { %v2355_v11 = vpop.f32.mrf.mxu0 }
 0x1c5   : > { %v8023_v6 = vadd.f32 %v2559_v57, %v2547_v39  ;;  %v2561_v35 = vadd.f32 %v2560_v30, %v2355_v11  ;;  %v2572_v53 = vpop.f32.mrf.mxu1 }
 0x1c6   : > { %v2357_v27 = vpop.f32.mrf.mxu0 }
 0x1c7   : > { %v2563_v34 = vadd.f32 %v2562_v47, %v2357_v27  ;;  %v2576_v49 = vpop.f32.mrf.mxu1 }
 0x1c9   : > { %v8025_v60 = vadd.f32 %v2563_v34, %v2551_v19  ;;  %v2578_v54 = vpop.f32.mrf.mxu1 }
 0x1ca   : > { %v2361_v56 = vpop.f32.mrf.mxu0 }
 0x1cb   : > { %v2567_v63 = vadd.f32 %v2566_v28, %v2361_v56  ;;  %v2580_v22 = vpop.f32.mrf.mxu1 }
 0x1cc   : > { %v2363_v58 = vpop.f32.mrf.mxu0 }
 0x1cd   : > { %v2569_v21 = vadd.f32 %v2568_v23, %v2363_v58  ;;  %v2582_v2 = vpop.f32.mrf.mxu1 }
 0x1ce   : > { %v2365_v3 = vpop.f32.mrf.mxu0 }
 0x1cf   : > { %v8027_v38 = vadd.f32 %v2569_v21, %v2557_v51  ;;  %v2571_v62 = vadd.f32 %v2570_v15, %v2365_v3 }
 0x1d0   : > { %v2367_v14 = vpop.f32.mrf.mxu0 }
 0x1d1   : > { %9002 = vst [vmem:[#allocation19_spill] sm:$0xff] %v8027_v38  ;;  %v2573_v24 = vadd.f32 %v2572_v53, %v2367_v14  ;;  %v2586_v44 = vpop.f32.mrf.mxu1 }
 0x1d2   : > { %v2371_v39 = vpop.f32.mrf.mxu0 }
 0x1d3   : > { %v8029_v42 = vadd.f32 %v2573_v24, %v2561_v35  ;;  %v2577_v4 = vadd.f32 %v2576_v49, %v2371_v39  ;;  %v2588_v52 = vpop.f32.mrf.mxu1 }
 0x1d4   : > { %v2373_v30 = vpop.f32.mrf.mxu0 }
 0x1d5   : > { %9003 = vst [vmem:[#allocation20_spill] sm:$0xff] %v8029_v42  ;;  %v2579_v32 = vadd.f32 %v2578_v54, %v2373_v30  ;;  %v2590_v19 = vpop.f32.mrf.mxu1 }
 0x1d6   : > { %v2375_v47 = vpop.f32.mrf.mxu0 }
 0x1d7   : > { %v8031_v59 = vadd.f32 %v2579_v32, %v2567_v63  ;;  %v2581_v50 = vadd.f32 %v2580_v22, %v2375_v47  ;;  %v2592_v28 = vpop.f32.mrf.mxu1 }
 0x1d8   : > { %v2377_v45 = vpop.f32.mrf.mxu0 }
 0x1d9   : > { %9004 = vst [vmem:[#allocation21_spill] sm:$0xff] %v8031_v59  ;;  %v2583_v51 = vadd.f32 %v2582_v2, %v2377_v45  ;;  %v2596_v23 = vpop.f32.mrf.mxu1 }
 0x1db   : > { %v8033_v8 = vadd.f32 %v2583_v51, %v2571_v62  ;;  %v2598_v15 = vpop.f32.mrf.mxu1 }
 0x1dc   : > { %v2381_v57 = vpop.f32.mrf.mxu0 }
 0x1dd   : > { %9005 = vst [vmem:[#allocation22_spill] sm:$0xff] %v8033_v8  ;;  %v2587_v11 = vadd.f32 %v2586_v44, %v2381_v57  ;;  %v2600_v53 = vpop.f32.mrf.mxu1  ;;  %v3985_v8 = vld [vmem:[#allocation2 + $0x14] sm:$0xf] }
 0x1de   : > { %v2383_v35 = vpop.f32.mrf.mxu0 }
 0x1df   : > { %v2589_v27 = vadd.f32 %v2588_v52, %v2383_v35  ;;  %v2602_v49 = vpop.f32.mrf.mxu1 }
 0x1e0   : > { %v2385_v34 = vpop.f32.mrf.mxu0 }
 0x1e1   : > { %v8035_v56 = vadd.f32 %v2589_v27, %v2577_v4  ;;  %v2591_v54 = vadd.f32 %v2590_v19, %v2385_v34  ;;  %v2606_v58 = vpop.f32.mrf.mxu1 }
 0x1e2   : > { %v2387_v63 = vpop.f32.mrf.mxu0 }
 0x1e3   : > { %9006 = vst [vmem:[#allocation23_spill] sm:$0xff] %v8035_v56  ;;  %v2593_v21 = vadd.f32 %v2592_v28, %v2387_v63  ;;  %v2607_v3 = vpop.f32.mrf.mxu1 }
 0x1e4   : > { %v2391_v22 = vpop.f32.mrf.mxu0 }
 0x1e5   : > { %v8037_v2 = vadd.f32 %v2593_v21, %v2581_v50  ;;  %v2597_v62 = vadd.f32 %v2596_v23, %v2391_v22  ;;  %v2609_v24 = vpop.f32.mrf.mxu1 }
 0x1e6   : > { %v2393_v14 = vpop.f32.mrf.mxu0 }
 0x1e7   : > { %9007 = vst [vmem:[#allocation24_spill] sm:$0xff] %v8037_v2  ;;  %v2599_v39 = vadd.f32 %v2598_v15, %v2393_v14  ;;  %v2610_v30 = vpop.f32.mrf.mxu1 }
 0x1e8   : > { %v2395_v44 = vpop.f32.mrf.mxu0 }
 0x1e9   : > { %v8039_v32 = vadd.f32 %v2599_v39, %v2587_v11  ;;  %v2601_v52 = vadd.f32 %v2600_v53, %v2395_v44  ;;  %v2614_v4 = vpop.f32.mrf.mxu1 }
 0x1ea   : > { %v2397_v47 = vpop.f32.mrf.mxu0 }
 0x1eb   : > { %9008 = vst [vmem:[#allocation25_spill] sm:$0xff] %v8039_v32  ;;  %v2603_v45 = vadd.f32 %v2602_v49, %v2397_v47  ;;  %v2615_v51 = vpop.f32.mrf.mxu1 }
 0x1ec   : > { %v2401_v19 = vpop.f32.mrf.mxu0 }
 0x1ed   : > { %v8041_v57 = vadd.f32 %v2603_v45, %v2591_v54  ;;  %v2616_v35 = vpop.f32.mrf.mxu1 }
 0x1ee   : > { %v2402_v28 = vpop.f32.mrf.mxu0 }
 0x1ef   : > { %9009 = vst [vmem:[#allocation26_spill] sm:$0xff] %v8041_v57  ;;  %v2608_v50 = vadd.f32 %v2607_v3, %v2402_v28  ;;  %v2617_v23 = vpop.f32.mrf.mxu1 }
 0x1f0   : > { %v2404_v27 = vpop.f32.mrf.mxu0 }
 0x1f1   : > { %v8043_v34 = vadd.f32 %v2608_v50, %v2597_v62  ;;  %v2653_v63 = vpop.f32.mrf.mxu1 }
 0x1f2   : > { %v2405_v15 = vpop.f32.mrf.mxu0  ;;  %v8051_v63 = vld [vmem:[%s8941_s2] ss:$0 sm:$0xff] }
 0x1f3   : > { %9010 = vst [vmem:[#allocation27_spill] sm:$0xff] %v8043_v34  ;;  %v2611_v58 = vadd.f32 %v2610_v30, %v2405_v15  ;;  %v2654_v21 = vpop.f32.mrf.mxu1 }
 0x1f4   : > { %v2409_v11 = vpop.f32.mrf.mxu0 }
 0x1f5   : > { %v8045_v53 = vadd.f32 %v2611_v58, %v2601_v52  ;;  %v2655_v49 = vpop.f32.mrf.mxu1 }
 0x1f6   : > { %v2410_v22 = vpop.f32.mrf.mxu0 }
 0x1f7   : > { %9011 = vst [vmem:[#allocation28_spill] sm:$0xff] %v8045_v53  ;;  %v2656_v24 = vpop.f32.mrf.mxu1 }
 0x1f8   : > { %v2411_v14 = vpop.f32.mrf.mxu0 }
 0x1f9   : > { %v2659_v39 = vpop.f32.mrf.mxu1 }
 0x1fa   : > { %v2412_v54 = vpop.f32.mrf.mxu0 }
 0x1fb   : > { %v2660_v47 = vpop.f32.mrf.mxu1 }
 0x1fc   : > { %v6038_v44 = vpop.f32.mrf.mxu0 }
 0x1fd   : > { %v2661_v4 = vpop.f32.mrf.mxu1 }
 0x1fe   : > { %v2826_v3 = vpop.f32.mrf.mxu0 }
 0x1ff   : > { %v2662_v62 = vpop.f32.mrf.mxu1 }
 0x200   : > { %v6039_v45 = vpop.f32.mrf.mxu0 }
 0x201   : > { %v2665_v51 = vpop.f32.mrf.mxu1 }
 0x202   : > { %v2828_v19 = vpop.f32.mrf.mxu0 }
 0x203   : > { %v2667_v30 = vpop.f32.mrf.mxu1 }
 0x204   : > { %v6042_v28 = vpop.f32.mrf.mxu0 }
 0x205   : > { %v2668_v50 = vpop.f32.mrf.mxu1 }
 0x206   : > { %v2838_v35 = vpop.f32.mrf.mxu0 }
 0x207   : > { %v2839_v52 = vadd.f32 %v2838_v35, %v2665_v51  ;;  %v2670_v23 = vpop.f32.mrf.mxu1 }
 0x208   : > { %v6043_v27 = vpop.f32.mrf.mxu0 }
 0x209   : > { %v2997_v15 = vadd.f32 %v7965_v7, %v2839_v52  ;;  %v2673_v11 = vpop.f32.mrf.mxu1 }
 0x20a   : > { %v2841_v58 = vpop.f32.mrf.mxu0  ;;  %v2847_v49 = vadd.f32 %v6042_v28, %v2673_v11 }
 0x20b   : > { %v3036_v21 = vadd.f32 %v8051_v63, %v2997_v15  ;;  %v2842_v22 = vadd.f32 %v2841_v58, %v2668_v50  ;;  %v2675_v24 = vpop.f32.mrf.mxu1 }
 0x20c   : > { %v6046_v14 = vpop.f32.mrf.mxu0  ;;  %v2999_v44 = vadd.f32 %v7972_v29, %v2847_v49 }
 0x20d   : > { %v3068_v54 = vmax.f32 %v3036_v21, 0.0  ;;  %v2998_v39 = vadd.f32 %v7969_v40, %v2842_v22  ;;  %v2676_v7 = vpop.f32.mrf.mxu1 }
 0x20e   : > { %v2854_v47 = vpop.f32.mrf.mxu0  ;;  %v3038_v45 = vadd.f32 %v8051_v63, %v2999_v44  ;;  %v2850_v62 = vadd.f32 %v6043_v27, %v2676_v7 }
 0x20f   : > { %v5865_v3 = vpack.c.bf16 %v3068_v54, %v3068_v54  ;;  %v3037_v4 = vadd.f32 %v8051_v63, %v2998_v39  ;;  %v2678_v19 = vpop.f32.mrf.mxu1 }
 0x210   : > { %v8058_v30 = vpop.f32.mrf.mxu0  ;;  %v3070_v28 = vmax.f32 %v3038_v45, 0.0  ;;  %v3000_v35 = vadd.f32 %v7976_v46, %v2850_v62  ;;  %v3628_v19 = vld [vmem:[#allocation2 + $0x18] sm:$0xf] }
 0x211   : > { %3228 = vst [vmem:[#allocation2 + $0x1c] sm:$0xf] %v5865_v3  ;;  %v3069_v51 = vmax.f32 %v3037_v4, 0.0  ;;  %v2681_v50 = vpop.f32.mrf.mxu1 }
 0x212   : > { %v5867_v52 = vpack.c.bf16 %v3070_v28, %v3070_v28  ;;  %v3039_v29 = vadd.f32 %v8051_v63, %v3000_v35  ;;  %v2855_v23 = vadd.f32 %v2854_v47, %v2681_v50  ;;  %v2857_v58 = vpop.f32.mrf.mxu0 }
 0x213   : > { %v5866_v40 = vpack.c.bf16 %v3069_v51, %v3069_v51  ;;  %v2683_v15 = vpop.f32.mrf.mxu1 }
 0x214   : > { %3230 = vst [vmem:[#allocation2 + $0x34] sm:$0xf] %v5867_v52  ;;  %3260 = vst [vmem:[#allocation2 + $0x4] sm:$0xf] %v5867_v52  ;;  %v3071_v27 = vmax.f32 %v3039_v29, 0.0  ;;  %v3001_v11 = vadd.f32 %v7978_v26, %v2855_v23  ;;  %v8069_v62 = vpop.f32.mrf.mxu0 }
 0x215   : > { %3229 = vst [vmem:[#allocation2 + $0x28] sm:$0xf] %v5866_v40  ;;  %v2684_v21 = vpop.f32.mrf.mxu1 }
 0x216   : > { %v5868_v49 = vpack.c.bf16 %v3071_v27, %v3071_v27  ;;  %v3040_v24 = vadd.f32 %v8051_v63, %v3001_v11  ;;  %v2858_v46 = vadd.f32 %v2857_v58, %v2684_v21 }
 0x217   : > { %v2686_v54 = vpop.f32.mrf.mxu1 }
 0x218   : > { %v3266_v22 = vld [vmem:[#allocation2 + $0x1c] sm:$0xf]  ;;  %3231 = vst [vmem:[#allocation2 + $0x40] sm:$0xf] %v5868_v49  ;;  %3261 = vst [vmem:[#allocation2 + $0x10] sm:$0xf] %v5868_v49  ;;  %v3002_v7 = vadd.f32 %v7982_v9, %v2858_v46 }
 0x219   : > { %v3317_v39 = vshrl.u32 %v3266_v22, 16  ;;  %v3320_v44 = vshll.u32 %v3266_v22, 16  ;;  %v3072_v47 = vmax.f32 %v3040_v24, 0.0  ;;  %v2689_v26 = vpop.f32.mrf.mxu1 }
 0x21a   : > { %v2863_v28 = vadd.f32 %v6046_v14, %v2689_v26  ;;  %v8074_v50 = vadd.f32 %v8051_v63, %v3002_v7  ;;  %v3624_v7 = vld [vmem:[#allocation2] sm:$0xf]  ;;  %v3632_v26 = vld [vmem:[#allocation2 + $0x30] sm:$0xf] }
 0x21b   : > { %v8065_v3 = vrot.slane %v3317_v39, 7  ;;  %v8067_v4 = vrot.slane %v3317_v39, 4  ;;  %v3812_v45 = vrot.slane %v3320_v44, 5  ;;  %v5869_v35 = vpack.c.bf16 %v3072_v47, %v3072_v47  ;;  %v3264_v40 = vld [vmem:[#allocation2 + $0x4] sm:$0xf]  ;;  %v2691_v58 = vpop.f32.mrf.mxu1  ;;  %v8088_v39 = vpop.f32.mrf.mxu0 }
 0x21c   : > { %v8071_v51 = vld [vmem:[#allocation2 + $0x28] sm:$0xf]  ;;  %v3268_v52 = vld [vmem:[#allocation2 + $0x34] sm:$0xf]  ;;  %v3301_v27 = vshrl.u32 %v3264_v40, 16  ;;  %v3304_v11 = vshll.u32 %v3264_v40, 16 }
 0x21d   : > { %v3322_v9 = vor.u32 %v3320_v44, %v8065_v3  ;;  %v3699_v23 = vrot.slane %v8067_v4, 4  ;;  %v3813_v15 = vor.u32 %v3812_v45, %v8067_v4  ;;  %v3333_v21 = vshrl.u32 %v3268_v52, 16  ;;  %3232 = vst [vmem:[#allocation2 + $0x4c] sm:$0xf] %v5869_v35  ;;  %v2692_v54 = vpop.f32.mrf.mxu1 }
 0x21e   : > { %v3336_v22 = vshll.u32 %v3268_v52, 16  ;;  %v8086_v46 = vshll.u32 %v8071_v51, 16  ;;  %v3303_v44 = vrot.slane %v3301_v27, 7  ;;  %v8092_v4 = vrot.slane %v3301_v27, 4 }
 0x21f   : > { %v3629_v14 = vsel %vm7089_vm12, %v3322_v9, %v3628_v19  ;;  %v8082_v49 = vrot.slane %v3813_v15, 4  ;;  %v8090_v47 = vrot.slane %v3333_v21, 7  ;;  %v8094_v45 = vrot.slane %v3333_v21, 4  ;;  %v3265_v40 = vld [vmem:[#allocation2 + $0x10] sm:$0xf]  ;;  %v2694_v9 = vpop.f32.mrf.mxu1 }
 0x220   : > { %3630 = vst [vmem:[#allocation2 + $0x18] sm:$0xf] %v3629_v14  ;;  %v3804_v19 = vrot.slane %v3304_v11, 5  ;;  %v3820_v35 = vrot.slane %v3336_v22, 5  ;;  %v3003_v52 = vadd.f32 %v7984_v31, %v2863_v28  ;;  %v8098_v15 = vadd.f32 %v8058_v30, %v2692_v54  ;;  %v3269_v53 = vld [vmem:[#allocation2 + $0x40] sm:$0xf]  ;;  %v8108_v28 = vpop.f32.mrf.mxu0 }
 0x221   : > { %v3306_v58 = vor.u32 %v3304_v11, %v3303_v44  ;;  %v3307_v29 = vrot.slane %v3303_v44, 4  ;;  %v3338_v24 = vor.u32 %v3336_v22, %v8090_v47  ;;  %v3339_v27 = vrot.slane %v8090_v47, 4  ;;  %v8106_v31 = vpop.f32.mrf.mxu1 }
 0x222   : > { %v3805_v34 = vor.u32 %v3804_v19, %v8092_v4  ;;  %v3821_v57 = vor.u32 %v3820_v35, %v8094_v45  ;;  %v3309_v22 = vshrl.u32 %v3265_v40, 16  ;;  %v8114_v54 = vshll.u32 %v3265_v40, 16 }
 0x223   : > { %v3625_v30 = vsel %vm7089_vm12, %v3306_v58, %v3624_v7  ;;  %v3633_v11 = vsel %vm7089_vm12, %v3338_v24, %v3632_v26  ;;  %v3341_v19 = vshrl.u32 %v3269_v53, 16  ;;  %v8116_v9 = vshll.u32 %v3269_v53, 16  ;;  %v2699_v35 = vpop.f32.mrf.mxu1 }
 0x224   : > { %3626 = vst [vmem:[#allocation2] sm:$0xf] %v3625_v30  ;;  %3634 = vst [vmem:[#allocation2 + $0x30] sm:$0xf] %v3633_v11  ;;  %v3806_v44 = vrot.slane %v3805_v34, 4  ;;  %v3822_v47 = vrot.slane %v3821_v57, 4  ;;  %v8125_v57 = vpop.f32.mrf.mxu0 }
 0x225   : > { %v3311_v14 = vrot.slane %v3309_v22, 7  ;;  %v3807_v21 = vrot.slane %v8114_v54, 5  ;;  %v3809_v32 = vrot.slane %v3309_v22, 4  ;;  %v9012_v7 = vshrl.u32 %v8071_v51, 16  ;;  %v8123_v34 = vpop.f32.mrf.mxu1  ;;  %v3270_v42 = vld [vmem:[#allocation2 + $0x4c] sm:$0xf] }
 0x226   : > { %v3343_v24 = vrot.slane %v3341_v19, 7  ;;  %v3823_v26 = vrot.slane %v8116_v9, 5  ;;  %v3825_v40 = vrot.slane %v3341_v19, 4  ;;  %v3815_v30 = vrot.slane %v8086_v46, 5 }
 0x227   : > { %v3327_v58 = vrot.slane %v9012_v7, 7  ;;  %v3753_v2 = vld [vmem:[#allocation2 + $0x18] sm:$0x1]  ;;  %v3314_v11 = vor.u32 %v8114_v54, %v3311_v14  ;;  %v3808_v22 = vsel %vm7031_vm7, %v3806_v44, %v3807_v21  ;;  %v3810_v35 = vor.u32 %v3809_v32, %v3807_v21  ;;  %v2702_v38 = vpop.f32.mrf.mxu1  ;;  %v3993_v32 = vld [vmem:[#allocation2 + $0x44] sm:$0xf] }
 0x228   : > { %v3754_v53 = vsel %vm7160_vm14, %v3699_v23, %v3753_v2  ;;  %v3346_v7 = vor.u32 %v8116_v9, %v3343_v24  ;;  %v3824_v19 = vsel %vm7031_vm7, %v3822_v47, %v3823_v26  ;;  %v3826_v56 = vor.u32 %v3825_v40, %v3823_v26  ;;  %3984 = vst [vmem:[#allocation2 + $0x8] sm:$0xf] %v3808_v22  ;;  %v8136_v2 = vpop.f32.mrf.mxu0 }
 0x229   : > { %3755 = vst [vmem:[#allocation2 + $0x18] sm:$0x1] %v3754_v53  ;;  %v3330_v59 = vor.u32 %v8086_v46, %v3327_v58  ;;  %v3315_v23 = vsel %vm7076_vm11, %v3307_v29, %v3314_v11  ;;  %v3811_v14 = vrot.slane %v3810_v35, 4  ;;  %3992 = vst [vmem:[#allocation2 + $0x38] sm:$0xf] %v3824_v19  ;;  %v3816_v21 = vsel %vm7031_vm7, %v8082_v49, %v3815_v30  ;;  %v2705_v40 = vpop.f32.mrf.mxu1 }
 0x22a   : > { %v9013_v44 = vshrl.u32 %v8071_v51, 16  ;;  %v3347_v58 = vsel %vm7076_vm11, %v3339_v27, %v3346_v7  ;;  %3627 = vst [vmem:[#allocation2 + $0xc] sm:$0xf] %v3315_v23  ;;  %v3827_v38 = vrot.slane %v3826_v56, 4  ;;  %v9014_v24 = vrot.slane %v8065_v3, 4 }
 0x22b   : > { %3988 = vst [vmem:[#allocation2 + $0x20] sm:$0xf] %v3816_v21  ;;  %v3042_v26 = vadd.f32 %v8051_v63, %v3003_v52  ;;  %v3750_v53 = vld [vmem:[#allocation2] sm:$0x1]  ;;  %v3756_v11 = vld [vmem:[#allocation2 + $0x30] sm:$0x1]  ;;  %v3986_v51 = vsel %vm7044_vm8, %v3811_v14, %v3985_v8  ;;  %v2707_v19 = vpop.f32.mrf.mxu1 }
 0x22c   : > { %v3817_v47 = vrot.slane %v9013_v44, 4  ;;  %v3331_v29 = vsel %vm7076_vm11, %v9014_v24, %v3330_v59  ;;  %3635 = vst [vmem:[#allocation2 + $0x3c] sm:$0xf] %v3347_v58  ;;  %v3349_v27 = vshrl.u32 %v3270_v42, 16  ;;  %v3352_v22 = vshll.u32 %v3270_v42, 16 }
 0x22d   : > { %3631 = vst [vmem:[#allocation2 + $0x24] sm:$0xf] %v3331_v29  ;;  %v9015_v56 = vrot.slane %v8092_v4, 4  ;;  %v9016_v59 = vrot.slane %v8094_v45, 4  ;;  %3987 = vst [vmem:[#allocation2 + $0x14] sm:$0xf] %v3986_v51  ;;  %v3994_v35 = vsel %vm7044_vm8, %v3827_v38, %v3993_v32  ;;  %v3004_v44 = vadd.f32 %v7988_v55, %v8098_v15  ;;  %v2708_v58 = vpop.f32.mrf.mxu1 }
 0x22e   : > { %v3818_v49 = vor.u32 %v3817_v47, %v3815_v30  ;;  %v3989_v7 = vld [vmem:[#allocation2 + $0x2c] sm:$0xf]  ;;  %v3074_v8 = vmax.f32 %v3042_v26, 0.0  ;;  %v2886_v30 = vpop.f32.mrf.mxu0  ;;  %3995 = vst [vmem:[#allocation2 + $0x44] sm:$0xf] %v3994_v35  ;;  %v8164_v4 = vrot.slane %v3349_v27, 7  ;;  %v2871_v47 = vadd.f32 %v8088_v39, %v8106_v31 }
 0x22f   : > { %v3751_v3 = vsel %vm7160_vm14, %v9015_v56, %v3750_v53  ;;  %v3757_v52 = vsel %vm7160_vm14, %v9016_v59, %v3756_v11  ;;  %v8166_v23 = vrot.slane %v3349_v27, 4  ;;  %v3828_v45 = vrot.slane %v3352_v22, 5  ;;  %v3636_v21 = vld [vmem:[#allocation2 + $0x48] sm:$0xf]  ;;  %v2710_v11 = vpop.f32.mrf.mxu1 }
 0x230   : > { %3752 = vst [vmem:[#allocation2] sm:$0x1] %v3751_v3  ;;  %3758 = vst [vmem:[#allocation2 + $0x30] sm:$0x1] %v3757_v52  ;;  %v3819_v42 = vrot.slane %v3818_v49, 4  ;;  %v5871_v14 = vpack.c.bf16 %v3074_v8, %v3074_v8  ;;  %v3073_v32 = vmax.f32 %v8074_v50, 0.0  ;;  %v3354_v24 = vor.u32 %v3352_v22, %v8164_v4  ;;  %v8178_v55 = vpop.f32.mrf.mxu0 }
 0x231   : > { %v3043_v29 = vadd.f32 %v8051_v63, %v3004_v44  ;;  %v3005_v53 = vadd.f32 %v7990_v37, %v2871_v47  ;;  %v2879_v39 = vadd.f32 %v8069_v62, %v2705_v40  ;;  %v2874_v15 = vadd.f32 %v8125_v57, %v8123_v34  ;;  %v2713_v27 = vpop.f32.mrf.mxu1 }
 0x232   : > { %v3990_v38 = vsel %vm7044_vm8, %v3819_v42, %v3989_v7  ;;  %3234 = vst [vmem:[#allocation2 + $0x64] sm:$0xf] %v5871_v14  ;;  %v5870_v26 = vpack.c.bf16 %v3073_v32, %v3073_v32  ;;  %v3637_v50 = vsel %vm7089_vm12, %v3354_v24, %v3636_v21  ;;  %v2882_v31 = vadd.f32 %v8108_v28, %v2708_v58  ;;  %v2889_v35 = vpop.f32.mrf.mxu0 }
 0x233   : > { %3991 = vst [vmem:[#allocation2 + $0x2c] sm:$0xf] %v3990_v38  ;;  %3638 = vst [vmem:[#allocation2 + $0x48] sm:$0xf] %v3637_v50  ;;  %v3829_v51 = vor.u32 %v3828_v45, %v8166_v23  ;;  %v3075_v49 = vmax.f32 %v3043_v29, 0.0  ;;  %v3044_v37 = vadd.f32 %v8051_v63, %v3005_v53  ;;  %v3007_v56 = vadd.f32 %v7996_v16, %v2879_v39  ;;  %v2715_v52 = vpop.f32.mrf.mxu1 }
 0x234   : > { %3233 = vst [vmem:[#allocation2 + $0x58] sm:$0xf] %v5870_v26  ;;  %v4074_v22 = vld [vmem:[#allocation2 + $0x14] sm:$0x8]  ;;  %v3006_v3 = vadd.f32 %v7994_v18, %v2874_v15  ;;  %v3008_v62 = vadd.f32 %v8000_v41, %v2882_v31  ;;  %v2887_v40 = vadd.f32 %v2886_v30, %v2713_v27  ;;  %v3703_v8 = vrot.slane %v8166_v23, 4 }
 0x235   : > { %v4075_v28 = vsel %vm7101_vm13, %v8114_v54, %v4074_v22  ;;  %v4080_v34 = vld [vmem:[#allocation2 + $0x44] sm:$0x8]  ;;  %v5872_v57 = vpack.c.bf16 %v3075_v49, %v3075_v49  ;;  %v3076_v59 = vmax.f32 %v3044_v37, 0.0  ;;  %v3046_v16 = vadd.f32 %v8051_v63, %v3007_v56  ;;  %v2716_v42 = vpop.f32.mrf.mxu1  ;;  %v3640_v49 = vld [vmem:[#allocation2 + $0x60] sm:$0xf] }
 0x236   : > { %4076 = vst [vmem:[#allocation2 + $0x14] sm:$0x8] %v4075_v28  ;;  %v4081_v7 = vsel %vm7101_vm13, %v8116_v9, %v4080_v34  ;;  %v3045_v18 = vadd.f32 %v8051_v63, %v3006_v3  ;;  %v3047_v41 = vadd.f32 %v8051_v63, %v3008_v62  ;;  %v3830_v54 = vrot.slane %v3829_v51, 4  ;;  %v8215_v51 = vpop.f32.mrf.mxu0 }
 0x237   : > { %4082 = vst [vmem:[#allocation2 + $0x44] sm:$0x8] %v4081_v7  ;;  %3235 = vst [vmem:[#allocation2 + $0x70] sm:$0xf] %v5872_v57  ;;  %v5873_v19 = vpack.c.bf16 %v3076_v59, %v3076_v59  ;;  %v3009_v30 = vadd.f32 %v8002_v33, %v2887_v40  ;;  %v3078_v21 = vmax.f32 %v3046_v16, 0.0  ;;  %v2890_v9 = vadd.f32 %v2889_v35, %v2716_v42  ;;  %v2718_v23 = vpop.f32.mrf.mxu1 }
 0x238   : > { %v3077_v44 = vmax.f32 %v3045_v18, 0.0  ;;  %v3079_v38 = vmax.f32 %v3047_v41, 0.0  ;;  %v3355_v40 = vrot.slane %v8164_v4, 4  ;;  %v4001_v23 = vld [vmem:[#allocation2 + $0x74] sm:$0xf] }
 0x239   : > { %v3272_v14 = vld [vmem:[#allocation2 + $0x64] sm:$0xf]  ;;  %3236 = vst [vmem:[#allocation2 + $0x7c] sm:$0xf] %v5873_v19  ;;  %v5875_v26 = vpack.c.bf16 %v3078_v21, %v3078_v21  ;;  %v3048_v53 = vadd.f32 %v8051_v63, %v3009_v30  ;;  %v3010_v11 = vadd.f32 %v8006_v61, %v2890_v9  ;;  %v8213_v31 = vpop.f32.mrf.mxu1  ;;  %v8230_v19 = vpop.f32.mrf.mxu0 }
 0x23a   : > { %v4077_v45 = vld [vmem:[#allocation2 + $0x2c] sm:$0x8]  ;;  %v3365_v47 = vshrl.u32 %v3272_v14, 16  ;;  %v3368_v58 = vshll.u32 %v3272_v14, 16  ;;  %v3759_v24 = vld [vmem:[#allocation2 + $0x48] sm:$0x1]  ;;  %v5874_v33 = vpack.c.bf16 %v3077_v44, %v3077_v44  ;;  %v5876_v61 = vpack.c.bf16 %v3079_v38, %v3079_v38 }
 0x23b   : > { %v4078_v32 = vsel %vm7101_vm13, %v8086_v46, %v4077_v45  ;;  %v3271_v29 = vld [vmem:[#allocation2 + $0x58] sm:$0xf]  ;;  %v3760_v46 = vsel %vm7160_vm14, %v3703_v8, %v3759_v24  ;;  %3238 = vst [vmem:[#allocation2 + $0x94] sm:$0xf] %v5875_v26  ;;  %v3080_v22 = vmax.f32 %v3048_v53, 0.0  ;;  %v2723_v28 = vpop.f32.mrf.mxu1  ;;  %v8236_v14 = vadd.f32 %v8051_v63, %v3010_v11 }
 0x23c   : > { %4079 = vst [vmem:[#allocation2 + $0x2c] sm:$0x8] %v4078_v32  ;;  %v8207_v50 = vrot.slane %v3365_v47, 7  ;;  %v8209_v39 = vrot.slane %v3365_v47, 4  ;;  %v3836_v15 = vrot.slane %v3368_v58, 5  ;;  %v3357_v37 = vshrl.u32 %v3271_v29, 16 }
 0x23d   : > { %3761 = vst [vmem:[#allocation2 + $0x48] sm:$0x1] %v3760_v46  ;;  %v8217_v27 = vshll.u32 %v3271_v29, 16  ;;  %3237 = vst [vmem:[#allocation2 + $0x88] sm:$0xf] %v5874_v33  ;;  %v5877_v35 = vpack.c.bf16 %v3080_v22, %v3080_v22  ;;  %v8228_v8 = vpop.f32.mrf.mxu1 }
 0x23e   : > { %v3370_v56 = vor.u32 %v3368_v58, %v8207_v50  ;;  %v3371_v3 = vrot.slane %v8207_v50, 4  ;;  %v3837_v62 = vor.u32 %v3836_v15, %v8209_v39  ;;  %v3273_v34 = vld [vmem:[#allocation2 + $0x70] sm:$0xf]  ;;  %v3359_v57 = vrot.slane %v3357_v37, 7  ;;  %3239 = vst [vmem:[#allocation2 + $0xa0] sm:$0xf] %v5876_v61 }
 0x23f   : > { %v3831_v59 = vrot.slane %v8217_v27, 5  ;;  %v3833_v52 = vrot.slane %v3357_v37, 4  ;;  %v3373_v18 = vshrl.u32 %v3273_v34, 16  ;;  %v8226_v41 = vshll.u32 %v3273_v34, 16  ;;  %3240 = vst [vmem:[#allocation2 + $0xac] sm:$0xf] %v5877_v35  ;;  %v2726_v58 = vpop.f32.mrf.mxu1 }
 0x240   : > { %v3641_v7 = vsel %vm7089_vm12, %v3370_v56, %v3640_v49  ;;  %v3838_v16 = vrot.slane %v3837_v62, 4  ;;  %v3362_v4 = vor.u32 %v8217_v27, %v3359_v57  ;;  %v3274_v45 = vld [vmem:[#allocation2 + $0x7c] sm:$0xf]  ;;  %v3705_v38 = vrot.slane %v8209_v39, 4  ;;  %v3644_v50 = vld [vmem:[#allocation2 + $0x78] sm:$0xf]  ;;  %v8249_v39 = vpop.f32.mrf.mxu0 }
 0x241   : > { %3642 = vst [vmem:[#allocation2 + $0x60] sm:$0xf] %v3641_v7  ;;  %v3832_v30 = vsel %vm7031_vm7, %v3830_v54, %v3831_v59  ;;  %v3834_v42 = vor.u32 %v3833_v52, %v3831_v59  ;;  %v3375_v21 = vrot.slane %v3373_v18, 7  ;;  %v3839_v44 = vrot.slane %v8226_v41, 5  ;;  %v3997_v32 = vld [vmem:[#allocation2 + $0x5c] sm:$0xf]  ;;  %v8247_v46 = vpop.f32.mrf.mxu1 }
 0x242   : > { %v3841_v9 = vrot.slane %v3373_v18, 4  ;;  %3996 = vst [vmem:[#allocation2 + $0x50] sm:$0xf] %v3832_v30  ;;  %v3381_v47 = vshrl.u32 %v3274_v45, 16  ;;  %v3363_v54 = vsel %vm7076_vm11, %v3355_v40, %v3362_v4  ;;  %v3384_v29 = vshll.u32 %v3274_v45, 16 }
 0x243   : > { %v3835_v24 = vrot.slane %v3834_v42, 4  ;;  %v3378_v26 = vor.u32 %v8226_v41, %v3375_v21  ;;  %v3840_v33 = vsel %vm7031_vm7, %v3838_v16, %v3839_v44  ;;  %3639 = vst [vmem:[#allocation2 + $0x54] sm:$0xf] %v3363_v54  ;;  %v3276_v15 = vld [vmem:[#allocation2 + $0x94] sm:$0xf]  ;;  %v3081_v34 = vmax.f32 %v8236_v14, 0.0  ;;  %v2731_v57 = vpop.f32.mrf.mxu1 }
 0x244   : > { %v3842_v53 = vor.u32 %v3841_v9, %v3839_v44  ;;  %v8245_v11 = vrot.slane %v3381_v47, 7  ;;  %4000 = vst [vmem:[#allocation2 + $0x68] sm:$0xf] %v3840_v33  ;;  %v8253_v37 = vrot.slane %v3381_v47, 4  ;;  %v3844_v61 = vrot.slane %v3384_v29, 5  ;;  %v8271_v44 = vpop.f32.mrf.mxu0 }
 0x245   : > { %v3998_v49 = vsel %vm7044_vm8, %v3835_v24, %v3997_v32  ;;  %v3397_v22 = vshrl.u32 %v3276_v15, 16  ;;  %v3275_v56 = vld [vmem:[#allocation2 + $0x88] sm:$0xf]  ;;  %v3379_v62 = vsel %vm7076_vm11, %v3371_v3, %v3378_v26  ;;  %v3400_v7 = vshll.u32 %v3276_v15, 16  ;;  %v3648_v16 = vld [vmem:[#allocation2 + $0x90] sm:$0xf]  ;;  %v8269_v21 = vpop.f32.mrf.mxu1 }
 0x246   : > { %v3843_v40 = vrot.slane %v3842_v53, 4  ;;  %3999 = vst [vmem:[#allocation2 + $0x5c] sm:$0xf] %v3998_v49  ;;  %v3386_v28 = vor.u32 %v3384_v29, %v8245_v11  ;;  %3643 = vst [vmem:[#allocation2 + $0x6c] sm:$0xf] %v3379_v62  ;;  %v3387_v59 = vrot.slane %v8245_v11, 4  ;;  %v3845_v52 = vor.u32 %v3844_v61, %v8253_v37  ;;  %v8280_v53 = vpop.f32.mrf.mxu0 }
 0x247   : > { %v8261_v35 = vrot.slane %v3397_v22, 7  ;;  %v8267_v30 = vrot.slane %v3397_v22, 4  ;;  %v3389_v42 = vshrl.u32 %v3275_v56, 16  ;;  %v3277_v45 = vld [vmem:[#allocation2 + $0xa0] sm:$0xf]  ;;  %v3707_v32 = vrot.slane %v8253_v37, 4  ;;  %v2734_v33 = vpop.f32.mrf.mxu1 }
 0x248   : > { %v3762_v18 = vld [vmem:[#allocation2 + $0x60] sm:$0x1]  ;;  %v4002_v3 = vsel %vm7044_vm8, %v3843_v40, %v4001_v23  ;;  %v3645_v4 = vsel %vm7089_vm12, %v3386_v28, %v3644_v50  ;;  %v3846_v47 = vrot.slane %v3845_v52, 4  ;;  %v3278_v23 = vld [vmem:[#allocation2 + $0xac] sm:$0xf]  ;;  %v3852_v24 = vrot.slane %v3400_v7, 5 }
 0x249   : > { %v3763_v9 = vsel %vm7160_vm14, %v3705_v38, %v3762_v18  ;;  %4003 = vst [vmem:[#allocation2 + $0x74] sm:$0xf] %v4002_v3  ;;  %3646 = vst [vmem:[#allocation2 + $0x78] sm:$0xf] %v3645_v4  ;;  %v3402_v58 = vor.u32 %v3400_v7, %v8261_v35  ;;  %v3403_v54 = vrot.slane %v8261_v35, 4  ;;  %v3391_v29 = vrot.slane %v3389_v42, 7  ;;  %v2918_v4 = vpop.f32.mrf.mxu0 }
 0x24a   : > { %3764 = vst [vmem:[#allocation2 + $0x60] sm:$0x1] %v3763_v9  ;;  %v8278_v26 = vshll.u32 %v3275_v56, 16  ;;  %v3849_v11 = vrot.slane %v3389_v42, 4  ;;  %v3405_v50 = vshrl.u32 %v3277_v45, 16  ;;  %v8284_v15 = vshll.u32 %v3277_v45, 16  ;;  %v8289_v56 = vpop.f32.mrf.mxu1 }
 0x24b   : > { %v3649_v38 = vsel %vm7089_vm12, %v3402_v58, %v3648_v16  ;;  %v3853_v49 = vor.u32 %v3852_v24, %v8267_v30  ;;  %v3413_v22 = vshrl.u32 %v3278_v23, 16  ;;  %v3416_v52 = vshll.u32 %v3278_v23, 16  ;;  %v4005_v45 = vld [vmem:[#allocation2 + $0x8c] sm:$0xf] }
 0x24c   : > { %3650 = vst [vmem:[#allocation2 + $0x90] sm:$0xf] %v3649_v38  ;;  %v3394_v37 = vor.u32 %v8278_v26, %v3391_v29  ;;  %v3847_v61 = vrot.slane %v8278_v26, 5  ;;  %v3407_v40 = vrot.slane %v3405_v50, 7  ;;  %v3855_v28 = vrot.slane %v8284_v15, 5  ;;  %v2739_v3 = vpop.f32.mrf.mxu1 }
 0x24d   : > { %v4083_v62 = vld [vmem:[#allocation2 + $0x5c] sm:$0x8]  ;;  %v3857_v57 = vrot.slane %v3405_v50, 4  ;;  %v3854_v7 = vrot.slane %v3853_v49, 4  ;;  %v8300_v23 = vrot.slane %v3413_v22, 7  ;;  %v8304_v29 = vrot.slane %v3413_v22, 4 }
 0x24e   : > { %v4084_v35 = vsel %vm7101_vm13, %v8217_v27, %v4083_v62  ;;  %v3395_v16 = vsel %vm7076_vm11, %v3387_v59, %v3394_v37  ;;  %v3848_v18 = vsel %vm7031_vm7, %v3846_v47, %v3847_v61  ;;  %v3850_v42 = vor.u32 %v3849_v11, %v3847_v61  ;;  %v2740_v38 = vpop.f32.mrf.mxu1  ;;  %v4009_v61 = vld [vmem:[#allocation2 + $0xa4] sm:$0xf]  ;;  %v3652_v22 = vld [vmem:[#allocation2 + $0xa8] sm:$0xf] }
 0x24f   : > { %4085 = vst [vmem:[#allocation2 + $0x5c] sm:$0x8] %v4084_v35  ;;  %3647 = vst [vmem:[#allocation2 + $0x84] sm:$0xf] %v3395_v16  ;;  %v3410_v9 = vor.u32 %v8284_v15, %v3407_v40  ;;  %v3858_v58 = vor.u32 %v3857_v57, %v3855_v28  ;;  %v3856_v59 = vsel %vm7031_vm7, %v3854_v7, %v3855_v28  ;;  %v3860_v47 = vrot.slane %v3416_v52, 5 }
 0x250   : > { %4004 = vst [vmem:[#allocation2 + $0x80] sm:$0xf] %v3848_v18  ;;  %v4086_v27 = vld [vmem:[#allocation2 + $0x74] sm:$0x8]  ;;  %v3765_v24 = vld [vmem:[#allocation2 + $0x78] sm:$0x1]  ;;  %v5878_v33 = vpack.c.bf16 %v3081_v34, %v3081_v34  ;;  %v3418_v62 = vor.u32 %v3416_v52, %v8300_v23  ;;  %v2742_v40 = vpop.f32.mrf.mxu1  ;;  %v2895_v35 = vadd.f32 %v8136_v2, %v8213_v31  ;;  %v2903_v18 = vadd.f32 %v8230_v19, %v8247_v46 }
 0x251   : > { %v4087_v11 = vsel %vm7101_vm13, %v8226_v41, %v4086_v27  ;;  %v3766_v50 = vsel %vm7160_vm14, %v3707_v32, %v3765_v24  ;;  %v3851_v49 = vrot.slane %v3850_v42, 4  ;;  %v3411_v37 = vsel %vm7076_vm11, %v3403_v54, %v3410_v9  ;;  %4008 = vst [vmem:[#allocation2 + $0x98] sm:$0xf] %v3856_v59  ;;  %v8319_v32 = vpop.f32.mrf.mxu0 }
 0x252   : > { %4088 = vst [vmem:[#allocation2 + $0x74] sm:$0x8] %v4087_v11  ;;  %3767 = vst [vmem:[#allocation2 + $0x78] sm:$0x1] %v3766_v50  ;;  %v3709_v14 = vrot.slane %v8267_v30, 4  ;;  %v3859_v34 = vrot.slane %v3858_v58, 4  ;;  %v3861_v57 = vor.u32 %v3860_v47, %v8304_v29  ;;  %v2898_v30 = vadd.f32 %v8178_v55, %v8228_v8  ;;  %v2745_v3 = vpop.f32.mrf.mxu1 }
 0x253   : > { %3651 = vst [vmem:[#allocation2 + $0x9c] sm:$0xf] %v3411_v37  ;;  %v3419_v41 = vrot.slane %v8300_v23, 4  ;;  %3241 = vst [vmem:[#allocation2 + $0xb8] sm:$0xf] %v5878_v33  ;;  %v4006_v54 = vsel %vm7044_vm8, %v3851_v49, %v4005_v45  ;;  %v3653_v16 = vsel %vm7089_vm12, %v3418_v62, %v3652_v22  ;;  %v3711_v2 = vrot.slane %v8304_v29, 4  ;;  %v2921_v58 = vpop.f32.mrf.mxu0 }
 0x254   : > { %v3768_v28 = vld [vmem:[#allocation2 + $0x90] sm:$0x1]  ;;  %4007 = vst [vmem:[#allocation2 + $0x8c] sm:$0xf] %v4006_v54  ;;  %v4010_v7 = vsel %vm7044_vm8, %v3859_v34, %v4009_v61  ;;  %3654 = vst [vmem:[#allocation2 + $0xa8] sm:$0xf] %v3653_v16  ;;  %v3011_v55 = vadd.f32 %v8008_v25, %v2895_v35  ;;  %v3012_v31 = vadd.f32 %v8012_v17, %v2898_v30  ;;  %v2747_v9 = vpop.f32.mrf.mxu1 }
 0x255   : > { %v3769_v52 = vsel %vm7160_vm14, %v3709_v14, %v3768_v28  ;;  %4011 = vst [vmem:[#allocation2 + $0xa4] sm:$0xf] %v4010_v7  ;;  %v2906_v8 = vadd.f32 %v8271_v44, %v8269_v21  ;;  %v3013_v42 = vadd.f32 %v8014_v20, %v2903_v18  ;;  %v2911_v45 = vadd.f32 %v8215_v51, %v8289_v56 }
 0x256   : > { %3770 = vst [vmem:[#allocation2 + $0x90] sm:$0x1] %v3769_v52  ;;  %v2914_v19 = vadd.f32 %v8249_v39, %v2740_v38  ;;  %v2919_v46 = vadd.f32 %v2918_v4, %v2745_v3  ;;  %v3862_v27 = vrot.slane %v3861_v57, 4  ;;  %v3050_v24 = vadd.f32 %v8051_v63, %v3011_v55  ;;  %v2748_v44 = vpop.f32.mrf.mxu1 }
 0x257   : > { %v3051_v25 = vadd.f32 %v8051_v63, %v3012_v31  ;;  %v3014_v17 = vadd.f32 %v8017_v43, %v2906_v8  ;;  %v3052_v59 = vadd.f32 %v8051_v63, %v3013_v42  ;;  %v3015_v21 = vadd.f32 %v8019_v36, %v2911_v45  ;;  %v4013_v8 = vld [vmem:[#allocation2 + $0xbc] sm:$0xf] }
 0x258   : > { %v3016_v20 = vadd.f32 %v8021_v10, %v2914_v19  ;;  %v3017_v51 = vadd.f32 %v8023_v6, %v2919_v46  ;;  %v3082_v56 = vmax.f32 %v3050_v24, 0.0  ;;  %v2922_v47 = vadd.f32 %v2921_v58, %v2748_v44  ;;  %v2750_v50 = vpop.f32.mrf.mxu1 }
 0x259   : > { %v3083_v4 = vmax.f32 %v3051_v25, 0.0  ;;  %v3053_v29 = vadd.f32 %v8051_v63, %v3014_v17  ;;  %v3084_v11 = vmax.f32 %v3052_v59, 0.0  ;;  %v3054_v43 = vadd.f32 %v8051_v63, %v3015_v21  ;;  %v8384_v59 = vpop.f32.mrf.mxu0 }
 0x25a   : > { %v3279_v39 = vld [vmem:[#allocation2 + $0xb8] sm:$0xf]  ;;  %v5879_v36 = vpack.c.bf16 %v3082_v56, %v3082_v56  ;;  %v3055_v6 = vadd.f32 %v8051_v63, %v3016_v20  ;;  %v2753_v28 = vpop.f32.mrf.mxu1 }
 0x25b   : > { %v3421_v33 = vshrl.u32 %v3279_v39, 16  ;;  %v8353_v38 = vshll.u32 %v3279_v39, 16  ;;  %v4089_v49 = vld [vmem:[#allocation2 + $0x8c] sm:$0x8]  ;;  %v5880_v37 = vpack.c.bf16 %v3083_v4, %v3083_v4  ;;  %v3085_v10 = vmax.f32 %v3053_v29, 0.0 }
 0x25c   : > { %v4090_v61 = vsel %vm7101_vm13, %v8278_v26, %v4089_v49  ;;  %v4092_v22 = vld [vmem:[#allocation2 + $0xa4] sm:$0x8]  ;;  %v3771_v14 = vld [vmem:[#allocation2 + $0xa8] sm:$0x1]  ;;  %v5881_v40 = vpack.c.bf16 %v3084_v11, %v3084_v11  ;;  %3242 = vst [vmem:[#allocation2 + $0xc4] sm:$0xf] %v5879_v36  ;;  %v2755_v18 = vpop.f32.mrf.mxu1  ;;  %v2927_v55 = vadd.f32 %v8280_v53, %v2753_v28 }
 0x25d   : > { %v3423_v34 = vrot.slane %v3421_v33, 7  ;;  %v3863_v62 = vrot.slane %v8353_v38, 5  ;;  %4091 = vst [vmem:[#allocation2 + $0x8c] sm:$0x8] %v4090_v61  ;;  %v4093_v54 = vsel %vm7101_vm13, %v8284_v15, %v4092_v22  ;;  %v3772_v57 = vsel %vm7160_vm14, %v3711_v2, %v3771_v14  ;;  %3243 = vst [vmem:[#allocation2 + $0xd0] sm:$0xf] %v5880_v37 }
 0x25e   : > { %v3865_v35 = vrot.slane %v3421_v33, 4  ;;  %v5882_v30 = vpack.c.bf16 %v3085_v10, %v3085_v10  ;;  %4094 = vst [vmem:[#allocation2 + $0xa4] sm:$0x8] %v4093_v54  ;;  %3773 = vst [vmem:[#allocation2 + $0xa8] sm:$0x1] %v3772_v57  ;;  %v3086_v7 = vmax.f32 %v3054_v43, 0.0  ;;  %v3056_v15 = vadd.f32 %v8051_v63, %v3017_v51  ;;  %v2756_v19 = vpop.f32.mrf.mxu1 }
 0x25f   : > { %v3426_v26 = vor.u32 %v8353_v38, %v3423_v34  ;;  %v3864_v52 = vsel %vm7031_vm7, %v3862_v27, %v3863_v62  ;;  %3244 = vst [vmem:[#allocation2 + $0xdc] sm:$0xf] %v5881_v40  ;;  %v3087_v16 = vmax.f32 %v3055_v6, 0.0  ;;  %v3018_v2 = vadd.f32 %v8025_v60, %v2922_v47  ;;  %v9017_v27 = vld [vmem:[#allocation19_spill] sm:$0xff]  ;;  %v9018_v51 = vld [vmem:[#allocation20_spill] sm:$0xff]  ;;  %v8396_v6 = vpop.f32.mrf.mxu0 }
 0x260   : > { %v3866_v3 = vor.u32 %v3865_v35, %v3863_v62  ;;  %4012 = vst [vmem:[#allocation2 + $0xb0] sm:$0xf] %v3864_v52  ;;  %3245 = vst [vmem:[#allocation2 + $0xe8] sm:$0xf] %v5882_v30  ;;  %v5883_v42 = vpack.c.bf16 %v3086_v7, %v3086_v7  ;;  %v3088_v9 = vmax.f32 %v3056_v15, 0.0  ;;  %v3019_v24 = vadd.f32 %v9017_v27, %v2927_v55  ;;  %v2758_v53 = vpop.f32.mrf.mxu1 }
 0x261   : > { %v3427_v31 = vsel %vm7076_vm11, %v3419_v41, %v3426_v26  ;;  %v5884_v45 = vpack.c.bf16 %v3087_v16, %v3087_v16  ;;  %v3057_v58 = vadd.f32 %v8051_v63, %v3018_v2  ;;  %v2930_v60 = vadd.f32 %v8319_v32, %v2756_v19  ;;  %v3656_v61 = vld [vmem:[#allocation2 + $0xc0] sm:$0xf]  ;;  %v4017_v30 = vld [vmem:[#allocation2 + $0xd4] sm:$0xf]  ;;  %v3660_v26 = vld [vmem:[#allocation2 + $0xd8] sm:$0xf] }
 0x262   : > { %3655 = vst [vmem:[#allocation2 + $0xb4] sm:$0xf] %v3427_v31  ;;  %v3867_v46 = vrot.slane %v3866_v3, 4  ;;  %3246 = vst [vmem:[#allocation2 + $0xf4] sm:$0xf] %v5883_v42  ;;  %v5885_v41 = vpack.c.bf16 %v3088_v9, %v3088_v9  ;;  %v8382_v17 = vadd.f32 %v8051_v63, %v3019_v24  ;;  %v8389_v39 = vpop.f32.mrf.mxu1 }
 0x263   : > { %3247 = vst [vmem:[#allocation2 + $0x100] sm:$0xf] %v5884_v45  ;;  %v3089_v25 = vmax.f32 %v3057_v58, 0.0  ;;  %v3280_v21 = vld [vmem:[#allocation2 + $0xc4] sm:$0xf]  ;;  %v8387_v44 = vadd.f32 %v9018_v51, %v2930_v60 }
 0x264   : > { %v4014_v23 = vsel %vm7044_vm8, %v3867_v46, %v4013_v8  ;;  %v3281_v20 = vld [vmem:[#allocation2 + $0xd0] sm:$0xf]  ;;  %v3429_v32 = vshrl.u32 %v3280_v21, 16  ;;  %v3432_v56 = vshll.u32 %v3280_v21, 16  ;;  %3248 = vst [vmem:[#allocation2 + $0x10c] sm:$0xf] %v5885_v41  ;;  %v2763_v50 = vpop.f32.mrf.mxu1  ;;  %v8415_v46 = vpop.f32.mrf.mxu0 }
 0x265   : > { %4015 = vst [vmem:[#allocation2 + $0xbc] sm:$0xf] %v4014_v23  ;;  %v3437_v4 = vshrl.u32 %v3281_v20, 16  ;;  %v8391_v29 = vshll.u32 %v3281_v20, 16  ;;  %v5886_v11 = vpack.c.bf16 %v3089_v25, %v3089_v25  ;;  %v3090_v43 = vmax.f32 %v8382_v17, 0.0 }
 0x266   : > { %v3282_v47 = vld [vmem:[#allocation2 + $0xdc] sm:$0xf]  ;;  %v3431_v49 = vrot.slane %v3429_v32, 7  ;;  %v8394_v36 = vrot.slane %v3429_v32, 4  ;;  %v3868_v37 = vrot.slane %v3432_v56, 5  ;;  %v8403_v40 = vpop.f32.mrf.mxu1 }
 0x267   : > { %v3445_v33 = vshrl.u32 %v3282_v47, 16  ;;  %v3448_v63 = vshll.u32 %v3282_v47, 16  ;;  %v3439_v10 = vrot.slane %v3437_v4, 7  ;;  %v3871_v22 = vrot.slane %v8391_v29, 5  ;;  %3249 = vst [vmem:[#allocation2 + $0x118] sm:$0xf] %v5886_v11 }
 0x268   : > { %v3873_v14 = vrot.slane %v3437_v4, 4  ;;  %v3434_v28 = vor.u32 %v3432_v56, %v3431_v49  ;;  %v3435_v54 = vrot.slane %v3431_v49, 4  ;;  %v3713_v57 = vrot.slane %v8394_v36, 4  ;;  %v3283_v52 = vld [vmem:[#allocation2 + $0xe8] sm:$0xf]  ;;  %v2766_v55 = vpop.f32.mrf.mxu1 }
 0x269   : > { %v8399_v34 = vrot.slane %v3445_v33, 7  ;;  %v8401_v62 = vrot.slane %v3445_v33, 4  ;;  %v3869_v35 = vor.u32 %v3868_v37, %v8394_v36  ;;  %v3442_v7 = vor.u32 %v8391_v29, %v3439_v10  ;;  %v3284_v15 = vld [vmem:[#allocation2 + $0xf4] sm:$0xf] }
 0x26a   : > { %v3874_v16 = vor.u32 %v3873_v14, %v3871_v22  ;;  %v8410_v2 = vld [vmem:[#allocation2 + $0x100] sm:$0xf]  ;;  %v3657_v8 = vsel %vm7089_vm12, %v3434_v28, %v3656_v61  ;;  %v3876_v19 = vrot.slane %v3448_v63, 5  ;;  %v8424_v60 = vpop.f32.mrf.mxu1  ;;  %v3453_v41 = vshrl.u32 %v3283_v52, 16 }
 0x26b   : > { %v3450_v18 = vor.u32 %v3448_v63, %v8399_v34  ;;  %v3451_v3 = vrot.slane %v8399_v34, 4  ;;  %v3870_v42 = vrot.slane %v3869_v35, 4  ;;  %v3715_v45 = vrot.slane %v8401_v62, 4  ;;  %3658 = vst [vmem:[#allocation2 + $0xc0] sm:$0xf] %v3657_v8  ;;  %v8435_v63 = vpop.f32.mrf.mxu0 }
 0x26c   : > { %v4095_v31 = vld [vmem:[#allocation2 + $0xbc] sm:$0x8]  ;;  %v3443_v58 = vsel %vm7076_vm11, %v3435_v54, %v3442_v7  ;;  %v3875_v27 = vrot.slane %v3874_v16, 4  ;;  %v3877_v23 = vor.u32 %v3876_v19, %v8401_v62  ;;  %v3461_v21 = vshrl.u32 %v3284_v15, 16  ;;  %v2771_v32 = vpop.f32.mrf.mxu1  ;;  %v3664_v34 = vld [vmem:[#allocation2 + $0xf0] sm:$0xf] }
 0x26d   : > { %v4096_v9 = vsel %vm7101_vm13, %v8353_v38, %v4095_v31  ;;  %v3661_v24 = vsel %vm7089_vm12, %v3450_v18, %v3660_v26  ;;  %3659 = vst [vmem:[#allocation2 + $0xcc] sm:$0xf] %v3443_v58  ;;  %v3872_v53 = vsel %vm7031_vm7, %v3870_v42, %v3871_v22  ;;  %v8429_v38 = vshll.u32 %v3283_v52, 16  ;;  %v8447_v28 = vpop.f32.mrf.mxu0  ;;  %v4021_v54 = vld [vmem:[#allocation2 + $0xec] sm:$0xf] }
 0x26e   : > { %4097 = vst [vmem:[#allocation2 + $0xbc] sm:$0x8] %v4096_v9  ;;  %3662 = vst [vmem:[#allocation2 + $0xd8] sm:$0xf] %v3661_v24  ;;  %v4018_v25 = vsel %vm7044_vm8, %v3875_v27, %v4017_v30  ;;  %v3464_v20 = vshll.u32 %v3284_v15, 16  ;;  %v3469_v51 = vshrl.u32 %v8410_v2, 16  ;;  %v8439_v10 = vpop.f32.mrf.mxu1 }
 0x26f   : > { %4016 = vst [vmem:[#allocation2 + $0xc8] sm:$0xf] %v3872_v53  ;;  %4019 = vst [vmem:[#allocation2 + $0xd4] sm:$0xf] %v4018_v25  ;;  %v3878_v56 = vrot.slane %v3877_v23, 4  ;;  %v3455_v4 = vrot.slane %v3453_v41, 7  ;;  %v8469_v23 = vpop.f32.mrf.mxu0 }
 0x270   : > { %v3879_v47 = vrot.slane %v8429_v38, 5  ;;  %v3881_v33 = vrot.slane %v3453_v41, 4  ;;  %v3463_v11 = vrot.slane %v3461_v21, 7  ;;  %v8437_v50 = vrot.slane %v3461_v21, 4  ;;  %v3286_v7 = vld [vmem:[#allocation2 + $0x10c] sm:$0xf]  ;;  %v2774_v16 = vpop.f32.mrf.mxu1 }
 0x271   : > { %v3884_v49 = vrot.slane %v3464_v20, 5  ;;  %v3471_v37 = vrot.slane %v3469_v51, 7  ;;  %v3458_v61 = vor.u32 %v8429_v38, %v3455_v4  ;;  %v8445_v62 = vshll.u32 %v8410_v2, 16  ;;  %v3287_v8 = vld [vmem:[#allocation2 + $0x118] sm:$0xf] }
 0x272   : > { %v3880_v22 = vsel %vm7031_vm7, %v3878_v56, %v3879_v47  ;;  %v3882_v14 = vor.u32 %v3881_v33, %v3879_v47  ;;  %v3466_v35 = vor.u32 %v3464_v20, %v3463_v11  ;;  %v3467_v30 = vrot.slane %v3463_v11, 4  ;;  %v3774_v18 = vld [vmem:[#allocation2 + $0xc0] sm:$0x1]  ;;  %v8461_v24 = vpop.f32.mrf.mxu1  ;;  %v4025_v56 = vld [vmem:[#allocation2 + $0x104] sm:$0xf] }
 0x273   : > { %4020 = vst [vmem:[#allocation2 + $0xe0] sm:$0xf] %v3880_v22  ;;  %v3717_v26 = vrot.slane %v8437_v50, 4  ;;  %v3885_v52 = vor.u32 %v3884_v49, %v8437_v50  ;;  %v3459_v15 = vsel %vm7076_vm11, %v3451_v3, %v3458_v61  ;;  %v3474_v2 = vor.u32 %v8445_v62, %v3471_v37  ;;  %v3668_v49 = vld [vmem:[#allocation2 + $0x108] sm:$0xf]  ;;  %v9021_v50 = vld [vmem:[#allocation23_spill] sm:$0xff] }
 0x274   : > { %v3883_v55 = vrot.slane %v3882_v14, 4  ;;  %v3887_v31 = vrot.slane %v8445_v62, 5  ;;  %v3775_v42 = vsel %vm7160_vm14, %v3713_v57, %v3774_v18  ;;  %3663 = vst [vmem:[#allocation2 + $0xe4] sm:$0xf] %v3459_v15  ;;  %v3665_v9 = vsel %vm7089_vm12, %v3466_v35, %v3664_v34 }
 0x275   : > { %v3777_v19 = vld [vmem:[#allocation2 + $0xd8] sm:$0x1]  ;;  %v3886_v58 = vrot.slane %v3885_v52, 4  ;;  %v3889_v27 = vrot.slane %v3469_v51, 4  ;;  %3776 = vst [vmem:[#allocation2 + $0xc0] sm:$0x1] %v3775_v42  ;;  %v3475_v36 = vsel %vm7076_vm11, %v3467_v30, %v3474_v2  ;;  %v2779_v51 = vpop.f32.mrf.mxu1  ;;  %v6071_v30 = vpop.f32.mrf.mxu0  ;;  %v5887_v18 = vpack.c.bf16 %v3090_v43, %v3090_v43 }
 0x276   : > { %v3778_v3 = vsel %vm7160_vm14, %v3715_v45, %v3777_v19  ;;  %v4022_v53 = vsel %vm7044_vm8, %v3883_v55, %v4021_v54  ;;  %3666 = vst [vmem:[#allocation2 + $0xf0] sm:$0xf] %v3665_v9  ;;  %v3477_v57 = vshrl.u32 %v3286_v7, 16  ;;  %v4098_v41 = vld [vmem:[#allocation2 + $0xd4] sm:$0x8]  ;;  %v3480_v20 = vshll.u32 %v3286_v7, 16 }
 0x277   : > { %3779 = vst [vmem:[#allocation2 + $0xd8] sm:$0x1] %v3778_v3  ;;  %4023 = vst [vmem:[#allocation2 + $0xec] sm:$0xf] %v4022_v53  ;;  %v3888_v25 = vsel %vm7031_vm7, %v3886_v58, %v3887_v31  ;;  %v3890_v21 = vor.u32 %v3889_v27, %v3887_v31  ;;  %v3485_v45 = vshrl.u32 %v3287_v8, 16  ;;  %v4099_v32 = vsel %vm7101_vm13, %v8391_v29, %v4098_v41  ;;  %v2780_v14 = vpop.f32.mrf.mxu1  ;;  %v2953_v41 = vpop.f32.mrf.mxu0 }
 0x278   : > { %3667 = vst [vmem:[#allocation2 + $0xfc] sm:$0xf] %v3475_v36  ;;  %4024 = vst [vmem:[#allocation2 + $0xf8] sm:$0xf] %v3888_v25  ;;  %v3479_v4 = vrot.slane %v3477_v57, 7  ;;  %v8476_v47 = vrot.slane %v3477_v57, 4  ;;  %v2935_v42 = vadd.f32 %v8396_v6, %v8389_v39  ;;  %v2938_v58 = vadd.f32 %v8435_v63, %v8403_v40 }
 0x279   : > { %v8478_v33 = vshll.u32 %v3287_v8, 16  ;;  %4100 = vst [vmem:[#allocation2 + $0xd4] sm:$0x8] %v4099_v32  ;;  %v3891_v11 = vrot.slane %v3890_v21, 4  ;;  %v3892_v37 = vrot.slane %v3480_v20, 5  ;;  %v3487_v61 = vrot.slane %v3485_v45, 7  ;;  %v2782_v15 = vpop.f32.mrf.mxu1 }
 0x27a   : > { %v3897_v22 = vrot.slane %v3485_v45, 4  ;;  %v3482_v34 = vor.u32 %v3480_v20, %v3479_v4  ;;  %v3483_v54 = vrot.slane %v3479_v4, 4  ;;  %v3719_v35 = vrot.slane %v8476_v47, 4  ;;  %v8494_v31 = vld [vmem:[%s8941_s2] ss:$0 sm:$0xff] }
 0x27b   : > { %v3895_v29 = vrot.slane %v8478_v33, 5  ;;  %v4026_v52 = vsel %vm7044_vm8, %v3891_v11, %v4025_v56  ;;  %v3893_v7 = vor.u32 %v3892_v37, %v8476_v47  ;;  %v3490_v16 = vor.u32 %v8478_v33, %v3487_v61  ;;  %v4029_v9 = vld [vmem:[#allocation2 + $0x11c] sm:$0xf]  ;;  %3250 = vst [vmem:[#allocation2 + $0x124] sm:$0xf] %v5887_v18  ;;  %v2785_v3 = vpop.f32.mrf.mxu1  ;;  %v9019_v36 = vld [vmem:[#allocation21_spill] sm:$0xff] }
 0x27c   : > { %4027 = vst [vmem:[#allocation2 + $0x104] sm:$0xf] %v4026_v52  ;;  %v3669_v55 = vsel %vm7089_vm12, %v3482_v34, %v3668_v49  ;;  %v3059_v8 = vadd.f32 %v8494_v31, %v8387_v44  ;;  %v2943_v27 = vadd.f32 %v8384_v59, %v8424_v60  ;;  %v3021_v57 = vadd.f32 %v9019_v36, %v2935_v42  ;;  %v9020_v60 = vld [vmem:[#allocation22_spill] sm:$0xff]  ;;  %v9022_v37 = vld [vmem:[#allocation24_spill] sm:$0xff] }
 0x27d   : > { %v3898_v2 = vor.u32 %v3897_v22, %v3895_v29  ;;  %v3780_v17 = vld [vmem:[#allocation2 + $0xf0] sm:$0x1]  ;;  %3670 = vst [vmem:[#allocation2 + $0x108] sm:$0xf] %v3669_v55  ;;  %v3894_v43 = vrot.slane %v3893_v7, 4  ;;  %v3491_v19 = vsel %vm7076_vm11, %v3483_v54, %v3490_v16  ;;  %v3022_v63 = vadd.f32 %v9020_v60, %v2938_v58  ;;  %v2787_v21 = vpop.f32.mrf.mxu1  ;;  %v9024_v7 = vld [vmem:[#allocation26_spill] sm:$0xff] }
 0x27e   : > { %v4101_v53 = vld [vmem:[#allocation2 + $0xec] sm:$0x8]  ;;  %v3781_v44 = vsel %vm7160_vm14, %v3717_v26, %v3780_v17  ;;  %3671 = vst [vmem:[#allocation2 + $0x114] sm:$0xf] %v3491_v19  ;;  %v3091_v6 = vmax.f32 %v3059_v8, 0.0  ;;  %v3023_v25 = vadd.f32 %v9021_v50, %v2943_v27  ;;  %v3060_v45 = vadd.f32 %v8494_v31, %v3021_v57  ;;  %v9026_v36 = vld [vmem:[#allocation28_spill] sm:$0xff] }
 0x27f   : > { %v3899_v39 = vrot.slane %v3898_v2, 4  ;;  %v4102_v40 = vsel %vm7101_vm13, %v8429_v38, %v4101_v53  ;;  %3782 = vst [vmem:[#allocation2 + $0xf0] sm:$0x1] %v3781_v44  ;;  %v3896_v59 = vsel %vm7031_vm7, %v3894_v43, %v3895_v29  ;;  %v2946_v38 = vadd.f32 %v8415_v46, %v8439_v10  ;;  %v2788_v11 = vpop.f32.mrf.mxu1  ;;  %v9023_v10 = vld [vmem:[#allocation25_spill] sm:$0xff]  ;;  %v9025_v2 = vld [vmem:[#allocation27_spill] sm:$0xff] }
 0x280   : > { %4103 = vst [vmem:[#allocation2 + $0xec] sm:$0x8] %v4102_v40  ;;  %4028 = vst [vmem:[#allocation2 + $0x110] sm:$0xf] %v3896_v59  ;;  %v5888_v20 = vpack.c.bf16 %v3091_v6, %v3091_v6  ;;  %v3061_v51 = vadd.f32 %v8494_v31, %v3022_v63  ;;  %v3062_v32 = vadd.f32 %v8494_v31, %v3023_v25  ;;  %v3092_v49 = vmax.f32 %v3060_v45, 0.0 }
 0x281   : > { %v4030_v26 = vsel %vm7044_vm8, %v3899_v39, %v4029_v9  ;;  %v2951_v56 = vadd.f32 %v8469_v23, %v8461_v24  ;;  %v2954_v4 = vadd.f32 %v2953_v41, %v2780_v14  ;;  %v3024_v61 = vadd.f32 %v9022_v37, %v2946_v38  ;;  %v2790_v18 = vpop.f32.mrf.mxu1 }
 0x282   : > { %4031 = vst [vmem:[#allocation2 + $0x11c] sm:$0xf] %v4030_v26  ;;  %3251 = vst [vmem:[#allocation2 + $0x130] sm:$0xf] %v5888_v20  ;;  %v2959_v22 = vadd.f32 %v8447_v28, %v2785_v3  ;;  %v2962_v34 = vadd.f32 %v6071_v30, %v2788_v11  ;;  %v3093_v29 = vmax.f32 %v3061_v51, 0.0  ;;  %v3094_v46 = vmax.f32 %v3062_v32, 0.0 }
 0x283   : > { %v4104_v54 = vld [vmem:[#allocation2 + $0x104] sm:$0x8]  ;;  %v3025_v52 = vadd.f32 %v9023_v10, %v2951_v56  ;;  %v3026_v16 = vadd.f32 %v9024_v7, %v2954_v4  ;;  %v5889_v15 = vpack.c.bf16 %v3092_v49, %v3092_v49  ;;  %v3063_v55 = vadd.f32 %v8494_v31, %v3024_v61  ;;  %v3676_v10 = vld [vmem:[#allocation2 + $0x138] sm:$0xf] }
 0x284   : > { %v4105_v24 = vsel %vm7101_vm13, %v8445_v62, %v4104_v54  ;;  %v3783_v23 = vld [vmem:[#allocation2 + $0x108] sm:$0x1]  ;;  %v3288_v14 = vld [vmem:[#allocation2 + $0x124] sm:$0xf]  ;;  %v3027_v28 = vadd.f32 %v9025_v2, %v2959_v22  ;;  %v5890_v17 = vpack.c.bf16 %v3093_v29, %v3093_v29  ;;  %v5891_v43 = vpack.c.bf16 %v3094_v46, %v3094_v46 }
 0x285   : > { %4106 = vst [vmem:[#allocation2 + $0x104] sm:$0x8] %v4105_v24  ;;  %v3784_v30 = vsel %vm7160_vm14, %v3719_v35, %v3783_v23  ;;  %v3493_v8 = vshrl.u32 %v3288_v14, 16  ;;  %v3496_v42 = vshll.u32 %v3288_v14, 16  ;;  %3252 = vst [vmem:[#allocation2 + $0x13c] sm:$0xf] %v5889_v15  ;;  %v3064_v19 = vadd.f32 %v8494_v31, %v3025_v52 }
 0x286   : > { %3785 = vst [vmem:[#allocation2 + $0x108] sm:$0x1] %v3784_v30  ;;  %v3095_v62 = vmax.f32 %v3063_v55, 0.0  ;;  %v3065_v9 = vadd.f32 %v8494_v31, %v3026_v16  ;;  %3253 = vst [vmem:[#allocation2 + $0x148] sm:$0xf] %v5890_v17  ;;  %v3066_v47 = vadd.f32 %v8494_v31, %v3027_v28  ;;  %v3028_v57 = vadd.f32 %v9026_v36, %v2962_v34 }
 0x287   : > { %v3495_v58 = vrot.slane %v3493_v8, 7  ;;  %v8542_v27 = vrot.slane %v3493_v8, 4  ;;  %v3900_v3 = vrot.slane %v3496_v42, 5  ;;  %v3672_v35 = vld [vmem:[#allocation2 + $0x120] sm:$0xf]  ;;  %v3096_v39 = vmax.f32 %v3064_v19, 0.0 }
 0x288   : > { %3254 = vst [vmem:[#allocation2 + $0x154] sm:$0xf] %v5891_v43  ;;  %v5892_v44 = vpack.c.bf16 %v3095_v62, %v3095_v62  ;;  %v3097_v6 = vmax.f32 %v3065_v9, 0.0  ;;  %v3098_v20 = vmax.f32 %v3066_v47, 0.0  ;;  %v3067_v45 = vadd.f32 %v8494_v31, %v3028_v57  ;;  %v4033_v34 = vld [vmem:[#allocation2 + $0x134] sm:$0xf] }
 0x289   : > { %v4107_v53 = vld [vmem:[#allocation2 + $0x11c] sm:$0x8]  ;;  %v3498_v40 = vor.u32 %v3496_v42, %v3495_v58  ;;  %v3289_v59 = vld [vmem:[#allocation2 + $0x130] sm:$0xf]  ;;  %v3901_v60 = vor.u32 %v3900_v3, %v8542_v27  ;;  %v5893_v25 = vpack.c.bf16 %v3096_v39, %v3096_v39  ;;  %v3499_v56 = vrot.slane %v3495_v58, 4 }
 0x28a   : > { %v4108_v41 = vsel %vm7101_vm13, %v8478_v33, %v4107_v53  ;;  %v3501_v63 = vshrl.u32 %v3289_v59, 16  ;;  %v8550_v50 = vshll.u32 %v3289_v59, 16  ;;  %3255 = vst [vmem:[#allocation2 + $0x160] sm:$0xf] %v5892_v44  ;;  %v5894_v26 = vpack.c.bf16 %v3097_v6, %v3097_v6 }
 0x28b   : > { %4109 = vst [vmem:[#allocation2 + $0x11c] sm:$0x8] %v4108_v41  ;;  %v3673_v21 = vsel %vm7089_vm12, %v3498_v40, %v3672_v35  ;;  %v3902_v38 = vrot.slane %v3901_v60, 4  ;;  %3256 = vst [vmem:[#allocation2 + $0x16c] sm:$0xf] %v5893_v25  ;;  %v3721_v4 = vrot.slane %v8542_v27, 4  ;;  %v5895_v49 = vpack.c.bf16 %v3098_v20, %v3098_v20 }
 0x28c   : > { %3674 = vst [vmem:[#allocation2 + $0x120] sm:$0xf] %v3673_v21  ;;  %v3503_v33 = vrot.slane %v3501_v63, 7  ;;  %v3903_v51 = vrot.slane %v8550_v50, 5  ;;  %v3905_v32 = vrot.slane %v3501_v63, 4  ;;  %v3099_v37 = vmax.f32 %v3067_v45, 0.0 }
 0x28d   : > { %3262 = vst [vmem:[#allocation2 + $0x19c] sm:$0xf] %v5893_v25  ;;  %v3290_v11 = vld [vmem:[#allocation2 + $0x13c] sm:$0xf]  ;;  %3257 = vst [vmem:[#allocation2 + $0x178] sm:$0xf] %v5894_v26 }
 0x28e   : > { %3263 = vst [vmem:[#allocation2 + $0x1a8] sm:$0xf] %v5894_v26  ;;  %v3506_v61 = vor.u32 %v8550_v50, %v3503_v33  ;;  %v3904_v31 = vsel %vm7031_vm7, %v3902_v38, %v3903_v51  ;;  %v3906_v22 = vor.u32 %v3905_v32, %v3903_v51  ;;  %v3509_v54 = vshrl.u32 %v3290_v11, 16  ;;  %v3291_v29 = vld [vmem:[#allocation2 + $0x148] sm:$0xf] }
 0x28f   : > { %4032 = vst [vmem:[#allocation2 + $0x128] sm:$0xf] %v3904_v31  ;;  %v3512_v46 = vshll.u32 %v3290_v11, 16  ;;  %v3517_v52 = vshrl.u32 %v3291_v29, 16  ;;  %v8560_v7 = vshll.u32 %v3291_v29, 16  ;;  %v5896_v16 = vpack.c.bf16 %v3099_v37, %v3099_v37 }
 0x290   : > { %3258 = vst [vmem:[#allocation2 + $0x184] sm:$0xf] %v5895_v49  ;;  %v3507_v18 = vsel %vm7076_vm11, %v3499_v56, %v3506_v61  ;;  %v3907_v24 = vrot.slane %v3906_v22, 4  ;;  %v3511_v23 = vrot.slane %v3509_v54, 7  ;;  %v8564_v14 = vrot.slane %v3509_v54, 4 }
 0x291   : > { %v3292_v15 = vld [vmem:[#allocation2 + $0x154] sm:$0xf]  ;;  %3675 = vst [vmem:[#allocation2 + $0x12c] sm:$0xf] %v3507_v18  ;;  %v3908_v55 = vrot.slane %v3512_v46, 5  ;;  %v3519_v2 = vrot.slane %v3517_v52, 7 }
 0x292   : > { %v3911_v28 = vrot.slane %v8560_v7, 5  ;;  %v3913_v30 = vrot.slane %v3517_v52, 4  ;;  %v3293_v8 = vld [vmem:[#allocation2 + $0x160] sm:$0xf]  ;;  %3259 = vst [vmem:[#allocation2 + $0x190] sm:$0xf] %v5896_v16  ;;  %v4034_v42 = vsel %vm7044_vm8, %v3907_v24, %v4033_v34  ;;  %v3514_v17 = vor.u32 %v3512_v46, %v3511_v23 }
 0x293   : > { %v3515_v43 = vrot.slane %v3511_v23, 4  ;;  %v3723_v62 = vrot.slane %v8564_v14, 4  ;;  %v3786_v19 = vld [vmem:[#allocation2 + $0x120] sm:$0x1]  ;;  %4035 = vst [vmem:[#allocation2 + $0x134] sm:$0xf] %v4034_v42  ;;  %v3909_v9 = vor.u32 %v3908_v55, %v8564_v14  ;;  %v3522_v58 = vor.u32 %v8560_v7, %v3519_v2 }
 0x294   : > { %v3914_v27 = vor.u32 %v3913_v30, %v3911_v28  ;;  %v3525_v3 = vshrl.u32 %v3292_v15, 16  ;;  %v3787_v47 = vsel %vm7160_vm14, %v3721_v4, %v3786_v19  ;;  %v3677_v53 = vsel %vm7089_vm12, %v3514_v17, %v3676_v10  ;;  %v4037_v35 = vld [vmem:[#allocation2 + $0x14c] sm:$0xf]  ;;  %v3680_v40 = vld [vmem:[#allocation2 + $0x150] sm:$0xf] }
 0x295   : > { %v3528_v44 = vshll.u32 %v3292_v15, 16  ;;  %v3533_v39 = vshrl.u32 %v3293_v8, 16  ;;  %3788 = vst [vmem:[#allocation2 + $0x120] sm:$0x1] %v3787_v47  ;;  %3678 = vst [vmem:[#allocation2 + $0x138] sm:$0xf] %v3677_v53  ;;  %v3523_v36 = vsel %vm7076_vm11, %v3515_v43, %v3522_v58 }
 0x296   : > { %v3910_v6 = vrot.slane %v3909_v9, 4  ;;  %v3915_v57 = vrot.slane %v3914_v27, 4  ;;  %v3527_v41 = vrot.slane %v3525_v3, 7  ;;  %3679 = vst [vmem:[#allocation2 + $0x144] sm:$0xf] %v3523_v36  ;;  %v8578_v59 = vrot.slane %v3525_v3, 4 }
 0x297   : > { %v3916_v60 = vrot.slane %v3528_v44, 5  ;;  %v3535_v63 = vrot.slane %v3533_v39, 7  ;;  %v8580_v25 = vshll.u32 %v3293_v8, 16  ;;  %v3294_v21 = vld [vmem:[#allocation2 + $0x16c] sm:$0xf]  ;;  %v3921_v49 = vrot.slane %v3533_v39, 4 }
 0x298   : > { %v3912_v26 = vsel %vm7031_vm7, %v3910_v6, %v3911_v28  ;;  %v4038_v20 = vsel %vm7044_vm8, %v3915_v57, %v4037_v35  ;;  %v3530_v45 = vor.u32 %v3528_v44, %v3527_v41  ;;  %v3531_v38 = vrot.slane %v3527_v41, 4  ;;  %v3298_v33 = vld [vmem:[#allocation2 + $0x19c] sm:$0xf]  ;;  %v4041_v52 = vld [vmem:[#allocation2 + $0x164] sm:$0xf] }
 0x299   : > { %4036 = vst [vmem:[#allocation2 + $0x140] sm:$0xf] %v3912_v26  ;;  %4039 = vst [vmem:[#allocation2 + $0x14c] sm:$0xf] %v4038_v20  ;;  %v3725_v51 = vrot.slane %v8578_v59, 4  ;;  %v3917_v32 = vor.u32 %v3916_v60, %v8578_v59  ;;  %v3538_v56 = vor.u32 %v8580_v25, %v3535_v63  ;;  %v3919_v4 = vrot.slane %v8580_v25, 5 }
 0x29a   : > { %v3681_v11 = vsel %vm7089_vm12, %v3530_v45, %v3680_v40  ;;  %v3541_v37 = vshrl.u32 %v3294_v21, 16  ;;  %v3544_v61 = vshll.u32 %v3294_v21, 16  ;;  %v4110_v31 = vld [vmem:[#allocation2 + $0x134] sm:$0x8]  ;;  %v3573_v54 = vshrl.u32 %v3298_v33, 16 }
 0x29b   : > { %3682 = vst [vmem:[#allocation2 + $0x150] sm:$0xf] %v3681_v11  ;;  %v3918_v22 = vrot.slane %v3917_v32, 4  ;;  %v3539_v34 = vsel %vm7076_vm11, %v3531_v38, %v3538_v56  ;;  %v3576_v29 = vshll.u32 %v3298_v33, 16  ;;  %v4111_v46 = vsel %vm7101_vm13, %v8550_v50, %v4110_v31  ;;  %v3684_v18 = vld [vmem:[#allocation2 + $0x168] sm:$0xf] }
 0x29c   : > { %3683 = vst [vmem:[#allocation2 + $0x15c] sm:$0xf] %v3539_v34  ;;  %v3922_v10 = vor.u32 %v3921_v49, %v3919_v4  ;;  %v8597_v16 = vrot.slane %v3541_v37, 7  ;;  %v8599_v24 = vrot.slane %v3541_v37, 4  ;;  %4112 = vst [vmem:[#allocation2 + $0x134] sm:$0x8] %v4111_v46 }
 0x29d   : > { %v3789_v23 = vld [vmem:[#allocation2 + $0x138] sm:$0x1]  ;;  %v3920_v14 = vsel %vm7031_vm7, %v3918_v22, %v3919_v4  ;;  %v8603_v15 = vrot.slane %v3573_v54, 7  ;;  %v8605_v55 = vrot.slane %v3573_v54, 4  ;;  %v3924_v2 = vrot.slane %v3544_v61, 5 }
 0x29e   : > { %v3790_v50 = vsel %vm7160_vm14, %v3723_v62, %v3789_v23  ;;  %v3923_v28 = vrot.slane %v3922_v10, 4  ;;  %4040 = vst [vmem:[#allocation2 + $0x158] sm:$0xf] %v3920_v14  ;;  %v3546_v30 = vor.u32 %v3544_v61, %v8597_v16  ;;  %v3547_v8 = vrot.slane %v8597_v16, 4  ;;  %v3692_v42 = vld [vmem:[#allocation2 + $0x198] sm:$0xf] }
 0x29f   : > { %v3295_v17 = vld [vmem:[#allocation2 + $0x178] sm:$0xf]  ;;  %3791 = vst [vmem:[#allocation2 + $0x138] sm:$0x1] %v3790_v50  ;;  %v3578_v43 = vor.u32 %v3576_v29, %v8603_v15  ;;  %v3579_v19 = vrot.slane %v8603_v15, 4  ;;  %v3727_v9 = vrot.slane %v8599_v24, 4  ;;  %v3925_v53 = vor.u32 %v3924_v2, %v8599_v24 }
 0x2a0   : > { %v3731_v58 = vrot.slane %v8605_v55, 4  ;;  %v3299_v27 = vld [vmem:[#allocation2 + $0x1a8] sm:$0xf]  ;;  %v4113_v3 = vld [vmem:[#allocation2 + $0x14c] sm:$0x8]  ;;  %v4042_v62 = vsel %vm7044_vm8, %v3923_v28, %v4041_v52  ;;  %v3685_v47 = vsel %vm7089_vm12, %v3546_v30, %v3684_v18  ;;  %v3940_v35 = vrot.slane %v3576_v29, 5 }
 0x2a1   : > { %v4114_v44 = vsel %vm7101_vm13, %v8560_v7, %v4113_v3  ;;  %4043 = vst [vmem:[#allocation2 + $0x164] sm:$0xf] %v4042_v62  ;;  %3686 = vst [vmem:[#allocation2 + $0x168] sm:$0xf] %v3685_v47  ;;  %v3693_v39 = vsel %vm7089_vm12, %v3578_v43, %v3692_v42  ;;  %v3549_v6 = vshrl.u32 %v3295_v17, 16  ;;  %v8625_v36 = vshll.u32 %v3295_v17, 16 }
 0x2a2   : > { %v3296_v57 = vld [vmem:[#allocation2 + $0x184] sm:$0xf]  ;;  %4115 = vst [vmem:[#allocation2 + $0x14c] sm:$0x8] %v4114_v44  ;;  %v3792_v41 = vld [vmem:[#allocation2 + $0x150] sm:$0x1]  ;;  %v3941_v59 = vor.u32 %v3940_v35, %v8605_v55 }
 0x2a3   : > { %3694 = vst [vmem:[#allocation2 + $0x198] sm:$0xf] %v3693_v39  ;;  %v3926_v40 = vrot.slane %v3925_v53, 4  ;;  %v3581_v60 = vshrl.u32 %v3299_v27, 16  ;;  %v8628_v63 = vshll.u32 %v3299_v27, 16  ;;  %v3793_v7 = vsel %vm7160_vm14, %v3725_v51, %v3792_v41 }
 0x2a4   : > { %v3551_v21 = vrot.slane %v3549_v6, 7  ;;  %v3927_v26 = vrot.slane %v8625_v36, 5  ;;  %v3929_v20 = vrot.slane %v3549_v6, 4  ;;  %3794 = vst [vmem:[#allocation2 + $0x150] sm:$0x1] %v3793_v7  ;;  %v3942_v45 = vrot.slane %v3941_v59, 4 }
 0x2a5   : > { %v3583_v38 = vrot.slane %v3581_v60, 7  ;;  %v3943_v33 = vrot.slane %v8628_v63, 5  ;;  %v3945_v32 = vrot.slane %v3581_v60, 4  ;;  %v4045_v49 = vld [vmem:[#allocation2 + $0x17c] sm:$0xf]  ;;  %v3557_v37 = vshrl.u32 %v3296_v57, 16 }
 0x2a6   : > { %v3554_v56 = vor.u32 %v8625_v36, %v3551_v21  ;;  %v3928_v4 = vsel %vm7031_vm7, %v3926_v40, %v3927_v26  ;;  %v3930_v11 = vor.u32 %v3929_v20, %v3927_v26  ;;  %v4053_v22 = vld [vmem:[#allocation2 + $0x1ac] sm:$0xf]  ;;  %v3560_v34 = vshll.u32 %v3296_v57, 16  ;;  %v3688_v54 = vld [vmem:[#allocation2 + $0x180] sm:$0xf] }
 0x2a7   : > { %v3586_v51 = vor.u32 %v8628_v63, %v3583_v38  ;;  %v3944_v61 = vsel %vm7031_vm7, %v3942_v45, %v3943_v33  ;;  %v3946_v31 = vor.u32 %v3945_v32, %v3943_v33  ;;  %4044 = vst [vmem:[#allocation2 + $0x170] sm:$0xf] %v3928_v4  ;;  %v3559_v10 = vrot.slane %v3557_v37, 7  ;;  %v3297_v16 = vld [vmem:[#allocation2 + $0x190] sm:$0xf] }
 0x2a8   : > { %v3555_v29 = vsel %vm7076_vm11, %v3547_v8, %v3554_v56  ;;  %v3931_v46 = vrot.slane %v3930_v11, 4  ;;  %4052 = vst [vmem:[#allocation2 + $0x1a0] sm:$0xf] %v3944_v61  ;;  %v3728_v52 = vrot.slane %v3557_v37, 4  ;;  %v4116_v18 = vld [vmem:[#allocation2 + $0x164] sm:$0x8] }
 0x2a9   : > { %v3795_v24 = vld [vmem:[#allocation2 + $0x168] sm:$0x1]  ;;  %v3587_v23 = vsel %vm7076_vm11, %v3579_v19, %v3586_v51  ;;  %3687 = vst [vmem:[#allocation2 + $0x174] sm:$0xf] %v3555_v29  ;;  %v3947_v14 = vrot.slane %v3946_v31, 4  ;;  %v3932_v15 = vrot.slane %v3560_v34, 5  ;;  %v4117_v2 = vsel %vm7101_vm13, %v8580_v25, %v4116_v18 }
 0x2aa   : > { %v3796_v50 = vsel %vm7160_vm14, %v3727_v9, %v3795_v24  ;;  %v3801_v28 = vld [vmem:[#allocation2 + $0x198] sm:$0x1]  ;;  %3695 = vst [vmem:[#allocation2 + $0x1a4] sm:$0xf] %v3587_v23  ;;  %v4046_v30 = vsel %vm7044_vm8, %v3931_v46, %v4045_v49  ;;  %v3562_v8 = vor.u32 %v3560_v34, %v3559_v10  ;;  %4118 = vst [vmem:[#allocation2 + $0x164] sm:$0x8] %v4117_v2 }
 0x2ab   : > { %3797 = vst [vmem:[#allocation2 + $0x168] sm:$0x1] %v3796_v50  ;;  %v3802_v42 = vsel %vm7160_vm14, %v3731_v58, %v3801_v28  ;;  %4047 = vst [vmem:[#allocation2 + $0x17c] sm:$0xf] %v4046_v30  ;;  %v4054_v25 = vsel %vm7044_vm8, %v3947_v14, %v4053_v22  ;;  %v3933_v43 = vor.u32 %v3932_v15, %v3728_v52  ;;  %v3565_v19 = vshrl.u32 %v3297_v16, 16 }
 0x2ac   : > { %3803 = vst [vmem:[#allocation2 + $0x198] sm:$0x1] %v3802_v42  ;;  %4055 = vst [vmem:[#allocation2 + $0x1ac] sm:$0xf] %v4054_v25  ;;  %v3689_v17 = vsel %vm7089_vm12, %v3562_v8, %v3688_v54  ;;  %v3568_v9 = vshll.u32 %v3297_v16, 16  ;;  %v3563_v47 = vrot.slane %v3559_v10, 4 }
 0x2ad   : > { %3690 = vst [vmem:[#allocation2 + $0x180] sm:$0xf] %v3689_v17  ;;  %v3934_v27 = vrot.slane %v3933_v43, 4  ;;  %v3567_v3 = vrot.slane %v3565_v19, 7  ;;  %v3937_v55 = vrot.slane %v3565_v19, 4  ;;  %v3729_v40 = vrot.slane %v3728_v52, 4 }
 0x2ae   : > { %v3935_v62 = vrot.slane %v3568_v9, 5  ;;  %v4049_v44 = vld [vmem:[#allocation2 + $0x194] sm:$0xf] }
 0x2af   : > { %v3570_v53 = vor.u32 %v3568_v9, %v3567_v3 }
 0x2b0   : > { %v3936_v58 = vsel %vm7031_vm7, %v3934_v27, %v3935_v62  ;;  %v3938_v35 = vor.u32 %v3937_v55, %v3935_v62 }
 0x2b1   : > { %4048 = vst [vmem:[#allocation2 + $0x188] sm:$0xf] %v3936_v58  ;;  %v3571_v0 = vsel %vm7076_vm11, %v3563_v47, %v3570_v53 }
 0x2b2   : > { %v4119_v39 = vld [vmem:[#allocation2 + $0x17c] sm:$0x8]  ;;  %v3939_v6 = vrot.slane %v3938_v35, 4  ;;  %3691 = vst [vmem:[#allocation2 + $0x18c] sm:$0xf] %v3571_v0 }
 0x2b3   : > { %v4120_v57 = vsel %vm7101_vm13, %v8625_v36, %v4119_v39  ;;  %v4125_v41 = vld [vmem:[#allocation2 + $0x1ac] sm:$0x8] }
 0x2b4   : > { %4121 = vst [vmem:[#allocation2 + $0x17c] sm:$0x8] %v4120_v57  ;;  %v4126_v5 = vsel %vm7101_vm13, %v8628_v63, %v4125_v41  ;;  %v3798_v59 = vld [vmem:[#allocation2 + $0x180] sm:$0x1]  ;;  %v4050_v60 = vsel %vm7044_vm8, %v3939_v6, %v4049_v44 }
 0x2b5   : > { %4127 = vst [vmem:[#allocation2 + $0x1ac] sm:$0x8] %v4126_v5  ;;  %v3799_v48 = vsel %vm7160_vm14, %v3729_v40, %v3798_v59  ;;  %4051 = vst [vmem:[#allocation2 + $0x194] sm:$0xf] %v4050_v60 }
 0x2b6   : > { %3800 = vst [vmem:[#allocation2 + $0x180] sm:$0x1] %v3799_v48 }
 0x2bc   : > { %v4122_v7 = vld [vmem:[#allocation2 + $0x194] sm:$0x8] }
 0x2bd   : > { %v4123_v36 = vsel %vm7101_vm13, %v3568_v9, %v4122_v7 }
 0x2be   : > { %4124 = vst [vmem:[#allocation2 + $0x194] sm:$0x8] %v4123_v36 }
 0x2bf PF: > { %v6428_v21 = vld [vmem:[#allocation8 + $0xac] ss:$12 sps:$4 sm:$0xff]   ;;  %v6778_v20 = vmov 0   ;;  %v6432_v12 = vld [vmem:[#allocation8 + $0xa8] ss:$12 sps:$4 sm:$0xff]   ;;  %s5897_s12 = smul.u32 192, %s6752_s24 }
 0x2c0   : > { %v6430_v26 = vld [vmem:[#allocation8 + $0x22c] ss:$12 sps:$4 sm:$0xff]   ;;  %4969 = vmatprep.mubr.bf16.mxu1 %v6778_v20  ;;  %4812 = vmatprep.subr.bf16.mxu0 %v6428_v21  ;;  %v6433_v63 = vld [vmem:[#allocation8 + $0x228] ss:$12 sps:$4 sm:$0xff]   ;;  %v6438_v38 = vld [vmem:[#allocation8 + $0x90] ss:$12 sps:$4 sm:$0xff]  }
 0x2c1   : > { %4937 = vmatprep.subr.bf16.mxu1 %v6430_v26  ;;  %v6434_v45 = vld [vmem:[#allocation8 + $0x94] ss:$12 sps:$4 sm:$0xff]   ;;  %4813 = vmatpush1.bf16.msra.mxu0 %v6432_v12  ;;  %v6439_v33 = vld [vmem:[#allocation8 + $0x210] ss:$12 sps:$4 sm:$0xff]   ;;  %v6444_v56 = vld [vmem:[#allocation8 + $0x78] ss:$12 sps:$4 sm:$0xff]  }
 0x2c2   : > { %4938 = vmatpush1.bf16.msra.mxu1 %v6433_v63  ;;  %v6436_v1 = vld [vmem:[#allocation8 + $0x214] ss:$12 sps:$4 sm:$0xff]   ;;  %4814 = vmatprep.subr.bf16.mxu0 %v6434_v45  ;;  %v6440_v13 = vld [vmem:[#allocation8 + $0x7c] ss:$12 sps:$4 sm:$0xff]   ;;  %v6445_v4 = vld [vmem:[#allocation8 + $0x1f8] ss:$12 sps:$4 sm:$0xff]  }
 0x2c3   : > { %4939 = vmatprep.subr.bf16.mxu1 %v6436_v1  ;;  %v6442_v32 = vld [vmem:[#allocation8 + $0x1fc] ss:$12 sps:$4 sm:$0xff]   ;;  %v6446_v11 = vld [vmem:[#allocation8 + $0x64] ss:$12 sps:$4 sm:$0xff]   ;;  %v6450_v37 = vld [vmem:[#allocation8 + $0x60] ss:$12 sps:$4 sm:$0xff]  }
 0x2c4   : > { %v6448_v49 = vld [vmem:[#allocation8 + $0x1e4] ss:$12 sps:$4 sm:$0xff]   ;;  %v6451_v51 = vld [vmem:[#allocation8 + $0x1e0] ss:$12 sps:$4 sm:$0xff]   ;;  %v6456_v22 = vld [vmem:[#allocation8 + $0x48] ss:$12 sps:$4 sm:$0xff]  }
 0x2c5   : > { %4815 = vmatpush1.bf16.msra.mxu0 %v6438_v38  ;;  %v6452_v61 = vld [vmem:[#allocation8 + $0x4c] ss:$12 sps:$4 sm:$0xff]   ;;  %v6457_v34 = vld [vmem:[#allocation8 + $0x1c8] ss:$12 sps:$4 sm:$0xff]   ;;  %v6462_v46 = vld [vmem:[#allocation8 + $0x30] ss:$12 sps:$4 sm:$0xff]  }
 0x2c6   : > { %4940 = vmatpush1.bf16.msra.mxu1 %v6439_v33  ;;  %4816 = vmatprep.subr.bf16.mxu0 %v6440_v13  ;;  %v6454_v31 = vld [vmem:[#allocation8 + $0x1cc] ss:$12 sps:$4 sm:$0xff]   ;;  %v6458_v54 = vld [vmem:[#allocation8 + $0x34] ss:$12 sps:$4 sm:$0xff]   ;;  %v6463_v10 = vld [vmem:[#allocation8 + $0x1b0] ss:$12 sps:$4 sm:$0xff]  }
 0x2c7   : > { %4941 = vmatprep.subr.bf16.mxu1 %v6442_v32  ;;  %v6460_v29 = vld [vmem:[#allocation8 + $0x1b4] ss:$12 sps:$4 sm:$0xff]   ;;  %v6464_v52 = vld [vmem:[#allocation8 + $0x1c] ss:$12 sps:$4 sm:$0xff]   ;;  %s8677_s1 = scalar_lea.vmem [#allocation2], %s5897_s12  ;;  %s5898_s3 = sshll.u32 %s6752_s24, 7 }
 0x2c8   : > { %v6466_v16 = vld [vmem:[#allocation8 + $0x19c] ss:$12 sps:$4 sm:$0xff]   ;;  %v6468_v18 = vld [vmem:[#allocation8 + $0x18] ss:$12 sps:$4 sm:$0xff]   ;;  %v6474_v15 = vld [vmem:[#allocation8] ss:$12 sps:$4 sm:$0xff]   ;;  %s8796_s13 = scalar_lea.vmem %s6971_s15, %s5898_s3 [#allocation3] }
 0x2c9   : > { %4817 = vmatpush1.bf16.msra.mxu0 %v6444_v56  ;;  %v6469_v24 = vld [vmem:[#allocation8 + $0x198] ss:$12 sps:$4 sm:$0xff]   ;;  %v6475_v2 = vld [vmem:[#allocation8 + $0x180] ss:$12 sps:$4 sm:$0xff]   ;;  %v6479_v28 = vld [vmem:[#allocation8 + $0x170] ss:$12 sps:$4 sm:$0xff]  }
 0x2ca   : > { %4942 = vmatpush1.bf16.msra.mxu1 %v6445_v4  ;;  %4818 = vmatprep.subr.bf16.mxu0 %v6446_v11  ;;  %v6470_v23 = vld [vmem:[#allocation8 + $0x4] ss:$12 sps:$4 sm:$0xff]   ;;  %v6476_v50 = vld [vmem:[#allocation8 + $0x16c] ss:$12 sps:$4 sm:$0xff]   ;;  %v6480_v8 = vld [vmem:[#allocation8 + $0x168] ss:$12 sps:$4 sm:$0xff]  }
 0x2cb   : > { %4943 = vmatprep.subr.bf16.mxu1 %v6448_v49  ;;  %v6472_v14 = vld [vmem:[#allocation8 + $0x184] ss:$12 sps:$4 sm:$0xff]   ;;  %v6482_v25 = vld [vmem:[#allocation8 + $0x154] ss:$12 sps:$4 sm:$0xff]   ;;  %v6485_v19 = vld [vmem:[#allocation8 + $0x13c] ss:$12 sps:$4 sm:$0xff]  }
 0x2cc   : > { %v8680_v30 = vld [vmem:[%s8677_s1 + $0x8] ss:$12 sps:$4 sm:$0xff]   ;;  %v6481_v42 = vld [vmem:[#allocation8 + $0xb0] ss:$12 sps:$4 sm:$0xff]   ;;  %v6500_v27 = vld [vmem:[#allocation8 + $0x140] ss:$12 sps:$4 sm:$0xff]  }
 0x2cd   : > { %4819 = vmatpush1.bf16.msra.mxu0 %v6450_v37  ;;  %v6484_v17 = vld [vmem:[#allocation8 + $0x150] ss:$12 sps:$4 sm:$0xff]   ;;  %v6489_v43 = vld [vmem:[#allocation8 + $0x158] ss:$12 sps:$4 sm:$0xff]   ;;  %v6502_v47 = vld [vmem:[#allocation8 + $0x80] ss:$12 sps:$4 sm:$0xff]  }
 0x2ce   : > { %4944 = vmatpush1.bf16.msra.mxu1 %v6451_v51  ;;  %4820 = vmatprep.subr.bf16.mxu0 %v6452_v61  ;;  %v6490_v9 = vld [vmem:[#allocation8 + $0x98] ss:$12 sps:$4 sm:$0xff]   ;;  %v8685_v3 = vld [vmem:[%s8677_s1 + $0x20] ss:$12 sps:$4 sm:$0xff]   ;;  %v6493_v53 = vld [vmem:[#allocation8 + $0x120] ss:$12 sps:$4 sm:$0xff]  }
 0x2cf   : > { %4945 = vmatprep.subr.bf16.mxu1 %v6454_v31  ;;  %v6488_v62 = vld [vmem:[#allocation8 + $0x138] ss:$12 sps:$4 sm:$0xff]   ;;  %v6510_v58 = vld [vmem:[#allocation8 + $0x128] ss:$12 sps:$4 sm:$0xff]   ;;  %v6520_v41 = vld [vmem:[#allocation8 + $0x110] ss:$12 sps:$4 sm:$0xff]  }
 0x2d0   : > { %v6491_v55 = vld [vmem:[#allocation8 + $0x124] ss:$12 sps:$4 sm:$0xff]   ;;  %v6494_v35 = vld [vmem:[#allocation8 + $0x10c] ss:$12 sps:$4 sm:$0xff]   ;;  %v8690_v44 = vld [vmem:[%s8677_s1 + $0x4] ss:$12 sps:$4 sm:$0xff]  }
 0x2d1   : > { %4821 = vmatpush1.bf16.msra.mxu0 %v6456_v22  ;;  %v6514_v39 = vld [vmem:[#allocation8 + $0x68] ss:$12 sps:$4 sm:$0xff]   ;;  %4844 = vmatprep.mubr.bf16.mxu0 %v8690_v44  ;;  %v6521_v40 = vld [vmem:[#allocation8 + $0x50] ss:$12 sps:$4 sm:$0xff]   ;;  %v8699_v60 = vld [vmem:[%s8677_s1 + $0x50] ss:$12 sps:$4 sm:$0xff]  }
 0x2d2   : > { %4946 = vmatpush1.bf16.msra.mxu1 %v6457_v34  ;;  %4822 = vmatprep.subr.bf16.mxu0 %v6458_v54  ;;  %v8694_v0 = vld [vmem:[%s8677_s1 + $0x38] ss:$12 sps:$4 sm:$0xff]   ;;  %v6501_v5 = vld [vmem:[#allocation8 + $0xf0] ss:$12 sps:$4 sm:$0xff]   ;;  %v6527_v48 = vld [vmem:[#allocation8 + $0xf8] ss:$12 sps:$4 sm:$0xff]  }
 0x2d3   : > { %4947 = vmatprep.subr.bf16.mxu1 %v6460_v29  ;;  %v6497_v6 = vld [vmem:[#allocation8 + $0x108] ss:$12 sps:$4 sm:$0xff]   ;;  %v6528_v7 = vld [vmem:[#allocation8 + $0x38] ss:$12 sps:$4 sm:$0xff]   ;;  %v6509_v26 = vld [vmem:[#allocation8 + $0xc0] ss:$12 sps:$4 sm:$0xff]  }
 0x2d4   : > { %v6498_v57 = vld [vmem:[#allocation8 + $0xf4] ss:$12 sps:$4 sm:$0xff]   ;;  %v6503_v59 = vld [vmem:[#allocation8 + $0xdc] ss:$12 sps:$4 sm:$0xff]   ;;  %v6506_v36 = vld [vmem:[#allocation8 + $0xd8] ss:$12 sps:$4 sm:$0xff]  }
 0x2d5   : > { %4823 = vmatpush1.bf16.msra.mxu0 %v6462_v46  ;;  %v6507_v21 = vld [vmem:[#allocation8 + $0xc4] ss:$12 sps:$4 sm:$0xff]   ;;  %v6534_v63 = vld [vmem:[#allocation8 + $0xe0] ss:$12 sps:$4 sm:$0xff]   ;;  %v6541_v13 = vld [vmem:[#allocation8 + $0xc8] ss:$12 sps:$4 sm:$0xff]  }
 0x2d6   : > { %4948 = vmatpush1.bf16.msra.mxu1 %v6463_v10  ;;  %4824 = vmatprep.subr.bf16.mxu0 %v6464_v52  ;;  %v6522_v12 = vld [vmem:[#allocation8 + $0x230] ss:$12 sps:$4 sm:$0xff]   ;;  %v6535_v45 = vld [vmem:[#allocation8 + $0x20] ss:$12 sps:$4 sm:$0xff]   ;;  %v8707_v38 = vld [vmem:[%s8677_s1 + $0x68] ss:$12 sps:$4 sm:$0xff]  }
 0x2d7   : > { %4949 = vmatprep.subr.bf16.mxu1 %v6466_v16  ;;  %v8704_v1 = vld [vmem:[%s8677_s1] ss:$12 sps:$4 sm:$0xff]   ;;  %v8710_v33 = vld [vmem:[%s8677_s1 + $0x1c] ss:$12 sps:$4 sm:$0xff]   ;;  %v6544_v56 = vld [vmem:[#allocation8 + $0x8] ss:$12 sps:$4 sm:$0xff]  }
 0x2d8   : > { %v6529_v32 = vld [vmem:[#allocation8 + $0x218] ss:$12 sps:$4 sm:$0xff]   ;;  %v8717_v4 = vld [vmem:[%s8677_s1 + $0x18] ss:$12 sps:$4 sm:$0xff]   ;;  %v6536_v11 = vld [vmem:[#allocation8 + $0x200] ss:$12 sps:$4 sm:$0xff]  }
 0x2d9   : > { %4825 = vmatpush1.bf16.msra.mxu0 %v6468_v18  ;;  %v8720_v49 = vld [vmem:[%s8677_s1 + $0x80] ss:$12 sps:$4 sm:$0xff]   ;;  %v6547_v51 = vld [vmem:[#allocation8 + $0x1e8] ss:$12 sps:$4 sm:$0xff]   ;;  %v6525_v31 = vld [vmem:[%s8677_s1 + $0x30] ss:$12 sps:$4 sm:$0xff]  }
 0x2da   : > { %4950 = vmatpush1.bf16.msra.mxu1 %v6469_v24  ;;  %4826 = vmatprep.subr.bf16.mxu0 %v6470_v23  ;;  %v6523_v37 = vld [vmem:[%s8677_s1 + $0x34] ss:$12 sps:$4 sm:$0xff]   ;;  %v8728_v22 = vld [vmem:[%s8677_s1 + $0x98] ss:$12 sps:$4 sm:$0xff]   ;;  %v6559_v29 = vld [vmem:[#allocation8 + $0x1a0] ss:$12 sps:$4 sm:$0xff]  }
 0x2db   : > { %4951 = vmatprep.subr.bf16.mxu1 %v6472_v14  ;;  %v6551_v61 = vld [vmem:[#allocation8 + $0x1d0] ss:$12 sps:$4 sm:$0xff]   ;;  %v6555_v54 = vld [vmem:[#allocation8 + $0x1b8] ss:$12 sps:$4 sm:$0xff]   ;;  %v6533_v10 = vld [vmem:[%s8677_s1 + $0xb0] ss:$12 sps:$4 sm:$0xff]  }
 0x2dc   : > { %v6530_v34 = vld [vmem:[%s8677_s1 + $0x4c] ss:$12 sps:$4 sm:$0xff]   ;;  %v6532_v46 = vld [vmem:[%s8677_s1 + $0x48] ss:$12 sps:$4 sm:$0xff]   ;;  %v6537_v52 = vld [vmem:[%s8677_s1 + $0x64] ss:$12 sps:$4 sm:$0xff]  }
 0x2dd   : > { %4827 = vmatpush1.bf16.msra.mxu0 %v6474_v15  ;;  %v6563_v16 = vld [vmem:[#allocation8 + $0x188] ss:$12 sps:$4 sm:$0xff]   ;;  %v6539_v18 = vld [vmem:[%s8677_s1 + $0x60] ss:$12 sps:$4 sm:$0xff]   ;;  %v6540_v24 = vld [vmem:[%s8677_s1 + $0xc8] ss:$12 sps:$4 sm:$0xff]  }
 0x2de   : > { %4952 = vmatpush1.bf16.msra.mxu1 %v6475_v2  ;;  %4828 = vmatprep.subr.bf16.mxu0 %v6476_v50  ;;  %v6542_v23 = vld [vmem:[%s8677_s1 + $0x7c] ss:$12 sps:$4 sm:$0xff]   ;;  %v6545_v14 = vld [vmem:[%s8677_s1 + $0x78] ss:$12 sps:$4 sm:$0xff]   ;;  %v6546_v15 = vld [vmem:[%s8677_s1 + $0xe0] ss:$12 sps:$4 sm:$0xff]  }
 0x2df   : > { %5926 = vmatprep.subr.bf16.mxu1 %v6479_v28  ;;  %v6548_v2 = vld [vmem:[%s8677_s1 + $0x94] ss:$12 sps:$4 sm:$0xff]   ;;  %v6550_v50 = vld [vmem:[%s8677_s1 + $0x90] ss:$12 sps:$4 sm:$0xff]   ;;  %v6552_v28 = vld [vmem:[%s8677_s1 + $0xac] ss:$12 sps:$4 sm:$0xff]  }
 0x2e0   : > { %s9027_s7 = sld [smem:[#allocation14_spill]]  ;;  %s5899_s16 = sshll.u32 %s6752_s24, 4 }
 0x2e1   : > { %4970 = vmatmul.mubr.bf16.vlgmr.msra.gmra.mxu1 %v8680_v30  ;;  %4829 = vmatpush2.bf16.msra.mxu0 %v6480_v8  ;;  %v6556_v8 = vld [vmem:[%s8677_s1 + $0xc4] ss:$12 sps:$4 sm:$0xff]   ;;  %s9028_s15 = sld [smem:[#allocation16_spill]]  ;;  %s5402_s9 = sshll.u32 %s6984_s10, 4  ;;  %s8874_s9 = int_to_ptr.vmem [resolvable:$true] %s5402_s9 }
 0x2e2   : > { %5927 = vmatpush3.bf16.msra.mxu1 %v6481_v42  ;;  %4830 = vmatprep.subr.bf16.mxu0 %v6482_v25  ;;  %v6558_v42 = vld [vmem:[%s8677_s1 + $0xc0] ss:$12 sps:$4 sm:$0xff]   ;;  %v6560_v25 = vld [vmem:[%s8677_s1 + $0xdc] ss:$12 sps:$4 sm:$0xff]   ;;  %s9029_s11 = sld [smem:[#allocation31_spill]]  ;;  %s8879_s12 = scalar_lea.sflag [#allocation5], %s283_s25 }
 0x2e3   : > { %4977 = vmatprep.mubr.bf16.mxu1 %v6778_v20  ;;  %5928 = vmatprep.subr.bf16.mxu1 %v6489_v43  ;;  %s6779_s3 = smov [#allocation9]  }
 0x2e5   : > { %4831 = vmatpush2.bf16.msra.mxu0 %v6484_v17  ;;  %v6562_v17 = vld [vmem:[%s8677_s1 + $0xd8] ss:$12 sps:$4 sm:$0xff]  }
 0x2e6   : > { %5929 = vmatpush3.bf16.msra.mxu1 %v6490_v9  ;;  %4832 = vmatprep.subr.bf16.mxu0 %v6485_v19  ;;  %s5828_s21 = sshll.u32 %s9027_s7, 5 }
 0x2e7   : > { %5930 = vmatprep.subr.bf16.mxu1 %v6500_v27  ;;  %s5399_s29 = sadd.s32 %s5899_s16, %s5828_s21  ;;  %p9030_p10 = scmp.ne.s32.totalorder %s9028_s15, 0 }
 0x2e8   : > { %s5829_s24 = sshll.u32 %s5399_s29, 7 }
 0x2e9   : > { %4978 = vmatmul.mubr.bf16.gmra.mxu1 %v8685_v3  ;;  %4833 = vmatpush2.bf16.msra.mxu0 %v6488_v62  ;;  %s8872_s17 = scalar_lea.hbm %s9029_s11, %s5829_s24 }
 0x2ea   : > { %4987 = vmatprep.mubr.bf16.mxu1 %v6778_v20  ;;  %4834 = vmatprep.subr.bf16.mxu0 %v6491_v55 }
 0x2eb   : > { %5931 = vmatpush3.bf16.msra.mxu1 %v6502_v47 }
 0x2ec   : > { %5932 = vmatprep.subr.bf16.mxu1 %v6510_v58 }
 0x2ed   : > { %4835 = vmatpush2.bf16.msra.mxu0 %v6493_v53 }
 0x2ee   : > { %4836 = vmatprep.subr.bf16.mxu0 %v6494_v35 }
 0x2ef   : > { %5933 = vmatpush3.bf16.msra.mxu1 %v6514_v39 }
 0x2f0   : > { %5934 = vmatprep.subr.bf16.mxu1 %v6520_v41 }
 0x2f1   : > { %4988 = vmatmul.mubr.bf16.gmra.mxu1 %v8694_v0  ;;  %4837 = vmatpush2.bf16.msra.mxu0 %v6497_v6 }
 0x2f2   : > { %4997 = vmatprep.mubr.bf16.mxu1 %v6778_v20  ;;  %4838 = vmatprep.subr.bf16.mxu0 %v6498_v57 }
 0x2f3   : > { %5935 = vmatpush3.bf16.msra.mxu1 %v6521_v40 }
 0x2f4   : > { %5936 = vmatprep.subr.bf16.mxu1 %v6527_v48 }
 0x2f5   : > { %4839 = vmatpush2.bf16.msra.mxu0 %v6501_v5 }
 0x2f6   : > { %4840 = vmatprep.subr.bf16.mxu0 %v6503_v59 }
 0x2f7   : > { %5937 = vmatpush3.bf16.msra.mxu1 %v6528_v7 }
 0x2f8   : > { %5938 = vmatprep.subr.bf16.mxu1 %v6534_v63 }
 0x2f9   : > { %4998 = vmatmul.mubr.bf16.gmra.mxu1 %v8699_v60  ;;  %4841 = vmatpush2.bf16.msra.mxu0 %v6506_v36 }
 0x2fa   : > { %5007 = vmatprep.mubr.bf16.mxu1 %v6778_v20  ;;  %4842 = vmatprep.subr.bf16.mxu0 %v6507_v21 }
 0x2fb   : > { %5939 = vmatpush3.bf16.msra.mxu1 %v6535_v45 }
 0x2fc   : > { %5940 = vmatprep.subr.bf16.mxu1 %v6541_v13 }
 0x2fd   : > { %4843 = vmatpush2.bf16.msra.mxu0 %v6509_v26 }
 0x2fe   : > { %6072 = vmatprep.subr.bf16.mxu0 %v6522_v12 }
 0x2ff   : > { %5941 = vmatpush3.bf16.msra.mxu1 %v6544_v56 }
 0x300   : > { %4845 = vmatmul.mubr.bf16.vlgmr.msra.gmra.mxu0 %v8704_v1 }
 0x301   : > { %5008 = vmatmul.mubr.bf16.gmra.mxu1 %v8707_v38  ;;  %4852 = vmatprep.mubr.bf16.mxu0 %v8710_v33 }
 0x302   : > { %5017 = vmatprep.mubr.bf16.mxu1 %v6778_v20  ;;  %6073 = vmatpush3.bf16.msra.mxu0 %v6522_v12 }
 0x303   : > { %6074 = vmatprep.subr.bf16.mxu0 %v6529_v32 }
 0x306   : > { %6075 = vmatpush3.bf16.msra.mxu0 %v6529_v32 }
 0x307   : > { %6076 = vmatprep.subr.bf16.mxu0 %v6536_v11 }
 0x308   : > { %4853 = vmatmul.mubr.bf16.gmra.mxu0 %v8717_v4 }
 0x309   : > { %5018 = vmatmul.mubr.bf16.gmra.mxu1 %v8720_v49  ;;  %4862 = vmatprep.mubr.bf16.mxu0 %v6523_v37 }
 0x30a   : > { %5027 = vmatprep.mubr.bf16.mxu1 %v6778_v20  ;;  %6077 = vmatpush3.bf16.msra.mxu0 %v6536_v11 }
 0x30b   : > { %6078 = vmatprep.subr.bf16.mxu0 %v6547_v51 }
 0x30e   : > { %6079 = vmatpush3.bf16.msra.mxu0 %v6547_v51 }
 0x30f   : > { %6080 = vmatprep.subr.bf16.mxu0 %v6551_v61 }
 0x310   : > { %4863 = vmatmul.mubr.bf16.gmra.mxu0 %v6525_v31 }
 0x311   : > { %5028 = vmatmul.mubr.bf16.gmra.mxu1 %v8728_v22  ;;  %4872 = vmatprep.mubr.bf16.mxu0 %v6530_v34 }
 0x312   : > { %5037 = vmatprep.mubr.bf16.mxu1 %v6778_v20  ;;  %6081 = vmatpush3.bf16.msra.mxu0 %v6551_v61 }
 0x313   : > { %6082 = vmatprep.subr.bf16.mxu0 %v6555_v54 }
 0x316   : > { %6083 = vmatpush3.bf16.msra.mxu0 %v6555_v54 }
 0x317   : > { %6084 = vmatprep.subr.bf16.mxu0 %v6559_v29 }
 0x318   : > { %4873 = vmatmul.mubr.bf16.gmra.mxu0 %v6532_v46 }
 0x319   : > { %5038 = vmatmul.mubr.bf16.gmra.mxu1 %v6533_v10  ;;  %4882 = vmatprep.mubr.bf16.mxu0 %v6537_v52 }
 0x31a   : > { %5047 = vmatprep.mubr.bf16.mxu1 %v6778_v20  ;;  %6085 = vmatpush3.bf16.msra.mxu0 %v6559_v29 }
 0x31b   : > { %6086 = vmatprep.subr.bf16.mxu0 %v6563_v16 }
 0x31e   : > { %6087 = vmatpush3.bf16.msra.mxu0 %v6563_v16 }
 0x320   : > { %4883 = vmatmul.mubr.bf16.gmra.mxu0 %v6539_v18 }
 0x321   : > { %5048 = vmatmul.mubr.bf16.gmra.mxu1 %v6540_v24  ;;  %4892 = vmatprep.mubr.bf16.mxu0 %v6542_v23 }
 0x322   : > { %5055 = vmatprep.mubr.bf16.mxu1 %v6778_v20  ;;  %v6554_v20 = vld [vmem:[%s8677_s1 + $0xa8] ss:$12 sps:$4 sm:$0xff]   ;;  %s6644_s1 = scalar_lea.vmem %s8874_s9, 2048 }
 0x323   : > { %p6645_p3 = scmp.ne.s32.totalorder %s8874_s9, %s6644_s1 }
 0x325   : > { %p6646_p12 = pnand %p6645_p3, %p9030_p10 }
 0x327   : > { %p6647_p2 = pneg %p6646_p12 }
 0x328   : > { %4893 = vmatmul.mubr.bf16.gmra.mxu0 %v6545_v14 }
 0x329   : > { %5056 = vmatmul.mubr.bf16.gmra.mxu1 %v6546_v15  ;;  %4902 = vmatprep.mubr.bf16.mxu0 %v6548_v2 }
 0x32a   : > { %5094 = vmatprep.mubr.bf16.mxu1 %v8690_v44 }
 0x330   : > { %4903 = vmatmul.mubr.bf16.gmra.mxu0 %v6550_v50 }
 0x331   : > { %5095 = vmatmul.mubr.bf16.vlgmr.msra.gmra.mxu1 %v8704_v1  ;;  %4912 = vmatprep.mubr.bf16.mxu0 %v6552_v28 }
 0x332   : > { %5100 = vmatprep.mubr.bf16.mxu1 %v8710_v33 }
 0x338   : > { %4913 = vmatmul.mubr.bf16.gmra.mxu0 %v6554_v20 }
 0x339   : > { %5101 = vmatmul.mubr.bf16.gmra.mxu1 %v8717_v4  ;;  %4922 = vmatprep.mubr.bf16.mxu0 %v6556_v8 }
 0x33a   : > { %5106 = vmatprep.mubr.bf16.mxu1 %v6523_v37 }
 0x340   : > { %4923 = vmatmul.mubr.bf16.gmra.mxu0 %v6558_v42 }
 0x341   : > { %5107 = vmatmul.mubr.bf16.gmra.mxu1 %v6525_v31  ;;  %4930 = vmatprep.mubr.bf16.mxu0 %v6560_v25 }
 0x342   : > { %5114 = vmatprep.mubr.bf16.mxu1 %v6530_v34 }
 0x348   : > { %4931 = vmatmul.mubr.bf16.gmra.mxu0 %v6562_v17 }
 0x349   : > { %5115 = vmatmul.mubr.bf16.gmra.mxu1 %v6532_v46  ;;  %6088 = vmatprep.mubr.bf16.mxu0 %v8680_v30 }
 0x34a   : > { %5122 = vmatprep.mubr.bf16.mxu1 %v6537_v52 }
 0x350   : > { %6089 = vmatmul.mubr.bf16.vlgmr.msra.gmra.mxu0 %v8685_v3 }
 0x351   : > { %5123 = vmatmul.mubr.bf16.gmra.mxu1 %v6539_v18  ;;  %6092 = vmatprep.mubr.bf16.mxu0 %v8694_v0 }
 0x352   : > { %5130 = vmatprep.mubr.bf16.mxu1 %v6542_v23 }
 0x358   : > { %6093 = vmatmul.mubr.bf16.gmra.mxu0 %v8699_v60 }
 0x359   : > { %5131 = vmatmul.mubr.bf16.gmra.mxu1 %v6545_v14  ;;  %6096 = vmatprep.mubr.bf16.mxu0 %v8707_v38 }
 0x35a   : > { %5138 = vmatprep.mubr.bf16.mxu1 %v6548_v2 }
 0x360   : > { %6097 = vmatmul.mubr.bf16.gmra.mxu0 %v8720_v49 }
 0x361   : > { %5139 = vmatmul.mubr.bf16.gmra.mxu1 %v6550_v50  ;;  %6100 = vmatprep.mubr.bf16.mxu0 %v8728_v22 }
 0x362   : > { %5146 = vmatprep.mubr.bf16.mxu1 %v6552_v28 }
 0x368   : > { %6101 = vmatmul.mubr.bf16.gmra.mxu0 %v6533_v10 }
 0x369   : > { %5147 = vmatmul.mubr.bf16.gmra.mxu1 %v6554_v20  ;;  %6104 = vmatprep.mubr.bf16.mxu0 %v6540_v24 }
 0x36a   : > { %5154 = vmatprep.mubr.bf16.mxu1 %v6556_v8 }
 0x370   : > { %6105 = vmatmul.mubr.bf16.gmra.mxu0 %v6546_v15 }
 0x371   : > { %5155 = vmatmul.mubr.bf16.gmra.mxu1 %v6558_v42 }
 0x372   : > { %5162 = vmatprep.mubr.bf16.mxu1 %v6560_v25 }
 0x379   : > { %5163 = vmatmul.mubr.bf16.gmra.mxu1 %v6562_v17 }
 0x3a1   : > { %v4971_v30 = vpop.f32.mrf.mxu1 }
 0x3a3   : > { %v4973_v43 = vpop.f32.mrf.mxu1 }
 0x3a5   : > { %v4974_v19 = vpop.f32.mrf.mxu1 }
 0x3a7   : > { %v4976_v9 = vpop.f32.mrf.mxu1 }
 0x3a9   : > { %v4979_v27 = vpop.f32.mrf.mxu1 }
 0x3ab   : > { %v4981_v3 = vpop.f32.mrf.mxu1 }
 0x3ad   : > { %v4983_v62 = vpop.f32.mrf.mxu1 }
 0x3af   : > { %v4985_v55 = vpop.f32.mrf.mxu1 }
 0x3b1   : > { %v4989_v47 = vpop.f32.mrf.mxu1 }
 0x3b3   : > { %v4991_v53 = vpop.f32.mrf.mxu1 }
 0x3b5   : > { %v4993_v58 = vpop.f32.mrf.mxu1 }
 0x3b7   : > { %v4995_v35 = vpop.f32.mrf.mxu1 }
 0x3b9   : > { %v4999_v44 = vpop.f32.mrf.mxu1 }
 0x3bb   : > { %v5001_v39 = vpop.f32.mrf.mxu1 }
 0x3bd   : > { %v5003_v0 = vpop.f32.mrf.mxu1 }
 0x3bf   : > { %v5005_v6 = vpop.f32.mrf.mxu1 }
 0x3c0   : > { %v4846_v57 = vpop.f32.mrf.mxu0 }
 0x3c1   : > { %v5009_v41 = vpop.f32.mrf.mxu1  ;;  %v4972_v40 = vadd.f32 %v4971_v30, %v4846_v57 }
 0x3c2   : > { %v4848_v5 = vpop.f32.mrf.mxu0 }
 0x3c3   : > { %v5011_v59 = vpop.f32.mrf.mxu1 }
 0x3c4   : > { %v4849_v60 = vpop.f32.mrf.mxu0 }
 0x3c5   : > { %v5013_v48 = vpop.f32.mrf.mxu1  ;;  %v4975_v7 = vadd.f32 %v4974_v19, %v4849_v60 }
 0x3c6   : > { %v4851_v36 = vpop.f32.mrf.mxu0 }
 0x3c7   : > { %v5015_v21 = vpop.f32.mrf.mxu1 }
 0x3c8   : > { %v4854_v26 = vpop.f32.mrf.mxu0 }
 0x3c9   : > { %v5019_v12 = vpop.f32.mrf.mxu1  ;;  %v4980_v63 = vadd.f32 %v4979_v27, %v4854_v26 }
 0x3ca   : > { %v4856_v45 = vpop.f32.mrf.mxu0 }
 0x3cb   : > { %v5021_v1 = vpop.f32.mrf.mxu1  ;;  %v4982_v38 = vadd.f32 %v4981_v3, %v4856_v45 }
 0x3cc   : > { %v4858_v33 = vpop.f32.mrf.mxu0 }
 0x3cd   : > { %v5023_v13 = vpop.f32.mrf.mxu1  ;;  %v8762_v32 = vadd.f32 %v4982_v38, %v4972_v40  ;;  %v4984_v56 = vadd.f32 %v4983_v62, %v4858_v33 }
 0x3ce   : > { %v4860_v4 = vpop.f32.mrf.mxu0 }
 0x3cf   : > { %v5025_v11 = vpop.f32.mrf.mxu1  ;;  %v4986_v49 = vadd.f32 %v4985_v55, %v4860_v4 }
 0x3d0   : > { %v4864_v37 = vpop.f32.mrf.mxu0 }
 0x3d1   : > { %v5029_v51 = vpop.f32.mrf.mxu1  ;;  %v8764_v61 = vadd.f32 %v4986_v49, %v4975_v7  ;;  %v4990_v31 = vadd.f32 %v4989_v47, %v4864_v37 }
 0x3d2   : > { %v4866_v22 = vpop.f32.mrf.mxu0 }
 0x3d3   : > { %v5031_v34 = vpop.f32.mrf.mxu1  ;;  %v4992_v54 = vadd.f32 %v4991_v53, %v4866_v22 }
 0x3d4   : > { %v4868_v29 = vpop.f32.mrf.mxu0 }
 0x3d5   : > { %v5033_v46 = vpop.f32.mrf.mxu1  ;;  %v8766_v10 = vadd.f32 %v4992_v54, %v4980_v63  ;;  %v4994_v52 = vadd.f32 %v4993_v58, %v4868_v29 }
 0x3d6   : > { %v4870_v16 = vpop.f32.mrf.mxu0 }
 0x3d7   : > { %v5035_v18 = vpop.f32.mrf.mxu1  ;;  %v4996_v24 = vadd.f32 %v4995_v35, %v4870_v16 }
 0x3d8   : > { %v4874_v23 = vpop.f32.mrf.mxu0 }
 0x3d9   : > { %v5039_v14 = vpop.f32.mrf.mxu1  ;;  %v8768_v15 = vadd.f32 %v4996_v24, %v4984_v56  ;;  %v5000_v2 = vadd.f32 %v4999_v44, %v4874_v23 }
 0x3da   : > { %v4876_v50 = vpop.f32.mrf.mxu0 }
 0x3db   : > { %v5041_v28 = vpop.f32.mrf.mxu1  ;;  %v5002_v20 = vadd.f32 %v5001_v39, %v4876_v50 }
 0x3dc   : > { %v4878_v8 = vpop.f32.mrf.mxu0 }
 0x3dd   : > { %v5043_v42 = vpop.f32.mrf.mxu1  ;;  %v8770_v25 = vadd.f32 %v5002_v20, %v4990_v31  ;;  %v5004_v17 = vadd.f32 %v5003_v0, %v4878_v8 }
 0x3de   : > { %v4880_v30 = vpop.f32.mrf.mxu0 }
 0x3df   : > { %v5045_v43 = vpop.f32.mrf.mxu1  ;;  %v5006_v19 = vadd.f32 %v5005_v6, %v4880_v30 }
 0x3e0   : > { %v4884_v9 = vpop.f32.mrf.mxu0 }
 0x3e1   : > { %v5049_v27 = vpop.f32.mrf.mxu1  ;;  %v8772_v3 = vadd.f32 %v5006_v19, %v4994_v52  ;;  %v5010_v62 = vadd.f32 %v5009_v41, %v4884_v9 }
 0x3e2   : > { %v4886_v55 = vpop.f32.mrf.mxu0 }
 0x3e3   : > { %v5050_v47 = vpop.f32.mrf.mxu1  ;;  %v5012_v53 = vadd.f32 %v5011_v59, %v4886_v55 }
 0x3e4   : > { %v4888_v58 = vpop.f32.mrf.mxu0 }
 0x3e5   : > { %v5052_v35 = vpop.f32.mrf.mxu1  ;;  %v8774_v44 = vadd.f32 %v5012_v53, %v5000_v2  ;;  %v5014_v39 = vadd.f32 %v5013_v48, %v4888_v58 }
 0x3e6   : > { %v4890_v57 = vpop.f32.mrf.mxu0 }
 0x3e7   : > { %v5053_v40 = vpop.f32.mrf.mxu1  ;;  %v5016_v5 = vadd.f32 %v5015_v21, %v4890_v57 }
 0x3e8   : > { %v4894_v0 = vpop.f32.mrf.mxu0 }
 0x3e9   : > { %v5057_v60 = vpop.f32.mrf.mxu1  ;;  %v8776_v7 = vadd.f32 %v5016_v5, %v5004_v17  ;;  %v5020_v6 = vadd.f32 %v5019_v12, %v4894_v0 }
 0x3ea   : > { %v4896_v36 = vpop.f32.mrf.mxu0 }
 0x3eb   : > { %v5058_v26 = vpop.f32.mrf.mxu1  ;;  %v5022_v63 = vadd.f32 %v5021_v1, %v4896_v36 }
 0x3ec   : > { %v4898_v41 = vpop.f32.mrf.mxu0 }
 0x3ed   : > { %v5059_v45 = vpop.f32.mrf.mxu1  ;;  %v8778_v38 = vadd.f32 %v5022_v63, %v5010_v62  ;;  %v5024_v59 = vadd.f32 %v5023_v13, %v4898_v41 }
 0x3ee   : > { %v4900_v33 = vpop.f32.mrf.mxu0 }
 0x3ef   : > { %v5060_v56 = vpop.f32.mrf.mxu1  ;;  %v5026_v4 = vadd.f32 %v5025_v11, %v4900_v33 }
 0x3f0   : > { %v4904_v48 = vpop.f32.mrf.mxu0 }
 0x3f1   : > { %v5942_v49 = vpop.f32.mrf.mxu1  ;;  %v8780_v37 = vadd.f32 %v5026_v4, %v5014_v39  ;;  %v5030_v21 = vadd.f32 %v5029_v51, %v4904_v48 }
 0x3f2   : > { %v4906_v31 = vpop.f32.mrf.mxu0 }
 0x3f3   : > { %v5943_v22 = vpop.f32.mrf.mxu1  ;;  %v5032_v54 = vadd.f32 %v5031_v34, %v4906_v31 }
 0x3f4   : > { %v4908_v12 = vpop.f32.mrf.mxu0 }
 0x3f5   : > { %v5945_v29 = vpop.f32.mrf.mxu1  ;;  %v8782_v52 = vadd.f32 %v5032_v54, %v5020_v6  ;;  %v5034_v1 = vadd.f32 %v5033_v46, %v4908_v12 }
 0x3f6   : > { %v4910_v16 = vpop.f32.mrf.mxu0  ;;  %v8801_v29 = vld [vmem:[%s8943_s4] ss:$0 sm:$0xff] }
 0x3f7   : > { %v5946_v24 = vpop.f32.mrf.mxu1  ;;  %v5036_v23 = vadd.f32 %v5035_v18, %v4910_v16 }
 0x3f8   : > { %v4914_v13 = vpop.f32.mrf.mxu0 }
 0x3f9   : > { %v5948_v2 = vpop.f32.mrf.mxu1  ;;  %v8784_v50 = vadd.f32 %v5036_v23, %v5024_v59  ;;  %v5040_v11 = vadd.f32 %v5039_v14, %v4914_v13 }
 0x3fa   : > { %v4916_v20 = vpop.f32.mrf.mxu0  ;;  %v5339_v2 = vld [vmem:[%s8796_s13 + $0x10] sm:$0xff] }
 0x3fb   : > { %v5949_v8 = vpop.f32.mrf.mxu1  ;;  %v5042_v17 = vadd.f32 %v5041_v28, %v4916_v20 }
 0x3fc   : > { %v4918_v51 = vpop.f32.mrf.mxu0 }
 0x3fd   : > { %v5951_v30 = vpop.f32.mrf.mxu1  ;;  %v8786_v19 = vadd.f32 %v5042_v17, %v5030_v21  ;;  %v5044_v34 = vadd.f32 %v5043_v42, %v4918_v51 }
 0x3fe   : > { %v4920_v9 = vpop.f32.mrf.mxu0 }
 0x3ff   : > { %v5952_v27 = vpop.f32.mrf.mxu1  ;;  %v5046_v62 = vadd.f32 %v5045_v43, %v4920_v9 }
 0x400   : > { %v4924_v46 = vpop.f32.mrf.mxu0 }
 0x401   : > { %v5954_v55 = vpop.f32.mrf.mxu1  ;;  %v8788_v53 = vadd.f32 %v5046_v62, %v5034_v1 }
 0x402   : > { %v4925_v18 = vpop.f32.mrf.mxu0 }
 0x403   : > { %v5955_v58 = vpop.f32.mrf.mxu1  ;;  %v5051_v35 = vadd.f32 %v5050_v47, %v4925_v18  ;;  %v5340_v18 = vld [vmem:[%s8796_s13 + $0x18] sm:$0xff] }
 0x404   : > { %v4927_v39 = vpop.f32.mrf.mxu0  ;;  %v5956_v54 = vadd.f32 %v5955_v58, %v5954_v55 }
 0x405   : > { %v5957_v14 = vpop.f32.mrf.mxu1  ;;  %v8790_v57 = vadd.f32 %v5051_v35, %v5040_v11 }
 0x406   : > { %v4928_v28 = vpop.f32.mrf.mxu0 }
 0x407   : > { %v5958_v5 = vpop.f32.mrf.mxu1  ;;  %v5054_v0 = vadd.f32 %v5053_v40, %v4928_v28 }
 0x408   : > { %v4932_v60 = vpop.f32.mrf.mxu0  ;;  %v5959_v30 = vadd.f32 %v5958_v5, %v5957_v14 }
 0x409   : > { %v5960_v6 = vpop.f32.mrf.mxu1  ;;  %v8792_v42 = vadd.f32 %v5054_v0, %v5044_v34  ;;  %v5337_v34 = vld [vmem:[%s8796_s13] sm:$0xff] }
 0x40a   : > { %v4933_v43 = vpop.f32.mrf.mxu0 }
 0x40b   : > { %v5961_v36 = vpop.f32.mrf.mxu1 }
 0x40c   : > { %v4934_v26 = vpop.f32.mrf.mxu0  ;;  %v5962_v21 = vadd.f32 %v5961_v36, %v5960_v6  ;;  %v5338_v36 = vld [vmem:[%s8796_s13 + $0x8] sm:$0xff] }
 0x40d   : > { %v5963_v63 = vpop.f32.mrf.mxu1 }
 0x40e   : > { %v4935_v41 = vpop.f32.mrf.mxu0 }
 0x40f   : > { %v5964_v45 = vpop.f32.mrf.mxu1 }
 0x410   : > { %v6090_v59 = vpop.f32.mrf.mxu0  ;;  %v5965_v24 = vadd.f32 %v5964_v45, %v5963_v63  ;;  %v5343_v45 = vld [vmem:[%s8796_s13 + $0x30] sm:$0xff] }
 0x411   : > { %v5966_v47 = vpop.f32.mrf.mxu1 }
 0x412   : > { %v5205_v56 = vpop.f32.mrf.mxu0 }
 0x413   : > { %v5967_v33 = vpop.f32.mrf.mxu1 }
 0x414   : > { %v6091_v48 = vpop.f32.mrf.mxu0  ;;  %v5968_v28 = vadd.f32 %v5967_v33, %v5966_v47 }
 0x415   : > { %v5969_v4 = vpop.f32.mrf.mxu1 }
 0x416   : > { %v5207_v40 = vpop.f32.mrf.mxu0 }
 0x417   : > { %v5970_v49 = vpop.f32.mrf.mxu1 }
 0x418   : > { %v6094_v22 = vpop.f32.mrf.mxu0  ;;  %v5971_v48 = vadd.f32 %v5970_v49, %v5969_v4 }
 0x419   : > { %v5972_v31 = vpop.f32.mrf.mxu1  ;;  %v5226_v12 = vadd.f32 %v6094_v22, %v5962_v21  ;;  %v5341_v21 = vld [vmem:[%s8796_s13 + $0x20] sm:$0xff] }
 0x41a   : > { %v5217_v16 = vpop.f32.mrf.mxu0 }
 0x41b   : > { %v5973_v1 = vpop.f32.mrf.mxu1  ;;  %v5298_v23 = vadd.f32 %v8766_v10, %v5226_v12  ;;  %v5218_v13 = vadd.f32 %v5956_v54, %v5217_v16 }
 0x41c   : > { %v6095_v20 = vpop.f32.mrf.mxu0  ;;  %v5974_v46 = vadd.f32 %v5973_v1, %v5972_v31  ;;  %v5344_v1 = vld [vmem:[%s8796_s13 + $0x38] sm:$0xff] }
 0x41d   : > { %v5975_v11 = vpop.f32.mrf.mxu1  ;;  %v5321_v8 = vadd.f32 %v8801_v29, %v5298_v23  ;;  %v5296_v17 = vadd.f32 %v8762_v32, %v5218_v13  ;;  %v5229_v51 = vadd.f32 %v6095_v20, %v5965_v24 }
 0x41e   : > { %v5220_v27 = vpop.f32.mrf.mxu0 }
 0x41f   : > { %v5976_v9 = vpop.f32.mrf.mxu1  ;;  %v5355_v62 = vadd.f32 %v5339_v2, %v5321_v8  ;;  %v5319_v10 = vadd.f32 %v8801_v29, %v5296_v17  ;;  %v5299_v55 = vadd.f32 %v8768_v15, %v5229_v51  ;;  %v5221_v58 = vadd.f32 %v5959_v30, %v5220_v27  ;;  %v5342_v8 = vld [vmem:[%s8796_s13 + $0x28] sm:$0xff] }
 0x420   : > { %v6098_v39 = vpop.f32.mrf.mxu0  ;;  %v5977_v43 = vadd.f32 %v5976_v9, %v5975_v11 }
 0x421   : > { %v5978_v35 = vpop.f32.mrf.mxu1  ;;  %5371 = vst [vmem:[%s6984_s10 + $0x10] sm:$0xff] %v5355_v62  ;;  %v5353_v32 = vadd.f32 %v5337_v34, %v5319_v10  ;;  %v5322_v14 = vadd.f32 %v8801_v29, %v5299_v55  ;;  %v5242_v5 = vadd.f32 %v6098_v39, %v5974_v46  ;;  %v5297_v0 = vadd.f32 %v8764_v61, %v5221_v58  ;;  %v5345_v46 = vld [vmem:[%s8796_s13 + $0x40] sm:$0xff] }
 0x422   : > { %v5233_v6 = vpop.f32.mrf.mxu0 }
 0x423   : > { %v5979_v60 = vpop.f32.mrf.mxu1  ;;  %5369 = vst [vmem:[%s6984_s10] sm:$0xff] %v5353_v32  ;;  %v5356_v15 = vadd.f32 %v5340_v18, %v5322_v14  ;;  %v5302_v26 = vadd.f32 %v8774_v44, %v5242_v5  ;;  %v5234_v63 = vadd.f32 %v5968_v28, %v5233_v6  ;;  %v5320_v41 = vadd.f32 %v8801_v29, %v5297_v0  ;;  %v5347_v28 = vld [vmem:[%s8796_s13 + $0x50] sm:$0xff]  ;;  %v5346_v6 = vld [vmem:[%s8796_s13 + $0x48] sm:$0xff] }
 0x424   : > { %v6099_v59 = vpop.f32.mrf.mxu0 }
 0x425   : > { %v5981_v47 = vpop.f32.mrf.mxu1  ;;  %5372 = vst [vmem:[%s6984_s10 + $0x18] sm:$0xff] %v5356_v15  ;;  %v5325_v61 = vadd.f32 %v8801_v29, %v5302_v26  ;;  %v5300_v33 = vadd.f32 %v8770_v25, %v5234_v63  ;;  %v5245_v56 = vadd.f32 %v6099_v59, %v5977_v43  ;;  %v5354_v40 = vadd.f32 %v5338_v36, %v5320_v41  ;;  %v5348_v41 = vld [vmem:[%s8796_s13 + $0x58] sm:$0xff] }
 0x426   : > { %v5236_v44 = vpop.f32.mrf.mxu0  ;;  %v5980_v25 = vadd.f32 %v5979_v60, %v5978_v35 }
 0x427   : > { %v5982_v31 = vpop.f32.mrf.mxu1  ;;  %v5359_v22 = vadd.f32 %v5343_v45, %v5325_v61  ;;  %v5323_v54 = vadd.f32 %v8801_v29, %v5300_v33  ;;  %v5303_v12 = vadd.f32 %v8776_v7, %v5245_v56  ;;  %5370 = vst [vmem:[%s6984_s10 + $0x8] sm:$0xff] %v5354_v40  ;;  %v5237_v16 = vadd.f32 %v5971_v48, %v5236_v44 }
 0x428   : > { %v6102_v23 = vpop.f32.mrf.mxu0  ;;  %v5983_v9 = vadd.f32 %v5982_v31, %v5981_v47 }
 0x429   : > { %v5984_v24 = vpop.f32.mrf.mxu1  ;;  %5375 = vst [vmem:[%s6984_s10 + $0x30] sm:$0xff] %v5359_v22  ;;  %v5357_v4 = vadd.f32 %v5341_v21, %v5323_v54  ;;  %v5326_v49 = vadd.f32 %v8801_v29, %v5303_v12  ;;  %v5301_v13 = vadd.f32 %v8772_v3, %v5237_v16  ;;  %v5349_v21 = vld [vmem:[%s8796_s13 + $0x60] sm:$0xff] }
 0x42a   : > { %v5249_v11 = vpop.f32.mrf.mxu0 }
 0x42b   : > { %v5985_v2 = vpop.f32.mrf.mxu1  ;;  %5373 = vst [vmem:[%s6984_s10 + $0x20] sm:$0xff] %v5357_v4  ;;  %v5360_v20 = vadd.f32 %v5344_v1, %v5326_v49  ;;  %v5250_v17 = vadd.f32 %v5980_v25, %v5249_v11  ;;  %v5324_v51 = vadd.f32 %v8801_v29, %v5301_v13  ;;  %v5351_v11 = vld [vmem:[%s8796_s13 + $0x70] sm:$0xff] }
 0x42c   : > { %v5986_v7 = vadd.f32 %v5985_v2, %v5984_v24  ;;  %v6103_v34 = vpop.f32.mrf.mxu0  ;;  %v5350_v24 = vld [vmem:[%s8796_s13 + $0x68] sm:$0xff] }
 0x42d   : > { %v5987_v30 = vpop.f32.mrf.mxu1  ;;  %5376 = vst [vmem:[%s6984_s10 + $0x38] sm:$0xff] %v5360_v20  ;;  %v5304_v62 = vadd.f32 %v8778_v38, %v5250_v17  ;;  %v5358_v3 = vadd.f32 %v5342_v8, %v5324_v51  ;;  %v5352_v17 = vld [vmem:[%s8796_s13 + $0x78] sm:$0xff]  ;;  %s6648_s13 = sshll.u32 %s6779_s3, 4  ;;  %s6649_s13 = int_to_ptr.vmem [resolvable:$false] %s6648_s13 }
 0x42e   : > { %v5258_v27 = vadd.f32 %v6102_v23, %v5986_v7  ;;  %v5252_v55 = vpop.f32.mrf.mxu0  ;;  %s6650_s14 = scalar_lea.vmem %s6649_s13, 4096  ;;  %p6651_p4 = scmp.lt.s32.totalorder %s8874_s9, %s6649_s13 }
 0x42f   : > { %v5988_v10 = vpop.f32.mrf.mxu1  ;;  %v5327_v58 = vadd.f32 %v8801_v29, %v5304_v62  ;;  %v5253_v39 = vadd.f32 %v5983_v9, %v5252_v55  ;;  %5374 = vst [vmem:[%s6984_s10 + $0x28] sm:$0xff] %v5358_v3  ;;  %p6652_p6 = scmp.lt.s32.totalorder %s6650_s14, %s6644_s1 }
 0x430   : > { %v5306_v18 = vadd.f32 %v8782_v52, %v5258_v27  ;;  %v5989_v35 = vadd.f32 %v5988_v10, %v5987_v30  ;;  %v6106_v14 = vpop.f32.mrf.mxu0 }
 0x431   : > { %v5990_v32 = vpop.f32.mrf.mxu1  ;;  %v5361_v5 = vadd.f32 %v5345_v46, %v5327_v58  ;;  %v5305_v60 = vadd.f32 %v8780_v37, %v5253_v39  ;;  %p6653_p5 = por %p6652_p6, %p6651_p4 }
 0x432   : > { %v5329_v38 = vadd.f32 %v8801_v29, %v5306_v18  ;;  %v5261_v0 = vadd.f32 %v6103_v34, %v5989_v35  ;;  %v5265_v52 = vpop.f32.mrf.mxu0 }
 0x433   : > { %v5991_v15 = vpop.f32.mrf.mxu1  ;;  %5377 = vst [vmem:[%s6984_s10 + $0x40] sm:$0xff] %v5361_v5  ;;  %v5328_v26 = vadd.f32 %v8801_v29, %v5305_v60  ;;  %p6654_p1 = pnand %p6653_p5, %p6647_p2 }
 0x434   : > { %v5363_v43 = vadd.f32 %v5347_v28, %v5329_v38  ;;  %v5307_v36 = vadd.f32 %v8784_v50, %v5261_v0  ;;  %v5992_v63 = vadd.f32 %v5991_v15, %v5990_v32  ;;  %v6107_v47 = vpop.f32.mrf.mxu0 }
 0x435   : > { %v5993_v45 = vpop.f32.mrf.mxu1  ;;  %v5362_v37 = vadd.f32 %v5346_v6, %v5328_v26 }
 0x436   : > { %5379 = vst [vmem:[%s6984_s10 + $0x50] sm:$0xff] %v5363_v43  ;;  %v5330_v59 = vadd.f32 %v8801_v29, %v5307_v36  ;;  %v5266_v61 = vadd.f32 %v5992_v63, %v5265_v52  ;;  %v5268_v56 = vpop.f32.mrf.mxu0 }
 0x437   : > { %v5994_v33 = vpop.f32.mrf.mxu1  ;;  %5378 = vst [vmem:[%s6984_s10 + $0x48] sm:$0xff] %v5362_v37 }
 0x438   : > { %v5364_v48 = vadd.f32 %v5348_v41, %v5330_v59  ;;  %v5308_v50 = vadd.f32 %v8786_v19, %v5266_v61  ;;  %v5995_v40 = vadd.f32 %v5994_v33, %v5993_v45 }
 0x439   : > { %v5996_v31 = vpop.f32.mrf.mxu1 }
 0x43a   : > { %5380 = vst [vmem:[%s6984_s10 + $0x58] sm:$0xff] %v5364_v48  ;;  %v5331_v44 = vadd.f32 %v8801_v29, %v5308_v50  ;;  %v5269_v22 = vadd.f32 %v5995_v40, %v5268_v56 }
 0x43b   : > { %v5997_v54 = vpop.f32.mrf.mxu1 }
 0x43c   : > { %v5365_v12 = vadd.f32 %v5349_v21, %v5331_v44  ;;  %v5309_v1 = vadd.f32 %v8788_v53, %v5269_v22  ;;  %v5998_v16 = vadd.f32 %v5997_v54, %v5996_v31 }
 0x43d   : > { %v5999_v23 = vpop.f32.mrf.mxu1 }
 0x43e   : > { %5381 = vst [vmem:[%s6984_s10 + $0x60] sm:$0xff] %v5365_v12  ;;  %v5332_v19 = vadd.f32 %v8801_v29, %v5309_v1  ;;  %v5274_v25 = vadd.f32 %v6106_v14, %v5998_v16 }
 0x43f   : > { %v6000_v4 = vpop.f32.mrf.mxu1 }
 0x440   : > { %v5366_v49 = vadd.f32 %v5350_v24, %v5332_v19  ;;  %v5310_v13 = vadd.f32 %v8790_v57, %v5274_v25  ;;  %v6001_v2 = vadd.f32 %v6000_v4, %v5999_v23 }
 0x442   : > { %5382 = vst [vmem:[%s6984_s10 + $0x68] sm:$0xff] %v5366_v49  ;;  %v5333_v53 = vadd.f32 %v8801_v29, %v5310_v13  ;;  %v5277_v20 = vadd.f32 %v6107_v47, %v6001_v2 }
 0x444   : > { %v5367_v8 = vadd.f32 %v5351_v11, %v5333_v53  ;;  %v5311_v7 = vadd.f32 %v8792_v42, %v5277_v20 }
 0x446   : > { %5383 = vst [vmem:[%s6984_s10 + $0x70] sm:$0xff] %v5367_v8  ;;  %v5334_v51 = vadd.f32 %v8801_v29, %v5311_v7 }
 0x448   : > { %v5368_v57 = vadd.f32 %v5352_v17, %v5334_v51 }
 0x44a   : > { %5384 = vst [vmem:[%s6984_s10 + $0x78] sm:$0xff] %v5368_v57 }
 0x44b   : > { %6657 = shalt.err (!%p6654_p1)
}
 0x44c   : > { %s6658_s25 = scalar_lea.hbm %s8872_s17, 2048  ;;  %s6662_s7 = scalar_lea.hbm %s9029_s11, 8192 }
 0x44d   : > { %p6659_p7 = scmp.ne.s32.totalorder %s8872_s17, %s6658_s25  ;;  %p6663_p0 = scmp.lt.s32.totalorder %s8872_s17, %s9029_s11 }
 0x44e   : > { %p6664_p8 = scmp.lt.s32.totalorder %s6662_s7, %s6658_s25 }
 0x44f   : > { %p6660_p9 = pnand %p6659_p7, %p9030_p10 }
 0x450   : > { %p6665_p11 = por %p6664_p8, %p6663_p0 }
 0x451   : > { %p6661_p13 = pneg %p6660_p9 }
 0x453   : > { %p6666_p3 = pnand %p6665_p11, %p6661_p13 }
 0x455   : > { %6669 = shalt.err (!%p6666_p3)
}
 0x456   : > { %s6780_s29 = smov 128   ;;  %s6781_s24 = smov 8  }
 0x457   : > { %6118 = dma.vmem_to_hbm [thread:$0]  (%p9030_p10), %s8874_s9, 2048, %s8872_s17, %s8879_s12, %s6780_s29, %s6780_s29, %s6781_s24  }
 0x458 PF: > { %s9031_s6 = sld [smem:[#allocation13_spill]]  ;;  %p6140_p12 = scmp.ge.s32.totalorder %s6768_s28, 2 }
 0x459   : > { %s9032_s8 = sld [smem:[#allocation17_spill]] }
 0x45e   : > { %s5417_s1 = sand.u32 1, %s9031_s6  }
 0x45f   : > { %p9033_p2 = scmp.ne.s32.totalorder %s9032_s8, 0  ;;  %s5418_s3 = scalar_lea.sflag [#allocation5], %s5417_s1 }
 0x461   : > { %p6132_p4 = pnand %p6140_p12, %p9033_p2 }
 0x463   : > { %p6133_p6 = pneg %p6132_p4 }
 0x465   : > { %6723 = dma.done.wait (%p6133_p6), %s5418_s3, 2048  }
 0x466   : > { %6725 = vsyncadd (%p6133_p6), %s5418_s3, 4294965248  ;;  %s22_s28 = sadd.s32 1, %s6768_s28   ;;  %s9034_s15 = smov %s6949_s18 }
 0x467   : > { %p19_p5 = scmp.ge.s32.totalorder %s22_s28, 6   ;;  %s9035_s24 = sld [smem:[#allocation15_spill]] }
 0x468   : > { %s9036_s9 = sld [smem:[#allocation18_spill]]  ;;  %s9037_s18 = smov %s6732_s19 }
 0x469   : > { %s9038_s19 = smov %s6736_s20  ;;  %s9039_s20 = smov %s6954_s26 }
 0x46a   : > { %s9040_s21 = smov %s6744_s22  ;;  %s9041_s22 = smov %s6748_s23 }
 0x46b   : > { %s9042_s23 = smov %s9034_s15  ;;  %s9043_s25 = smov %s6764_s27 }
 0x46c   : > { %s9045_s27 = smov %s9051_s30  ;;  %21 = sbr.rel (!%p19_p5) target bundleno = 14 (0xe), region = 101 }
 0x46e   : > { %s9044_s26 = smov %s9036_s9 }
 0x471   :  { %5423 = vsyncpa [#allocation4], 1 }
 0x472   :  { %5425 = vsyncpa [#allocation4 + $0x1], 1 }
 0x473   :  { %5426 = vsyncpa [#allocation7], 1 }
 0x474   :  { %5427 = vsyncpa [#allocation5], 1 }
 0x475   :  { %5429 = vsyncpa [#allocation5 + $0x1], 1 }

</bundles_post_ra>
